<compile_context>
chip_gen: v6e
topology: v6e:2x2x1
jax: 0.10.0
libtpu: 0.0.40
codegen_flags: <defaults>
</compile_context>

<pallas_src>
import numpy as np
import jax
import jax.numpy as jnp
from jax.experimental import pallas as pl
from jax.experimental.pallas import tpu as pltpu


# ---------------------------------------------------------------------------
# Compact (module-equivalent) parameter init
# ---------------------------------------------------------------------------

def init_temporal(key, Kt, c_in, c_out, act):
    ctot = 2 * c_out if act == 'glu' else c_out
    k1, k2, k3 = jax.random.split(key, 3)
    scale = 1.0 / np.sqrt(Kt * c_in)
    p = {
        'Kt': Kt, 'c_out': c_out, 'act': act,
        'w': jax.random.normal(k1, (Kt, c_in, ctot), jnp.float32) * scale,
        'b': jax.random.normal(k2, (1, ctot), jnp.float32) * 0.01,
    }
    if act != 'linear' and c_in > c_out:
        p['w_align'] = jax.random.normal(k3, (c_in, c_out), jnp.float32) / np.sqrt(c_in)
    return p


def init_spatial(key, Ks, c, Lk):
    k1, k2 = jax.random.split(key)
    return {
        'Lk': Lk,
        'theta': jax.random.normal(k1, (Ks, c, c), jnp.float32) / np.sqrt(Ks * c),
        'b': jax.random.normal(k2, (1, c), jnp.float32) * 0.01,
    }


def init_ln(N, C):
    return {'gamma': jnp.ones((N, C), jnp.float32),
            'beta': jnp.zeros((N, C), jnp.float32)}


def init_st_block(key, Ks, Kt, ch, Lk, N, act):
    c_in, c_hid, c_out = ch
    k1, k2, k3 = jax.random.split(key, 3)
    return {
        'tconv1': init_temporal(k1, Kt, c_in, c_hid, act),
        'sconv': init_spatial(k2, Ks, c_hid, Lk),
        'tconv2': init_temporal(k3, Kt, c_hid, c_out, 'relu'),
        'ln': init_ln(N, c_out),
    }


def init_output_layer(key, Ko, c, N):
    k1, k2, k3 = jax.random.split(key, 3)
    return {
        'tconv1': init_temporal(k1, Ko, c, c, 'glu'),
        'ln': init_ln(N, c),
        'tconv2': init_temporal(k2, 1, c, c, 'sigmoid'),
        'fc': init_temporal(k3, 1, c, 1, 'linear'),
    }


def init_stgcn(key, n_hist, Ks, Kt, blocks, kernels, N, act_func='glu'):
    keys = jax.random.split(key, len(blocks) + 1)
    st_blocks = []
    Ko = n_hist
    for i, ch in enumerate(blocks):
        st_blocks.append(init_st_block(keys[i], Ks, Kt, ch, kernels[i], N, act_func))
        Ko -= 2 * (Kt - 1)
    if Ko <= 1:
        raise ValueError(f'[ERROR] Kernel size Ko must be greater than 1, but received {Ko}')
    c_last = blocks[-1][-1]
    return {'st_blocks': st_blocks, 'output': init_output_layer(keys[-1], Ko, c_last, N)}


# ---------------------------------------------------------------------------
# Host-side weight folding into the lane-dense [rows, N*C] layout.
#   flattened channel index = n*C + c  (c fastest), matching x.reshape(..., N*C)
# ---------------------------------------------------------------------------

def _expand_temporal_weight(w, N):
    # w: [Kt, Cin, Cout] -> W[(k, n, ci), (n', co)] = w[k, ci, co] * I[n, n']
    Kt, Cin, Cout = w.shape
    eye = jnp.eye(N, dtype=w.dtype)
    W = jnp.einsum('kio,nm->knimo', w, eye)
    return W.reshape(Kt * N * Cin, N * Cout)


def _align_matrix(c_in, c_out, N, w_align=None):
    # identity (c_in==c_out), zero-pad (c_in<c_out) or 1x1 conv (c_in>c_out)
    A = w_align if w_align is not None else jnp.eye(c_in, c_out, dtype=jnp.float32)
    return jnp.kron(jnp.eye(N, dtype=A.dtype), A)            # [N*Cin, N*Cout]


def prepare_temporal(p, N, w_dtype):
    Kt, act, c_out = p['Kt'], p['act'], p['c_out']
    w, b = p['w'], p['b']                                     # [Kt,Cin,Ctot], [1,Ctot]
    c_in = w.shape[1]
    if act == 'glu':
        wp = _expand_temporal_weight(w[:, :, :c_out], N)      # value half
        wq = _expand_temporal_weight(w[:, :, c_out:], N)      # gate half
        # Fold the time-cropped, channel-aligned residual into the last tap's
        # rows of the VALUE half: (conv_p(x) + align(x[:,Kt-1:])) * sigmoid(conv_q(x))
        P = _align_matrix(c_in, c_out, N, p.get('w_align'))
        wp = wp.at[(Kt - 1) * N * c_in:, :].add(P)
        # ONE fused value|gate matmul: concat along the output-lane axis.
        W = jnp.concatenate([wp, wq], axis=1)                 # [Kt*N*Cin, 2*N*Cout]
        bias = jnp.concatenate([jnp.tile(b[0, :c_out], N),
                                jnp.tile(b[0, c_out:], N)])[None, :].astype(jnp.float32)
    else:
        W = _expand_temporal_weight(w, N)
        bias = jnp.tile(b[0], N)[None, :].astype(jnp.float32)
        if act != 'linear':
            P = _align_matrix(c_in, c_out, N, p.get('w_align'))
            W = W.at[(Kt - 1) * N * c_in:, :].add(P)
    return ('tconv', {'Kt': Kt, 'act': act}), {'w': W.astype(w_dtype), 'b': bias}


def prepare_spatial(p, N, w_dtype):
    Lk, theta, b = p['Lk'], p['theta'], p['b']
    C = theta.shape[1]
    # W[(n,ci),(m,co)] = sum_k Lk[k,m,n] * theta[k,ci,co]  (one matmul per layer)
    W = jnp.einsum('kmn,kio->nimo', Lk, theta).reshape(N * C, N * C)
    W = W + jnp.eye(N * C, dtype=W.dtype)                     # fold "+ x" residual
    b_t = jnp.tile(b[0], N)[None, :].astype(jnp.float32)
    return ('sconv', {}), {'w': W.astype(w_dtype), 'b': b_t}


def prepare_ln(p):
    return ('ln', {}), {'g': p['gamma'].reshape(1, -1).astype(jnp.float32),
                        'b': p['beta'].reshape(1, -1).astype(jnp.float32)}


def prepare_stgcn(params, N, w_dtype=jnp.bfloat16):
    plan, arrays = [], []

    def add(item):
        plan.append(item[0]); arrays.append(item[1])

    for blk in params['st_blocks']:
        add(prepare_temporal(blk['tconv1'], N, w_dtype))
        add(prepare_spatial(blk['sconv'], N, w_dtype))
        add(prepare_temporal(blk['tconv2'], N, w_dtype))
        add(prepare_ln(blk['ln']))
        # TODO(synk): nn.Dropout is identity at p=0.0 / eval; training dropout not implemented.
    out = params['output']
    add(prepare_temporal(out['tconv1'], N, w_dtype))
    add(prepare_ln(out['ln']))
    add(prepare_temporal(out['tconv2'], N, w_dtype))
    add(prepare_temporal(out['fc'], N, w_dtype))
    return plan, arrays


# ---------------------------------------------------------------------------
# In-kernel ops.  Activations live as a 2-D lane-dense slab h: [B*T_cur, N*C]
# (f32), rows packed per sample: row index = b*T_cur + t.  Batch is folded
# into the matmul M dimension.
# ---------------------------------------------------------------------------

def _k_temporal(h, a, Kt, act, B, T_cur):
    T_out = T_cur - Kt + 1
    if Kt > 1:
        # im2col over time, per sample, stacked along rows -> [B*T_out, Kt*NC]
        per_sample = []
        for b in range(B):
            base = b * T_cur
            per_sample.append(jnp.concatenate(
                [h[base + k: base + k + T_out, :] for k in range(Kt)], axis=1))
        cols = jnp.concatenate(per_sample, axis=0)
    else:
        cols = h
    w = a['w'][...]
    y = jnp.dot(cols.astype(w.dtype), w, preferred_element_type=jnp.float32)
    y = y + a['b'][...]
    if act == 'glu':
        # fused value|gate matmul; split at N*Cout (a multiple of 128 -> free)
        half = y.shape[-1] // 2
        y = y[:, :half] * jax.nn.sigmoid(y[:, half:])   # residual folded into value half
    elif act == 'relu':
        y = jnp.maximum(y, 0.0)
    elif act == 'sigmoid':
        y = jax.nn.sigmoid(y)
    # 'linear' (final 1x1 FC): no activation, no residual
    return y, T_out


def _k_spatial(h, a):
    w = a['w'][...]
    y = jnp.dot(h.astype(w.dtype), w, preferred_element_type=jnp.float32) + a['b'][...]
    return jnp.maximum(y, 0.0)                    # "+ x" residual folded into w


def _k_layernorm(h, a):
    # LayerNorm([N, C]) == normalize over the flattened N*C lane axis
    mu = jnp.mean(h, axis=-1, keepdims=True)
    var = jnp.mean((h - mu) ** 2, axis=-1, keepdims=True)
    hn = (h - mu) * jax.lax.rsqrt(var + 1e-5)
    return hn * a['g'][...] + a['b'][...]


# ---------------------------------------------------------------------------
# Fused forward: ONE pallas_call, ONE grid step (batch folded into matmul M)
# ---------------------------------------------------------------------------

def build_stgcn_forward(plan, arrays, B, T, N, C0):
    leaves, treedef = jax.tree_util.tree_flatten(arrays)
    NC0 = N * C0

    def kernel(x_ref, *refs):
        o_ref = refs[-1]
        p_refs = jax.tree_util.tree_unflatten(treedef, list(refs[:-1]))
        h = x_ref[...].astype(jnp.float32)                   # [B*T, N*C0]
        T_cur = T
        for (op, cfg), a in zip(plan, p_refs):
            if op == 'tconv':
                h, T_cur = _k_temporal(h, a, cfg['Kt'], cfg['act'], B, T_cur)
            elif op == 'sconv':
                h = _k_spatial(h, a)
            else:                                            # 'ln'
                h = _k_layernorm(h, a)
        o_ref[...] = h.astype(o_ref.dtype)                   # h: [B, N] (T_cur == 1)

    def _zero_map(nd):
        return lambda i: (0,) * nd

    # Single grid step -> constant weight inputs are loaded exactly once
    # (no cross-step pipelining, so no double-buffer waste / no need for
    # pl.Buffered(1)).
    in_specs = [pl.BlockSpec((B * T, NC0), lambda i: (0, 0))]
    in_specs += [pl.BlockSpec(l.shape, _zero_map(l.ndim)) for l in leaves]
    out_specs = pl.BlockSpec((B, N), lambda i: (0, 0))

    call = pl.pallas_call(
        kernel,
        out_shape=jax.ShapeDtypeStruct((B, N), jnp.float32),
        grid=(1,),
        in_specs=in_specs,
        out_specs=out_specs,
        compiler_params=pltpu.CompilerParams(
            dimension_semantics=("arbitrary",),
            vmem_limit_bytes=32 * 1024 * 1024,
        ),
    )

    @jax.jit
    def forward(x):                                          # x: [B, T, N, C0]
        xv = x.reshape(B * T, NC0)                           # free: contiguous layout
        y = call(xv, *leaves)
        return y.reshape(B, 1, N, 1)

    return forward


# ---------------------------------------------------------------------------
# Pure-JAX f32 reference (compact weights) for a correctness cross-check
# ---------------------------------------------------------------------------

def reference_forward(params, x):
    def temporal(p, x):
        Kt, c_out, act = p['Kt'], p['c_out'], p['act']
        Cin = x.shape[-1]
        T_out = x.shape[1] - Kt + 1
        acc = p['b'][0]
        out = None
        for k in range(Kt):
            term = jnp.einsum('btnc,cd->btnd', x[:, k:k + T_out], p['w'][k])
            out = term if out is None else out + term
        out = out + acc
        if act == 'linear':
            return out
        x_crop = x[:, Kt - 1:]
        if Cin > c_out:
            res = jnp.einsum('btnc,co->btno', x_crop, p['w_align'])
        elif Cin < c_out:
            pad = jnp.zeros(x_crop.shape[:-1] + (c_out - Cin,), x.dtype)
            res = jnp.concatenate([x_crop, pad], axis=-1)
        else:
            res = x_crop
        if act == 'glu':
            return (out[..., :c_out] + res) * jax.nn.sigmoid(out[..., c_out:])
        if act == 'relu':
            return jnp.maximum(out + res, 0.0)
        return jax.nn.sigmoid(out + res)

    def spatial(p, x):
        y = jnp.einsum('kmn,btnc,kcd->btmd', p['Lk'], x, p['theta']) + p['b'][0]
        return jnp.maximum(y + x, 0.0)

    def ln(p, x):
        mu = jnp.mean(x, axis=(2, 3), keepdims=True)
        var = jnp.mean((x - mu) ** 2, axis=(2, 3), keepdims=True)
        return (x - mu) * jax.lax.rsqrt(var + 1e-5) * p['gamma'] + p['beta']

    out = x
    for blk in params['st_blocks']:
        out = temporal(blk['tconv1'], out)
        out = spatial(blk['sconv'], out)
        out = temporal(blk['tconv2'], out)
        out = ln(blk['ln'], out)
    o = params['output']
    out = temporal(o['tconv1'], out)
    out = ln(o['ln'], out)
    out = temporal(o['tconv2'], out)
    out = temporal(o['fc'], out)
    return out


def cheb_graph_kernels(N, Ks):
    """Deterministic Chebyshev graph kernels [Ks, N, N] from a ring graph."""
    A = np.zeros((N, N), np.float32)
    for i in range(N):
        A[i, (i + 1) % N] = 1.0
        A[i, (i - 1) % N] = 1.0
    d_inv_sqrt = np.diag(1.0 / np.sqrt(A.sum(axis=1)))
    L = np.eye(N, dtype=np.float32) - d_inv_sqrt @ A @ d_inv_sqrt
    Lt = (L - np.eye(N, dtype=np.float32)).astype(np.float32)
    polys = [np.eye(N, dtype=np.float32)]
    if Ks > 1:
        polys.append(Lt)
    for _ in range(2, Ks):
        polys.append(2.0 * Lt @ polys[-1] - polys[-2])
    return jnp.asarray(np.stack(polys[:Ks], axis=0), dtype=jnp.float32)


if __name__ == "__main__":
    B, n_hist, N = 2, 12, 16
    Ks, Kt = 3, 3
    blocks = [[4, 8, 8], [8, 8, 16]]                # Ko = 12 - 2*2*(Kt-1) = 4 > 1
    Lk = cheb_graph_kernels(N, Ks)
    graph_kernels = [Lk for _ in blocks]

    root = jax.random.PRNGKey(0)
    pkey, xkey = jax.random.split(root)
    params = init_stgcn(pkey, n_hist, Ks, Kt, blocks, graph_kernels, N, act_func='glu')
    x = jax.random.normal(xkey, (B, n_hist, N, blocks[0][0]), jnp.float32)

    plan, arrays = prepare_stgcn(params, N, w_dtype=jnp.bfloat16)
    forward = build_stgcn_forward(plan, arrays, B, n_hist, N, blocks[0][0])

    y = jax.block_until_ready(forward(x))
    assert y.shape == (B, 1, N, 1), y.shape
    assert bool(jnp.all(jnp.isfinite(y)))

    # Cross-check against the f32 compact-weight reference (bf16 matmul weights
    # in the kernel => loose tolerance; catches structural / folding mistakes).
    y_ref = reference_forward(params, x)
    err = float(jnp.max(jnp.abs(y - y_ref)))
    assert err < 0.15, f"max abs diff vs reference: {err}"

    print("KERNEL_OK")
</pallas_src>

<mosaic_0001>
module attributes {stable_mosaic.version = 11 : i64} {
  func.func @kernel(%arg0: i32, %arg1: memref<24x64xf32, #tpu.memory_space<vmem>>, %arg2: memref<1x256xf32, #tpu.memory_space<vmem>>, %arg3: memref<192x256xbf16, #tpu.memory_space<vmem>>, %arg4: memref<1x128xf32, #tpu.memory_space<vmem>>, %arg5: memref<128x128xbf16, #tpu.memory_space<vmem>>, %arg6: memref<1x128xf32, #tpu.memory_space<vmem>>, %arg7: memref<384x128xbf16, #tpu.memory_space<vmem>>, %arg8: memref<1x128xf32, #tpu.memory_space<vmem>>, %arg9: memref<1x128xf32, #tpu.memory_space<vmem>>, %arg10: memref<1x256xf32, #tpu.memory_space<vmem>>, %arg11: memref<384x256xbf16, #tpu.memory_space<vmem>>, %arg12: memref<1x128xf32, #tpu.memory_space<vmem>>, %arg13: memref<128x128xbf16, #tpu.memory_space<vmem>>, %arg14: memref<1x256xf32, #tpu.memory_space<vmem>>, %arg15: memref<384x256xbf16, #tpu.memory_space<vmem>>, %arg16: memref<1x256xf32, #tpu.memory_space<vmem>>, %arg17: memref<1x256xf32, #tpu.memory_space<vmem>>, %arg18: memref<1x512xf32, #tpu.memory_space<vmem>>, %arg19: memref<1024x512xbf16, #tpu.memory_space<vmem>>, %arg20: memref<1x256xf32, #tpu.memory_space<vmem>>, %arg21: memref<1x256xf32, #tpu.memory_space<vmem>>, %arg22: memref<1x256xf32, #tpu.memory_space<vmem>>, %arg23: memref<256x256xbf16, #tpu.memory_space<vmem>>, %arg24: memref<1x16xf32, #tpu.memory_space<vmem>>, %arg25: memref<256x16xbf16, #tpu.memory_space<vmem>>, %arg26: memref<2x16xf32, #tpu.memory_space<vmem>>) attributes {dimension_semantics = [#tpu.dimension_semantics<arbitrary>], iteration_bounds = array<i64: 1>, scalar_prefetch = 0 : i64, scratch_operands = 0 : i64, tpu.core_type = #tpu.core_type<tc>, window_params = [{pipeline_mode = #tpu.pipeline_mode<synchronous>, transform_indices = @transform_0, window_bounds = array<i64: 24, 64>}, {pipeline_mode = #tpu.pipeline_mode<synchronous>, transform_indices = @transform_1, window_bounds = array<i64: 1, 256>}, {pipeline_mode = #tpu.pipeline_mode<synchronous>, transform_indices = @transform_2, window_bounds = array<i64: 192, 256>}, {pipeline_mode = #tpu.pipeline_mode<synchronous>, transform_indices = @transform_3, window_bounds = array<i64: 1, 128>}, {pipeline_mode = #tpu.pipeline_mode<synchronous>, transform_indices = @transform_4, window_bounds = array<i64: 128, 128>}, {pipeline_mode = #tpu.pipeline_mode<synchronous>, transform_indices = @transform_5, window_bounds = array<i64: 1, 128>}, {pipeline_mode = #tpu.pipeline_mode<synchronous>, transform_indices = @transform_6, window_bounds = array<i64: 384, 128>}, {pipeline_mode = #tpu.pipeline_mode<synchronous>, transform_indices = @transform_7, window_bounds = array<i64: 1, 128>}, {pipeline_mode = #tpu.pipeline_mode<synchronous>, transform_indices = @transform_8, window_bounds = array<i64: 1, 128>}, {pipeline_mode = #tpu.pipeline_mode<synchronous>, transform_indices = @transform_9, window_bounds = array<i64: 1, 256>}, {pipeline_mode = #tpu.pipeline_mode<synchronous>, transform_indices = @transform_10, window_bounds = array<i64: 384, 256>}, {pipeline_mode = #tpu.pipeline_mode<synchronous>, transform_indices = @transform_11, window_bounds = array<i64: 1, 128>}, {pipeline_mode = #tpu.pipeline_mode<synchronous>, transform_indices = @transform_12, window_bounds = array<i64: 128, 128>}, {pipeline_mode = #tpu.pipeline_mode<synchronous>, transform_indices = @transform_13, window_bounds = array<i64: 1, 256>}, {pipeline_mode = #tpu.pipeline_mode<synchronous>, transform_indices = @transform_14, window_bounds = array<i64: 384, 256>}, {pipeline_mode = #tpu.pipeline_mode<synchronous>, transform_indices = @transform_15, window_bounds = array<i64: 1, 256>}, {pipeline_mode = #tpu.pipeline_mode<synchronous>, transform_indices = @transform_16, window_bounds = array<i64: 1, 256>}, {pipeline_mode = #tpu.pipeline_mode<synchronous>, transform_indices = @transform_17, window_bounds = array<i64: 1, 512>}, {pipeline_mode = #tpu.pipeline_mode<synchronous>, transform_indices = @transform_18, window_bounds = array<i64: 1024, 512>}, {pipeline_mode = #tpu.pipeline_mode<synchronous>, transform_indices = @transform_19, window_bounds = array<i64: 1, 256>}, {pipeline_mode = #tpu.pipeline_mode<synchronous>, transform_indices = @transform_20, window_bounds = array<i64: 1, 256>}, {pipeline_mode = #tpu.pipeline_mode<synchronous>, transform_indices = @transform_21, window_bounds = array<i64: 1, 256>}, {pipeline_mode = #tpu.pipeline_mode<synchronous>, transform_indices = @transform_22, window_bounds = array<i64: 256, 256>}, {pipeline_mode = #tpu.pipeline_mode<synchronous>, transform_indices = @transform_23, window_bounds = array<i64: 1, 16>}, {pipeline_mode = #tpu.pipeline_mode<synchronous>, transform_indices = @transform_24, window_bounds = array<i64: 256, 16>}, {pipeline_mode = #tpu.pipeline_mode<synchronous>, transform_indices = @transform_25, window_bounds = array<i64: 2, 16>}]} {
    %c0 = arith.constant 0 : index
    %c0_0 = arith.constant 0 : index
    %0 = vector.load %arg1[%c0, %c0_0] : memref<24x64xf32, #tpu.memory_space<vmem>>, vector<24x64xf32>
    %1 = vector.extract_strided_slice %0 {offsets = [0, 0], sizes = [10, 64], strides = [1, 1]} : vector<24x64xf32> to vector<10x64xf32>
    %2 = vector.extract_strided_slice %0 {offsets = [1, 0], sizes = [10, 64], strides = [1, 1]} : vector<24x64xf32> to vector<10x64xf32>
    %3 = vector.extract_strided_slice %0 {offsets = [2, 0], sizes = [10, 64], strides = [1, 1]} : vector<24x64xf32> to vector<10x64xf32>
    %4 = tpu.concatenate %1, %2, %3 in 1 : vector<10x64xf32>, vector<10x64xf32>, vector<10x64xf32> -> vector<10x192xf32>
    %5 = vector.extract_strided_slice %0 {offsets = [12, 0], sizes = [10, 64], strides = [1, 1]} : vector<24x64xf32> to vector<10x64xf32>
    %6 = vector.extract_strided_slice %0 {offsets = [13, 0], sizes = [10, 64], strides = [1, 1]} : vector<24x64xf32> to vector<10x64xf32>
    %7 = vector.extract_strided_slice %0 {offsets = [14, 0], sizes = [10, 64], strides = [1, 1]} : vector<24x64xf32> to vector<10x64xf32>
    %8 = tpu.concatenate %5, %6, %7 in 1 : vector<10x64xf32>, vector<10x64xf32>, vector<10x64xf32> -> vector<10x192xf32>
    %9 = tpu.concatenate %4, %8 in 0 : vector<10x192xf32>, vector<10x192xf32> -> vector<20x192xf32>
    %c0_1 = arith.constant 0 : index
    %c0_2 = arith.constant 0 : index
    %10 = vector.load %arg3[%c0_1, %c0_2] : memref<192x256xbf16, #tpu.memory_space<vmem>>, vector<192x256xbf16>
    %11 = arith.truncf %9 : vector<20x192xf32> to vector<20x192xbf16>
    %cst = arith.constant dense<0.000000e+00> : vector<20x256xf32>
    %12 = tpu.matmul %11, %10, %cst {dimension_numbers = #tpu.dot_dimension_numbers<[1], [0], [0], [1], [0, 0, 1, 1], [], []>} : vector<20x192xbf16>, vector<192x256xbf16>, vector<20x256xf32> -> vector<20x256xf32>
    %c0_3 = arith.constant 0 : index
    %c0_4 = arith.constant 0 : index
    %13 = vector.load %arg2[%c0_3, %c0_4] : memref<1x256xf32, #tpu.memory_space<vmem>>, vector<1x256xf32>
    %14 = vector.broadcast %13 : vector<1x256xf32> to vector<20x256xf32>
    %15 = arith.addf %12, %14 : vector<20x256xf32>
    %16 = vector.extract_strided_slice %15 {offsets = [0, 0], sizes = [20, 128], strides = [1, 1]} : vector<20x256xf32> to vector<20x128xf32>
    %17 = vector.extract_strided_slice %15 {offsets = [0, 128], sizes = [20, 128], strides = [1, 1]} : vector<20x256xf32> to vector<20x128xf32>
    %18 = arith.negf %17 : vector<20x128xf32>
    %19 = math.exp %18 : vector<20x128xf32>
    %cst_5 = arith.constant 1.000000e+00 : f32
    %20 = vector.broadcast %cst_5 : f32 to vector<20x128xf32>
    %21 = arith.addf %20, %19 : vector<20x128xf32>
    %22 = arith.divf %20, %21 : vector<20x128xf32>
    %23 = arith.mulf %16, %22 : vector<20x128xf32>
    %c0_6 = arith.constant 0 : index
    %c0_7 = arith.constant 0 : index
    %24 = vector.load %arg5[%c0_6, %c0_7] : memref<128x128xbf16, #tpu.memory_space<vmem>>, vector<128x128xbf16>
    %25 = arith.truncf %23 : vector<20x128xf32> to vector<20x128xbf16>
    %cst_8 = arith.constant dense<0.000000e+00> : vector<20x128xf32>
    %26 = tpu.matmul %25, %24, %cst_8 {dimension_numbers = #tpu.dot_dimension_numbers<[1], [0], [0], [1], [0, 0, 1, 1], [], []>} : vector<20x128xbf16>, vector<128x128xbf16>, vector<20x128xf32> -> vector<20x128xf32>
    %c0_9 = arith.constant 0 : index
    %c0_10 = arith.constant 0 : index
    %27 = vector.load %arg4[%c0_9, %c0_10] : memref<1x128xf32, #tpu.memory_space<vmem>>, vector<1x128xf32>
    %28 = vector.broadcast %27 : vector<1x128xf32> to vector<20x128xf32>
    %29 = arith.addf %26, %28 : vector<20x128xf32>
    %cst_11 = arith.constant 0.000000e+00 : f32
    %30 = vector.broadcast %cst_11 : f32 to vector<20x128xf32>
    %31 = arith.maximumf %29, %30 : vector<20x128xf32>
    %32 = vector.extract_strided_slice %31 {offsets = [0, 0], sizes = [8, 128], strides = [1, 1]} : vector<20x128xf32> to vector<8x128xf32>
    %33 = vector.extract_strided_slice %31 {offsets = [1, 0], sizes = [8, 128], strides = [1, 1]} : vector<20x128xf32> to vector<8x128xf32>
    %34 = vector.extract_strided_slice %31 {offsets = [2, 0], sizes = [8, 128], strides = [1, 1]} : vector<20x128xf32> to vector<8x128xf32>
    %35 = tpu.concatenate %32, %33, %34 in 1 : vector<8x128xf32>, vector<8x128xf32>, vector<8x128xf32> -> vector<8x384xf32>
    %36 = vector.extract_strided_slice %31 {offsets = [10, 0], sizes = [8, 128], strides = [1, 1]} : vector<20x128xf32> to vector<8x128xf32>
    %37 = vector.extract_strided_slice %31 {offsets = [11, 0], sizes = [8, 128], strides = [1, 1]} : vector<20x128xf32> to vector<8x128xf32>
    %38 = vector.extract_strided_slice %31 {offsets = [12, 0], sizes = [8, 128], strides = [1, 1]} : vector<20x128xf32> to vector<8x128xf32>
    %39 = tpu.concatenate %36, %37, %38 in 1 : vector<8x128xf32>, vector<8x128xf32>, vector<8x128xf32> -> vector<8x384xf32>
    %40 = tpu.concatenate %35, %39 in 0 : vector<8x384xf32>, vector<8x384xf32> -> vector<16x384xf32>
    %c0_12 = arith.constant 0 : index
    %c0_13 = arith.constant 0 : index
    %41 = vector.load %arg7[%c0_12, %c0_13] : memref<384x128xbf16, #tpu.memory_space<vmem>>, vector<384x128xbf16>
    %42 = arith.truncf %40 : vector<16x384xf32> to vector<16x384xbf16>
    %cst_14 = arith.constant dense<0.000000e+00> : vector<16x128xf32>
    %43 = tpu.matmul %42, %41, %cst_14 {dimension_numbers = #tpu.dot_dimension_numbers<[1], [0], [0], [1], [0, 0, 1, 1], [], []>} : vector<16x384xbf16>, vector<384x128xbf16>, vector<16x128xf32> -> vector<16x128xf32>
    %c0_15 = arith.constant 0 : index
    %c0_16 = arith.constant 0 : index
    %44 = vector.load %arg6[%c0_15, %c0_16] : memref<1x128xf32, #tpu.memory_space<vmem>>, vector<1x128xf32>
    %45 = vector.broadcast %44 : vector<1x128xf32> to vector<16x128xf32>
    %46 = arith.addf %43, %45 : vector<16x128xf32>
    %cst_17 = arith.constant 0.000000e+00 : f32
    %47 = vector.broadcast %cst_17 : f32 to vector<16x128xf32>
    %48 = arith.maximumf %46, %47 : vector<16x128xf32>
    %cst_18 = arith.constant dense<0.000000e+00> : vector<16xf32>
    %49 = vector.multi_reduction <add>, %48, %cst_18 [1] : vector<16x128xf32> to vector<16xf32>
    %50 = vector.shape_cast %49 : vector<16xf32> to vector<16x1xf32>
    %cst_19 = arith.constant 1.280000e+02 : f32
    %51 = vector.broadcast %cst_19 : f32 to vector<16x1xf32>
    %52 = arith.divf %50, %51 : vector<16x1xf32>
    %53 = vector.broadcast %52 : vector<16x1xf32> to vector<16x128xf32>
    %54 = arith.subf %48, %53 : vector<16x128xf32>
    %55 = arith.mulf %54, %54 : vector<16x128xf32>
    %cst_20 = arith.constant dense<0.000000e+00> : vector<16xf32>
    %56 = vector.multi_reduction <add>, %55, %cst_20 [1] : vector<16x128xf32> to vector<16xf32>
    %57 = vector.shape_cast %56 : vector<16xf32> to vector<16x1xf32>
    %cst_21 = arith.constant 1.280000e+02 : f32
    %58 = vector.broadcast %cst_21 : f32 to vector<16x1xf32>
    %59 = arith.divf %57, %58 : vector<16x1xf32>
    %60 = vector.broadcast %52 : vector<16x1xf32> to vector<16x128xf32>
    %61 = arith.subf %48, %60 : vector<16x128xf32>
    %cst_22 = arith.constant 9.99999974E-6 : f32
    %62 = vector.broadcast %cst_22 : f32 to vector<16x1xf32>
    %63 = arith.addf %59, %62 : vector<16x1xf32>
    %64 = math.rsqrt %63 : vector<16x1xf32>
    %65 = vector.broadcast %64 : vector<16x1xf32> to vector<16x128xf32>
    %66 = arith.mulf %61, %65 : vector<16x128xf32>
    %c0_23 = arith.constant 0 : index
    %c0_24 = arith.constant 0 : index
    %67 = vector.load %arg9[%c0_23, %c0_24] : memref<1x128xf32, #tpu.memory_space<vmem>>, vector<1x128xf32>
    %68 = vector.broadcast %67 : vector<1x128xf32> to vector<16x128xf32>
    %69 = arith.mulf %66, %68 : vector<16x128xf32>
    %c0_25 = arith.constant 0 : index
    %c0_26 = arith.constant 0 : index
    %70 = vector.load %arg8[%c0_25, %c0_26] : memref<1x128xf32, #tpu.memory_space<vmem>>, vector<1x128xf32>
    %71 = vector.broadcast %70 : vector<1x128xf32> to vector<16x128xf32>
    %72 = arith.addf %69, %71 : vector<16x128xf32>
    %73 = vector.extract_strided_slice %72 {offsets = [0, 0], sizes = [6, 128], strides = [1, 1]} : vector<16x128xf32> to vector<6x128xf32>
    %74 = vector.extract_strided_slice %72 {offsets = [1, 0], sizes = [6, 128], strides = [1, 1]} : vector<16x128xf32> to vector<6x128xf32>
    %75 = vector.extract_strided_slice %72 {offsets = [2, 0], sizes = [6, 128], strides = [1, 1]} : vector<16x128xf32> to vector<6x128xf32>
    %76 = tpu.concatenate %73, %74, %75 in 1 : vector<6x128xf32>, vector<6x128xf32>, vector<6x128xf32> -> vector<6x384xf32>
    %77 = vector.extract_strided_slice %72 {offsets = [8, 0], sizes = [6, 128], strides = [1, 1]} : vector<16x128xf32> to vector<6x128xf32>
    %78 = vector.extract_strided_slice %72 {offsets = [9, 0], sizes = [6, 128], strides = [1, 1]} : vector<16x128xf32> to vector<6x128xf32>
    %79 = vector.extract_strided_slice %72 {offsets = [10, 0], sizes = [6, 128], strides = [1, 1]} : vector<16x128xf32> to vector<6x128xf32>
    %80 = tpu.concatenate %77, %78, %79 in 1 : vector<6x128xf32>, vector<6x128xf32>, vector<6x128xf32> -> vector<6x384xf32>
    %81 = tpu.concatenate %76, %80 in 0 : vector<6x384xf32>, vector<6x384xf32> -> vector<12x384xf32>
    %c0_27 = arith.constant 0 : index
    %c0_28 = arith.constant 0 : index
    %82 = vector.load %arg11[%c0_27, %c0_28] : memref<384x256xbf16, #tpu.memory_space<vmem>>, vector<384x256xbf16>
    %83 = arith.truncf %81 : vector<12x384xf32> to vector<12x384xbf16>
    %cst_29 = arith.constant dense<0.000000e+00> : vector<12x256xf32>
    %84 = tpu.matmul %83, %82, %cst_29 {dimension_numbers = #tpu.dot_dimension_numbers<[1], [0], [0], [1], [0, 0, 1, 1], [], []>} : vector<12x384xbf16>, vector<384x256xbf16>, vector<12x256xf32> -> vector<12x256xf32>
    %c0_30 = arith.constant 0 : index
    %c0_31 = arith.constant 0 : index
    %85 = vector.load %arg10[%c0_30, %c0_31] : memref<1x256xf32, #tpu.memory_space<vmem>>, vector<1x256xf32>
    %86 = vector.broadcast %85 : vector<1x256xf32> to vector<12x256xf32>
    %87 = arith.addf %84, %86 : vector<12x256xf32>
    %88 = vector.extract_strided_slice %87 {offsets = [0, 0], sizes = [12, 128], strides = [1, 1]} : vector<12x256xf32> to vector<12x128xf32>
    %89 = vector.extract_strided_slice %87 {offsets = [0, 128], sizes = [12, 128], strides = [1, 1]} : vector<12x256xf32> to vector<12x128xf32>
    %90 = arith.negf %89 : vector<12x128xf32>
    %91 = math.exp %90 : vector<12x128xf32>
    %cst_32 = arith.constant 1.000000e+00 : f32
    %92 = vector.broadcast %cst_32 : f32 to vector<12x128xf32>
    %93 = arith.addf %92, %91 : vector<12x128xf32>
    %94 = arith.divf %92, %93 : vector<12x128xf32>
    %95 = arith.mulf %88, %94 : vector<12x128xf32>
    %c0_33 = arith.constant 0 : index
    %c0_34 = arith.constant 0 : index
    %96 = vector.load %arg13[%c0_33, %c0_34] : memref<128x128xbf16, #tpu.memory_space<vmem>>, vector<128x128xbf16>
    %97 = arith.truncf %95 : vector<12x128xf32> to vector<12x128xbf16>
    %cst_35 = arith.constant dense<0.000000e+00> : vector<12x128xf32>
    %98 = tpu.matmul %97, %96, %cst_35 {dimension_numbers = #tpu.dot_dimension_numbers<[1], [0], [0], [1], [0, 0, 1, 1], [], []>} : vector<12x128xbf16>, vector<128x128xbf16>, vector<12x128xf32> -> vector<12x128xf32>
    %c0_36 = arith.constant 0 : index
    %c0_37 = arith.constant 0 : index
    %99 = vector.load %arg12[%c0_36, %c0_37] : memref<1x128xf32, #tpu.memory_space<vmem>>, vector<1x128xf32>
    %100 = vector.broadcast %99 : vector<1x128xf32> to vector<12x128xf32>
    %101 = arith.addf %98, %100 : vector<12x128xf32>
    %cst_38 = arith.constant 0.000000e+00 : f32
    %102 = vector.broadcast %cst_38 : f32 to vector<12x128xf32>
    %103 = arith.maximumf %101, %102 : vector<12x128xf32>
    %104 = vector.extract_strided_slice %103 {offsets = [0, 0], sizes = [4, 128], strides = [1, 1]} : vector<12x128xf32> to vector<4x128xf32>
    %105 = vector.extract_strided_slice %103 {offsets = [1, 0], sizes = [4, 128], strides = [1, 1]} : vector<12x128xf32> to vector<4x128xf32>
    %106 = vector.extract_strided_slice %103 {offsets = [2, 0], sizes = [4, 128], strides = [1, 1]} : vector<12x128xf32> to vector<4x128xf32>
    %107 = tpu.concatenate %104, %105, %106 in 1 : vector<4x128xf32>, vector<4x128xf32>, vector<4x128xf32> -> vector<4x384xf32>
    %108 = vector.extract_strided_slice %103 {offsets = [6, 0], sizes = [4, 128], strides = [1, 1]} : vector<12x128xf32> to vector<4x128xf32>
    %109 = vector.extract_strided_slice %103 {offsets = [7, 0], sizes = [4, 128], strides = [1, 1]} : vector<12x128xf32> to vector<4x128xf32>
    %110 = vector.extract_strided_slice %103 {offsets = [8, 0], sizes = [4, 128], strides = [1, 1]} : vector<12x128xf32> to vector<4x128xf32>
    %111 = tpu.concatenate %108, %109, %110 in 1 : vector<4x128xf32>, vector<4x128xf32>, vector<4x128xf32> -> vector<4x384xf32>
    %112 = tpu.concatenate %107, %111 in 0 : vector<4x384xf32>, vector<4x384xf32> -> vector<8x384xf32>
    %c0_39 = arith.constant 0 : index
    %c0_40 = arith.constant 0 : index
    %113 = vector.load %arg15[%c0_39, %c0_40] : memref<384x256xbf16, #tpu.memory_space<vmem>>, vector<384x256xbf16>
    %114 = arith.truncf %112 : vector<8x384xf32> to vector<8x384xbf16>
    %cst_41 = arith.constant dense<0.000000e+00> : vector<8x256xf32>
    %115 = tpu.matmul %114, %113, %cst_41 {dimension_numbers = #tpu.dot_dimension_numbers<[1], [0], [0], [1], [0, 0, 1, 1], [], []>} : vector<8x384xbf16>, vector<384x256xbf16>, vector<8x256xf32> -> vector<8x256xf32>
    %c0_42 = arith.constant 0 : index
    %c0_43 = arith.constant 0 : index
    %116 = vector.load %arg14[%c0_42, %c0_43] : memref<1x256xf32, #tpu.memory_space<vmem>>, vector<1x256xf32>
    %117 = vector.broadcast %116 : vector<1x256xf32> to vector<8x256xf32>
    %118 = arith.addf %115, %117 : vector<8x256xf32>
    %cst_44 = arith.constant 0.000000e+00 : f32
    %119 = vector.broadcast %cst_44 : f32 to vector<8x256xf32>
    %120 = arith.maximumf %118, %119 : vector<8x256xf32>
    %cst_45 = arith.constant dense<0.000000e+00> : vector<8xf32>
    %121 = vector.multi_reduction <add>, %120, %cst_45 [1] : vector<8x256xf32> to vector<8xf32>
    %122 = vector.shape_cast %121 : vector<8xf32> to vector<8x1xf32>
    %cst_46 = arith.constant 2.560000e+02 : f32
    %123 = vector.broadcast %cst_46 : f32 to vector<8x1xf32>
    %124 = arith.divf %122, %123 : vector<8x1xf32>
    %125 = vector.broadcast %124 : vector<8x1xf32> to vector<8x256xf32>
    %126 = arith.subf %120, %125 : vector<8x256xf32>
    %127 = arith.mulf %126, %126 : vector<8x256xf32>
    %cst_47 = arith.constant dense<0.000000e+00> : vector<8xf32>
    %128 = vector.multi_reduction <add>, %127, %cst_47 [1] : vector<8x256xf32> to vector<8xf32>
    %129 = vector.shape_cast %128 : vector<8xf32> to vector<8x1xf32>
    %cst_48 = arith.constant 2.560000e+02 : f32
    %130 = vector.broadcast %cst_48 : f32 to vector<8x1xf32>
    %131 = arith.divf %129, %130 : vector<8x1xf32>
    %132 = vector.broadcast %124 : vector<8x1xf32> to vector<8x256xf32>
    %133 = arith.subf %120, %132 : vector<8x256xf32>
    %cst_49 = arith.constant 9.99999974E-6 : f32
    %134 = vector.broadcast %cst_49 : f32 to vector<8x1xf32>
    %135 = arith.addf %131, %134 : vector<8x1xf32>
    %136 = math.rsqrt %135 : vector<8x1xf32>
    %137 = vector.broadcast %136 : vector<8x1xf32> to vector<8x256xf32>
    %138 = arith.mulf %133, %137 : vector<8x256xf32>
    %c0_50 = arith.constant 0 : index
    %c0_51 = arith.constant 0 : index
    %139 = vector.load %arg17[%c0_50, %c0_51] : memref<1x256xf32, #tpu.memory_space<vmem>>, vector<1x256xf32>
    %140 = vector.broadcast %139 : vector<1x256xf32> to vector<8x256xf32>
    %141 = arith.mulf %138, %140 : vector<8x256xf32>
    %c0_52 = arith.constant 0 : index
    %c0_53 = arith.constant 0 : index
    %142 = vector.load %arg16[%c0_52, %c0_53] : memref<1x256xf32, #tpu.memory_space<vmem>>, vector<1x256xf32>
    %143 = vector.broadcast %142 : vector<1x256xf32> to vector<8x256xf32>
    %144 = arith.addf %141, %143 : vector<8x256xf32>
    %145 = vector.extract_strided_slice %144 {offsets = [0, 0], sizes = [1, 256], strides = [1, 1]} : vector<8x256xf32> to vector<1x256xf32>
    %146 = vector.extract_strided_slice %144 {offsets = [1, 0], sizes = [1, 256], strides = [1, 1]} : vector<8x256xf32> to vector<1x256xf32>
    %147 = vector.extract_strided_slice %144 {offsets = [2, 0], sizes = [1, 256], strides = [1, 1]} : vector<8x256xf32> to vector<1x256xf32>
    %148 = vector.extract_strided_slice %144 {offsets = [3, 0], sizes = [1, 256], strides = [1, 1]} : vector<8x256xf32> to vector<1x256xf32>
    %149 = tpu.concatenate %145, %146, %147, %148 in 1 : vector<1x256xf32>, vector<1x256xf32>, vector<1x256xf32>, vector<1x256xf32> -> vector<1x1024xf32>
    %150 = vector.extract_strided_slice %144 {offsets = [4, 0], sizes = [1, 256], strides = [1, 1]} : vector<8x256xf32> to vector<1x256xf32>
    %151 = vector.extract_strided_slice %144 {offsets = [5, 0], sizes = [1, 256], strides = [1, 1]} : vector<8x256xf32> to vector<1x256xf32>
    %152 = vector.extract_strided_slice %144 {offsets = [6, 0], sizes = [1, 256], strides = [1, 1]} : vector<8x256xf32> to vector<1x256xf32>
    %153 = vector.extract_strided_slice %144 {offsets = [7, 0], sizes = [1, 256], strides = [1, 1]} : vector<8x256xf32> to vector<1x256xf32>
    %154 = tpu.concatenate %150, %151, %152, %153 in 1 : vector<1x256xf32>, vector<1x256xf32>, vector<1x256xf32>, vector<1x256xf32> -> vector<1x1024xf32>
    %155 = tpu.concatenate %149, %154 in 0 : vector<1x1024xf32>, vector<1x1024xf32> -> vector<2x1024xf32>
    %c0_54 = arith.constant 0 : index
    %c0_55 = arith.constant 0 : index
    %156 = vector.load %arg19[%c0_54, %c0_55] : memref<1024x512xbf16, #tpu.memory_space<vmem>>, vector<1024x512xbf16>
    %157 = arith.truncf %155 : vector<2x1024xf32> to vector<2x1024xbf16>
    %cst_56 = arith.constant dense<0.000000e+00> : vector<2x512xf32>
    %158 = tpu.matmul %157, %156, %cst_56 {dimension_numbers = #tpu.dot_dimension_numbers<[1], [0], [0], [1], [0, 0, 1, 1], [], []>} : vector<2x1024xbf16>, vector<1024x512xbf16>, vector<2x512xf32> -> vector<2x512xf32>
    %c0_57 = arith.constant 0 : index
    %c0_58 = arith.constant 0 : index
    %159 = vector.load %arg18[%c0_57, %c0_58] : memref<1x512xf32, #tpu.memory_space<vmem>>, vector<1x512xf32>
    %160 = vector.broadcast %159 : vector<1x512xf32> to vector<2x512xf32>
    %161 = arith.addf %158, %160 : vector<2x512xf32>
    %162 = vector.extract_strided_slice %161 {offsets = [0, 0], sizes = [2, 256], strides = [1, 1]} : vector<2x512xf32> to vector<2x256xf32>
    %163 = vector.extract_strided_slice %161 {offsets = [0, 256], sizes = [2, 256], strides = [1, 1]} : vector<2x512xf32> to vector<2x256xf32>
    %164 = arith.negf %163 : vector<2x256xf32>
    %165 = math.exp %164 : vector<2x256xf32>
    %cst_59 = arith.constant 1.000000e+00 : f32
    %166 = vector.broadcast %cst_59 : f32 to vector<2x256xf32>
    %167 = arith.addf %166, %165 : vector<2x256xf32>
    %168 = arith.divf %166, %167 : vector<2x256xf32>
    %169 = arith.mulf %162, %168 : vector<2x256xf32>
    %cst_60 = arith.constant dense<0.000000e+00> : vector<2xf32>
    %170 = vector.multi_reduction <add>, %169, %cst_60 [1] : vector<2x256xf32> to vector<2xf32>
    %171 = vector.shape_cast %170 : vector<2xf32> to vector<2x1xf32>
    %cst_61 = arith.constant 2.560000e+02 : f32
    %172 = vector.broadcast %cst_61 : f32 to vector<2x1xf32>
    %173 = arith.divf %171, %172 : vector<2x1xf32>
    %174 = vector.broadcast %173 : vector<2x1xf32> to vector<2x256xf32>
    %175 = arith.subf %169, %174 : vector<2x256xf32>
    %176 = arith.mulf %175, %175 : vector<2x256xf32>
    %cst_62 = arith.constant dense<0.000000e+00> : vector<2xf32>
    %177 = vector.multi_reduction <add>, %176, %cst_62 [1] : vector<2x256xf32> to vector<2xf32>
    %178 = vector.shape_cast %177 : vector<2xf32> to vector<2x1xf32>
    %cst_63 = arith.constant 2.560000e+02 : f32
    %179 = vector.broadcast %cst_63 : f32 to vector<2x1xf32>
    %180 = arith.divf %178, %179 : vector<2x1xf32>
    %181 = vector.broadcast %173 : vector<2x1xf32> to vector<2x256xf32>
    %182 = arith.subf %169, %181 : vector<2x256xf32>
    %cst_64 = arith.constant 9.99999974E-6 : f32
    %183 = vector.broadcast %cst_64 : f32 to vector<2x1xf32>
    %184 = arith.addf %180, %183 : vector<2x1xf32>
    %185 = math.rsqrt %184 : vector<2x1xf32>
    %186 = vector.broadcast %185 : vector<2x1xf32> to vector<2x256xf32>
    %187 = arith.mulf %182, %186 : vector<2x256xf32>
    %c0_65 = arith.constant 0 : index
    %c0_66 = arith.constant 0 : index
    %188 = vector.load %arg21[%c0_65, %c0_66] : memref<1x256xf32, #tpu.memory_space<vmem>>, vector<1x256xf32>
    %189 = vector.broadcast %188 : vector<1x256xf32> to vector<2x256xf32>
    %190 = arith.mulf %187, %189 : vector<2x256xf32>
    %c0_67 = arith.constant 0 : index
    %c0_68 = arith.constant 0 : index
    %191 = vector.load %arg20[%c0_67, %c0_68] : memref<1x256xf32, #tpu.memory_space<vmem>>, vector<1x256xf32>
    %192 = vector.broadcast %191 : vector<1x256xf32> to vector<2x256xf32>
    %193 = arith.addf %190, %192 : vector<2x256xf32>
    %c0_69 = arith.constant 0 : index
    %c0_70 = arith.constant 0 : index
    %194 = vector.load %arg23[%c0_69, %c0_70] : memref<256x256xbf16, #tpu.memory_space<vmem>>, vector<256x256xbf16>
    %195 = arith.truncf %193 : vector<2x256xf32> to vector<2x256xbf16>
    %cst_71 = arith.constant dense<0.000000e+00> : vector<2x256xf32>
    %196 = tpu.matmul %195, %194, %cst_71 {dimension_numbers = #tpu.dot_dimension_numbers<[1], [0], [0], [1], [0, 0, 1, 1], [], []>} : vector<2x256xbf16>, vector<256x256xbf16>, vector<2x256xf32> -> vector<2x256xf32>
    %c0_72 = arith.constant 0 : index
    %c0_73 = arith.constant 0 : index
    %197 = vector.load %arg22[%c0_72, %c0_73] : memref<1x256xf32, #tpu.memory_space<vmem>>, vector<1x256xf32>
    %198 = vector.broadcast %197 : vector<1x256xf32> to vector<2x256xf32>
    %199 = arith.addf %196, %198 : vector<2x256xf32>
    %200 = arith.negf %199 : vector<2x256xf32>
    %201 = math.exp %200 : vector<2x256xf32>
    %cst_74 = arith.constant 1.000000e+00 : f32
    %202 = vector.broadcast %cst_74 : f32 to vector<2x256xf32>
    %203 = arith.addf %202, %201 : vector<2x256xf32>
    %204 = arith.divf %202, %203 : vector<2x256xf32>
    %c0_75 = arith.constant 0 : index
    %c0_76 = arith.constant 0 : index
    %205 = vector.load %arg25[%c0_75, %c0_76] : memref<256x16xbf16, #tpu.memory_space<vmem>>, vector<256x16xbf16>
    %206 = arith.truncf %204 : vector<2x256xf32> to vector<2x256xbf16>
    %cst_77 = arith.constant dense<0.000000e+00> : vector<2x16xf32>
    %207 = tpu.matmul %206, %205, %cst_77 {dimension_numbers = #tpu.dot_dimension_numbers<[1], [0], [0], [1], [0, 0, 1, 1], [], []>} : vector<2x256xbf16>, vector<256x16xbf16>, vector<2x16xf32> -> vector<2x16xf32>
    %c0_78 = arith.constant 0 : index
    %c0_79 = arith.constant 0 : index
    %208 = vector.load %arg24[%c0_78, %c0_79] : memref<1x16xf32, #tpu.memory_space<vmem>>, vector<1x16xf32>
    %209 = vector.broadcast %208 : vector<1x16xf32> to vector<2x16xf32>
    %210 = arith.addf %207, %209 : vector<2x16xf32>
    %c0_80 = arith.constant 0 : index
    %c0_81 = arith.constant 0 : index
    %211 = vector.load %arg26[%c0_80, %c0_81] : memref<2x16xf32, #tpu.memory_space<vmem>>, vector<2x16xf32>
    tpu.vector_store %arg26[%c0_80, %c0_81], %210 {strides = array<i32>} : memref<2x16xf32, #tpu.memory_space<vmem>>, vector<2x16xf32>,
    return
  }
  func.func @transform_0(%arg0: i32) -> (i32, i32) {
    %c0_i32 = arith.constant 0 : i32
    %c0_i32_0 = arith.constant 0 : i32
    %c0_i32_1 = arith.constant 0 : i32
    return %c0_i32, %c0_i32_0 : i32, i32
  }
  func.func @transform_1(%arg0: i32) -> (i32, i32) {
    %c0_i32 = arith.constant 0 : i32
    %c0_i32_0 = arith.constant 0 : i32
    %c0_i32_1 = arith.constant 0 : i32
    return %c0_i32, %c0_i32_0 : i32, i32
  }
  func.func @transform_2(%arg0: i32) -> (i32, i32) {
    %c0_i32 = arith.constant 0 : i32
    %c0_i32_0 = arith.constant 0 : i32
    %c0_i32_1 = arith.constant 0 : i32
    return %c0_i32, %c0_i32_0 : i32, i32
  }
  func.func @transform_3(%arg0: i32) -> (i32, i32) {
    %c0_i32 = arith.constant 0 : i32
    %c0_i32_0 = arith.constant 0 : i32
    %c0_i32_1 = arith.constant 0 : i32
    return %c0_i32, %c0_i32_0 : i32, i32
  }
  func.func @transform_4(%arg0: i32) -> (i32, i32) {
    %c0_i32 = arith.constant 0 : i32
    %c0_i32_0 = arith.constant 0 : i32
    %c0_i32_1 = arith.constant 0 : i32
    return %c0_i32, %c0_i32_0 : i32, i32
  }
  func.func @transform_5(%arg0: i32) -> (i32, i32) {
    %c0_i32 = arith.constant 0 : i32
    %c0_i32_0 = arith.constant 0 : i32
    %c0_i32_1 = arith.constant 0 : i32
    return %c0_i32, %c0_i32_0 : i32, i32
  }
  func.func @transform_6(%arg0: i32) -> (i32, i32) {
    %c0_i32 = arith.constant 0 : i32
    %c0_i32_0 = arith.constant 0 : i32
    %c0_i32_1 = arith.constant 0 : i32
    return %c0_i32, %c0_i32_0 : i32, i32
  }
  func.func @transform_7(%arg0: i32) -> (i32, i32) {
    %c0_i32 = arith.constant 0 : i32
    %c0_i32_0 = arith.constant 0 : i32
    %c0_i32_1 = arith.constant 0 : i32
    return %c0_i32, %c0_i32_0 : i32, i32
  }
  func.func @transform_8(%arg0: i32) -> (i32, i32) {
    %c0_i32 = arith.constant 0 : i32
    %c0_i32_0 = arith.constant 0 : i32
    %c0_i32_1 = arith.constant 0 : i32
    return %c0_i32, %c0_i32_0 : i32, i32
  }
  func.func @transform_9(%arg0: i32) -> (i32, i32) {
    %c0_i32 = arith.constant 0 : i32
    %c0_i32_0 = arith.constant 0 : i32
    %c0_i32_1 = arith.constant 0 : i32
    return %c0_i32, %c0_i32_0 : i32, i32
  }
  func.func @transform_10(%arg0: i32) -> (i32, i32) {
    %c0_i32 = arith.constant 0 : i32
    %c0_i32_0 = arith.constant 0 : i32
    %c0_i32_1 = arith.constant 0 : i32
    return %c0_i32, %c0_i32_0 : i32, i32
  }
  func.func @transform_11(%arg0: i32) -> (i32, i32) {
    %c0_i32 = arith.constant 0 : i32
    %c0_i32_0 = arith.constant 0 : i32
    %c0_i32_1 = arith.constant 0 : i32
    return %c0_i32, %c0_i32_0 : i32, i32
  }
  func.func @transform_12(%arg0: i32) -> (i32, i32) {
    %c0_i32 = arith.constant 0 : i32
    %c0_i32_0 = arith.constant 0 : i32
    %c0_i32_1 = arith.constant 0 : i32
    return %c0_i32, %c0_i32_0 : i32, i32
  }
  func.func @transform_13(%arg0: i32) -> (i32, i32) {
    %c0_i32 = arith.constant 0 : i32
    %c0_i32_0 = arith.constant 0 : i32
    %c0_i32_1 = arith.constant 0 : i32
    return %c0_i32, %c0_i32_0 : i32, i32
  }
  func.func @transform_14(%arg0: i32) -> (i32, i32) {
    %c0_i32 = arith.constant 0 : i32
    %c0_i32_0 = arith.constant 0 : i32
    %c0_i32_1 = arith.constant 0 : i32
    return %c0_i32, %c0_i32_0 : i32, i32
  }
  func.func @transform_15(%arg0: i32) -> (i32, i32) {
    %c0_i32 = arith.constant 0 : i32
    %c0_i32_0 = arith.constant 0 : i32
    %c0_i32_1 = arith.constant 0 : i32
    return %c0_i32, %c0_i32_0 : i32, i32
  }
  func.func @transform_16(%arg0: i32) -> (i32, i32) {
    %c0_i32 = arith.constant 0 : i32
    %c0_i32_0 = arith.constant 0 : i32
    %c0_i32_1 = arith.constant 0 : i32
    return %c0_i32, %c0_i32_0 : i32, i32
  }
  func.func @transform_17(%arg0: i32) -> (i32, i32) {
    %c0_i32 = arith.constant 0 : i32
    %c0_i32_0 = arith.constant 0 : i32
    %c0_i32_1 = arith.constant 0 : i32
    return %c0_i32, %c0_i32_0 : i32, i32
  }
  func.func @transform_18(%arg0: i32) -> (i32, i32) {
    %c0_i32 = arith.constant 0 : i32
    %c0_i32_0 = arith.constant 0 : i32
    %c0_i32_1 = arith.constant 0 : i32
    return %c0_i32, %c0_i32_0 : i32, i32
  }
  func.func @transform_19(%arg0: i32) -> (i32, i32) {
    %c0_i32 = arith.constant 0 : i32
    %c0_i32_0 = arith.constant 0 : i32
    %c0_i32_1 = arith.constant 0 : i32
    return %c0_i32, %c0_i32_0 : i32, i32
  }
  func.func @transform_20(%arg0: i32) -> (i32, i32) {
    %c0_i32 = arith.constant 0 : i32
    %c0_i32_0 = arith.constant 0 : i32
    %c0_i32_1 = arith.constant 0 : i32
    return %c0_i32, %c0_i32_0 : i32, i32
  }
  func.func @transform_21(%arg0: i32) -> (i32, i32) {
    %c0_i32 = arith.constant 0 : i32
    %c0_i32_0 = arith.constant 0 : i32
    %c0_i32_1 = arith.constant 0 : i32
    return %c0_i32, %c0_i32_0 : i32, i32
  }
  func.func @transform_22(%arg0: i32) -> (i32, i32) {
    %c0_i32 = arith.constant 0 : i32
    %c0_i32_0 = arith.constant 0 : i32
    %c0_i32_1 = arith.constant 0 : i32
    return %c0_i32, %c0_i32_0 : i32, i32
  }
  func.func @transform_23(%arg0: i32) -> (i32, i32) {
    %c0_i32 = arith.constant 0 : i32
    %c0_i32_0 = arith.constant 0 : i32
    %c0_i32_1 = arith.constant 0 : i32
    return %c0_i32, %c0_i32_0 : i32, i32
  }
  func.func @transform_24(%arg0: i32) -> (i32, i32) {
    %c0_i32 = arith.constant 0 : i32
    %c0_i32_0 = arith.constant 0 : i32
    %c0_i32_1 = arith.constant 0 : i32
    return %c0_i32, %c0_i32_0 : i32, i32
  }
  func.func @transform_25(%arg0: i32) -> (i32, i32) {
    %c0_i32 = arith.constant 0 : i32
    %c0_i32_0 = arith.constant 0 : i32
    %c0_i32_1 = arith.constant 0 : i32
    return %c0_i32, %c0_i32_0 : i32, i32
  }
}

</mosaic_0001>

<bundles_post_ra>
// kernel: forward.1
= control target key start
LH: loop header
LB: loop body
LE: loop exit
PB: predicated region body
PF: predicated region fallthrough
CT: control target
= control target key end

     0   :  { %s6521_s0 = inlined_call_operand.vmem [shape: f32[24,64], index: 0, kind: input, shape index: {}]   ;;  %s6522_s1 = inlined_call_operand.vmem [shape: f32[1,256], index: 1, kind: input, shape index: {}]   ;;  %s6523_s2 = inlined_call_operand.hbm [shape: bf16[192,256], index: 2, kind: input, shape index: {}]   ;;  %s6524_s3 = inlined_call_operand.vmem [shape: f32[1,128], index: 3, kind: input, shape index: {}]   ;;  %s6525_s4 = inlined_call_operand.hbm [shape: bf16[128,128], index: 4, kind: input, shape index: {}]   ;;  %s6526_s5 = inlined_call_operand.vmem [shape: f32[1,128], index: 5, kind: input, shape index: {}]   ;;  %s6527_s6 = inlined_call_operand.hbm [shape: bf16[384,128], index: 6, kind: input, shape index: {}]   ;;  %s6528_s7 = inlined_call_operand.vmem [shape: f32[1,128], index: 7, kind: input, shape index: {}]   ;;  %s6529_s8 = inlined_call_operand.vmem [shape: f32[1,128], index: 8, kind: input, shape index: {}]   ;;  %s6530_s9 = inlined_call_operand.vmem [shape: f32[1,256], index: 9, kind: input, shape index: {}]   ;;  %s6531_s10 = inlined_call_operand.vmem [shape: bf16[384,256], index: 10, kind: input, shape index: {}]   ;;  %s6532_s11 = inlined_call_operand.vmem [shape: f32[1,128], index: 11, kind: input, shape index: {}]   ;;  %s6533_s12 = inlined_call_operand.hbm [shape: bf16[128,128], index: 12, kind: input, shape index: {}]   ;;  %s6534_s13 = inlined_call_operand.vmem [shape: f32[1,256], index: 13, kind: input, shape index: {}]   ;;  %s6535_s14 = inlined_call_operand.hbm [shape: bf16[384,256], index: 14, kind: input, shape index: {}]   ;;  %s6536_s15 = inlined_call_operand.vmem [shape: f32[1,256], index: 15, kind: input, shape index: {}, may-alias: {15,19}]   ;;  %s6537_s16 = inlined_call_operand.vmem [shape: f32[1,256], index: 16, kind: input, shape index: {}, may-alias: {16,20}]   ;;  %s6538_s17 = inlined_call_operand.vmem [shape: f32[1,512], index: 17, kind: input, shape index: {}]   ;;  %s6539_s18 = inlined_call_operand.hbm [shape: bf16[1024,512], index: 18, kind: input, shape index: {}]   ;;  %s6540_s19 = inlined_call_operand.vmem [shape: f32[1,256], index: 19, kind: input, shape index: {}, may-alias: {15,19}]   ;;  %s6541_s20 = inlined_call_operand.vmem [shape: f32[1,256], index: 20, kind: input, shape index: {}, may-alias: {16,20}]   ;;  %s6542_s21 = inlined_call_operand.vmem [shape: f32[1,256], index: 21, kind: input, shape index: {}]   ;;  %s6543_s22 = inlined_call_operand.hbm [shape: bf16[256,256], index: 22, kind: input, shape index: {}]   ;;  %s6544_s23 = inlined_call_operand.vmem [shape: f32[1,16], index: 23, kind: input, shape index: {}]   ;;  %s6545_s24 = inlined_call_operand.vmem [shape: bf16[256,16], index: 24, kind: input, shape index: {}]   ;;  %s6546_s25 = inlined_call_operand.hbm [shape: f32[2,16], index: 25, kind: output, shape index: {}]  }
   0x1   :  { %6548 = sst [smem:[#allocation20_spill]] %s6521_s0 }
   0x2   :  { %6549 = sst [smem:[#allocation21_spill]] %s6522_s1 }
   0x3   :  { %6550 = sst [smem:[#allocation22_spill]] %s6523_s2 }
   0x4   :  { %6551 = sst [smem:[#allocation23_spill]] %s6524_s3 }
   0x5   :  { %6552 = sst [smem:[#allocation24_spill]] %s6525_s4 }
   0x6   :  { %6553 = sst [smem:[#allocation25_spill]] %s6526_s5 }
   0x7   :  { %6554 = sst [smem:[#allocation26_spill]] %s6527_s6 }
   0x8   :  { %6555 = sst [smem:[#allocation27_spill]] %s6528_s7 }
   0x9   :  { %6556 = sst [smem:[#allocation28_spill]] %s6529_s8 }
   0xa   :  { %6557 = sst [smem:[#allocation29_spill]] %s6530_s9 }
   0xb   :  { %30 = vsyncpa [#allocation3], 0 }
   0xc   :  { %31 = vsyncpa [#allocation6], 0 }
   0xd   :  { %32 = vsyncpa [#allocation9], 0 }
   0xe   :  { %33 = vsyncpa [#allocation12], 0 }
   0xf   :  { %34 = vsyncpa [#allocation4], 0  ;;  %s5899_s29 = smov [#allocation5]  }
  0x10   :  { %s58_s2 = sshll.u32 %s5899_s29, 4  ;;  %s59_s2 = int_to_ptr.vmem [resolvable:$true] %s58_s2 }
  0x11   :  { %s5737_s6 = scalar_lea.vmem %s59_s2, 1024  ;;  %p5742_p1 = scmp.lt.s32.totalorder %s59_s2, %s59_s2 }
  0x12   :  { %p5738_p0 = scmp.ne.s32.totalorder %s59_s2, %s5737_s6  ;;  %p5743_p2 = scmp.lt.s32.totalorder %s5737_s6, %s5737_s6 }
  0x14   :  { %p5744_p3 = por %p5743_p2, %p5742_p1 }
  0x16   :  { %p5745_p4 = pnand %p5744_p3, %p5738_p0 }
  0x18   :  { %5748 = shalt.err (!%p5745_p4)
}
  0x19   :  { %s5900_s30 = smov 64   ;;  %s5901_s7 = smov 4  }
  0x1a   :  { %s6558_s1 = sld [smem:[#allocation24_spill]]  ;;  %s5902_s8 = smov [#allocation8]  }
  0x1b   :  { %s94_s27 = sshll.u32 %s5902_s8, 4  ;;  %s5903_s4 = smov [#allocation11]   ;;  %s95_s27 = int_to_ptr.vmem [resolvable:$true] %s94_s27 }
  0x1c   :  { %s126_s28 = sshll.u32 %s5903_s4, 4  ;;  %s5757_s9 = scalar_lea.vmem %s95_s27, 1024  ;;  %s127_s28 = int_to_ptr.vmem [resolvable:$true] %s126_s28 }
  0x1d   :  { %p5758_p5 = scmp.ne.s32.totalorder %s95_s27, %s5757_s9  ;;  %p5762_p6 = scmp.lt.s32.totalorder %s95_s27, %s95_s27 }
  0x1e   :  { %p5763_p7 = scmp.lt.s32.totalorder %s5757_s9, %s5757_s9 }
  0x20   :  { %64 = dma.hbm_to_vmem [thread:$0]  %s6558_s1, 1024, %s59_s2, [#allocation6], %s5900_s30, %s5900_s30, %s5901_s7  }
  0x21   :  { %p5764_p8 = por %p5763_p7, %p5762_p6 }
  0x23   :  { %p5765_p9 = pnand %p5764_p8, %p5758_p5 }
  0x25   :  { %5768 = shalt.err (!%p5765_p9)
}
  0x26   :  { %100 = dma.hbm_to_vmem [thread:$0]  %s6533_s12, 1024, %s95_s27, [#allocation9], %s5900_s30, %s5900_s30, %s5901_s7  }
  0x27   :  { %s5777_s29 = scalar_lea.vmem %s127_s28, 32768  ;;  %p5782_p11 = scmp.lt.s32.totalorder %s127_s28, %s127_s28 }
  0x28   :  { %p5778_p10 = scmp.ne.s32.totalorder %s127_s28, %s5777_s29  ;;  %p5783_p12 = scmp.lt.s32.totalorder %s5777_s29, %s5777_s29 }
  0x2a   :  { %p5784_p13 = por %p5783_p12, %p5782_p11 }
  0x2c   :  { %p5785_p0 = pnand %p5784_p13, %p5778_p10 }
  0x2e   :  { %5788 = shalt.err (!%p5785_p0)
}
  0x2f   :  { %s5904_s2 = smov 256   ;;  %s5905_s6 = smov 16  }
  0x30   :  { %132 = dma.hbm_to_vmem [thread:$0]  %s6539_s18, 32768, %s127_s28, [#allocation12], %s5904_s2, %s5904_s2, %s5905_s6  }
  0x31   :  { %s5906_s1 = smov [#allocation2]  }
  0x32   :  { %s44_s8 = sshll.u32 %s5906_s1, 4  ;;  %s45_s8 = int_to_ptr.vmem [resolvable:$true] %s44_s8 }
  0x33   :  { %s5797_s4 = scalar_lea.vmem %s45_s8, 3072  ;;  %p5802_p2 = scmp.lt.s32.totalorder %s45_s8, %s45_s8 }
  0x34   :  { %p5798_p1 = scmp.ne.s32.totalorder %s45_s8, %s5797_s4  ;;  %p5803_p3 = scmp.lt.s32.totalorder %s5797_s4, %s5797_s4 }
  0x36   :  { %p5804_p4 = por %p5803_p3, %p5802_p2 }
  0x38   :  { %p5805_p5 = pnand %p5804_p4, %p5798_p1 }
  0x3a   :  { %5808 = shalt.err (!%p5805_p5)
}
  0x3b   :  { %s5907_s12 = smov 128   ;;  %s5908_s27 = smov 8  }
  0x3c   :  { %s6559_s0 = sld [smem:[#allocation22_spill]]  ;;  %s5909_s18 = smov [#allocation7]  }
  0x3d   :  { %s72_s28 = sshll.u32 %s5909_s18, 4  ;;  %s5910_s29 = smov [#allocation10]   ;;  %s73_s28 = int_to_ptr.vmem [resolvable:$true] %s72_s28 }
  0x3e   :  { %s108_s2 = sshll.u32 %s5910_s29, 4  ;;  %s5817_s6 = scalar_lea.vmem %s73_s28, 3072  ;;  %s109_s2 = int_to_ptr.vmem [resolvable:$true] %s108_s2 }
  0x3f   :  { %p5818_p6 = scmp.ne.s32.totalorder %s73_s28, %s5817_s6  ;;  %p5822_p7 = scmp.lt.s32.totalorder %s73_s28, %s73_s28 }
  0x40   :  { %p5823_p8 = scmp.lt.s32.totalorder %s5817_s6, %s5817_s6 }
  0x42   :  { %50 = dma.hbm_to_vmem [thread:$0]  %s6559_s0, 3072, %s45_s8, [#allocation3], %s5907_s12, %s5907_s12, %s5908_s27  }
  0x43   :  { %p5824_p9 = por %p5823_p8, %p5822_p7 }
  0x45   :  { %p5825_p10 = pnand %p5824_p9, %p5818_p6 }
  0x47   :  { %5828 = shalt.err (!%p5825_p10)
}
  0x48   :  { %s6560_s1 = sld [smem:[#allocation26_spill]]  ;;  %s5837_s8 = scalar_lea.vmem %s109_s2, 6144 }
  0x49   :  { %p5838_p11 = scmp.ne.s32.totalorder %s109_s2, %s5837_s8  ;;  %p5842_p12 = scmp.lt.s32.totalorder %s109_s2, %s109_s2 }
  0x4a   :  { %p5843_p13 = scmp.lt.s32.totalorder %s5837_s8, %s5837_s8 }
  0x4c   :  { %p5844_p0 = por %p5843_p13, %p5842_p12 }
  0x4e   :  { %78 = dma.hbm_to_vmem [thread:$0]  %s6560_s1, 3072, %s73_s28, [#allocation6], %s5900_s30, %s5900_s30, %s5901_s7  }
  0x4f   :  { %p5845_p1 = pnand %p5844_p0, %p5838_p11 }
  0x51   :  { %5848 = shalt.err (!%p5845_p1)
}
  0x52   :  { %114 = dma.hbm_to_vmem [thread:$0]  %s6535_s14, 6144, %s109_s2, [#allocation9], %s5907_s12, %s5907_s12, %s5908_s27  }
  0x53   :  { %s5911_s5 = smov [#allocation13]  }
  0x54   :  { %s144_s0 = sshll.u32 %s5911_s5, 4  ;;  %s145_s0 = int_to_ptr.vmem [resolvable:$true] %s144_s0 }
  0x55   :  { %s5857_s18 = scalar_lea.vmem %s145_s0, 4096  ;;  %p5862_p3 = scmp.lt.s32.totalorder %s145_s0, %s145_s0 }
  0x56   :  { %p5858_p2 = scmp.ne.s32.totalorder %s145_s0, %s5857_s18  ;;  %p5863_p4 = scmp.lt.s32.totalorder %s5857_s18, %s5857_s18 }
  0x58   :  { %p5864_p5 = por %p5863_p4, %p5862_p3 }
  0x5a   :  { %p5865_p6 = pnand %p5864_p5, %p5858_p2 }
  0x5c   :  { %5868 = shalt.err (!%p5865_p6)
}
  0x5d   :  { %150 = dma.hbm_to_vmem [thread:$0]  %s6543_s22, 4096, %s145_s0, [#allocation12], %s5907_s12, %s5907_s12, %s5908_s27  }
  0x5e   :  { %5889 = dma.done.wait [#allocation3], 3072  }
  0x5f   :  { %5890 = vsyncadd [#allocation3], 4294964224 }
  0x60   :  { %5891 = dma.done.wait [#allocation6], 4096  }
  0x61   :  { %5892 = vsyncadd [#allocation6], 4294963200 }
  0x62   :  { %5893 = dma.done.wait [#allocation9], 7168  }
  0x63   :  { %5894 = vsyncadd [#allocation9], 4294960128 }
  0x64   :  { %5895 = dma.done.wait [#allocation12], 36864  }
  0x65   :  { %5896 = vsyncadd [#allocation12], 4294930432  ;;  %s6561_s2 = sld [smem:[#allocation20_spill]]  ;;  %vm182_vm0 = vcmask 1046528   ;;  %v5017_v7 = vld [vmem:[#allocation2 + $0x74] ss:$8 sps:$4 sm:$0xff]  }
  0x66   :  { %v5019_v8 = vld [vmem:[#allocation2 + $0x70] ss:$8 sps:$4 sm:$0xff]   ;;  %v5020_v11 = vld [vmem:[#allocation2 + $0x64] ss:$8 sps:$4 sm:$0xff]   ;;  %vm192_vm1 = vcmask 1045504   ;;  %395 = vmatprep.subr.bf16.mxu0 %v5017_v7  ;;  %vm226_vm2 = vcmask 1041408  }
  0x67   :  { %396 = vmatpush1.bf16.msra.mxu0 %v5019_v8  ;;  %v5022_v16 = vld [vmem:[#allocation2 + $0x60] ss:$8 sps:$4 sm:$0xff]   ;;  %v5023_v18 = vld [vmem:[#allocation2 + $0x54] ss:$8 sps:$4 sm:$0xff]   ;;  %v5025_v22 = vld [vmem:[#allocation2 + $0x50] ss:$8 sps:$4 sm:$0xff]  }
  0x68   :  { %397 = vmatprep.subr.bf16.mxu0 %v5020_v11  ;;  %v5026_v24 = vld [vmem:[#allocation2 + $0x44] ss:$8 sps:$4 sm:$0xff]   ;;  %vm198_vm3 = vcmask 523264   ;;  %v5028_v27 = vld [vmem:[#allocation2 + $0x40] ss:$8 sps:$4 sm:$0xff]   ;;  %v5053_v61 = vld [vmem:[#allocation5 + $0x38] sm:$0xff]  }
  0x69   :  { %v5029_v28 = vld [vmem:[#allocation2 + $0x34] ss:$8 sps:$4 sm:$0xff]   ;;  %v5031_v29 = vld [vmem:[#allocation2 + $0x30] ss:$8 sps:$4 sm:$0xff]   ;;  %v5032_v30 = vld [vmem:[#allocation2 + $0x24] ss:$8 sps:$4 sm:$0xff]   ;;  %4930 = vmatprep.subr.bf16.mxu1 %v5053_v61 }
  0x6a   :  { %v5034_v31 = vld [vmem:[#allocation2 + $0x20] ss:$8 sps:$4 sm:$0xff]   ;;  %v5035_v32 = vld [vmem:[#allocation2 + $0x14] ss:$8 sps:$4 sm:$0xff]   ;;  %v5037_v33 = vld [vmem:[#allocation2 + $0x10] ss:$8 sps:$4 sm:$0xff]   ;;  %4931 = vmatpush3.bf16.msra.mxu1 %v5053_v61 }
  0x6b   :  { %v6088_v0 = vld [vmem:[%s6561_s2 + $0x8] sm:$0xff]  ;;  %v6093_v1 = vld [vmem:[%s6561_s2 + $0x10] sm:$0xff]  ;;  %v6098_v2 = vld [vmem:[%s6561_s2] sm:$0xff]  ;;  %398 = vmatpush1.bf16.msra.mxu0 %v5022_v16  ;;  %v5912_v7 = vmov 0.0   ;;  %s6562_s26 = sld [smem:[#allocation21_spill]]  ;;  %vm5913_vm4 = vmmov 0  }
  0x6c   :  { %v184_v3 = vrot.slane %v6088_v0, 1  ;;  %v202_v4 = vrot.slane %v6093_v1, 1  ;;  %v210_v5 = vrot.slane %v6093_v1, 2  ;;  %v183_v6 = vrot.slane %v6098_v2, 1  ;;  %399 = vmatprep.subr.bf16.mxu0 %v5023_v18  ;;  %v5038_v34 = vld [vmem:[#allocation2 + $0x4] ss:$8 sps:$4 sm:$0xff]  }
  0x6d   :  { %v193_v13 = vrot.slane %v6098_v2, 2  ;;  %v194_v14 = vrot.slane %v6088_v0, 2  ;;  %v5040_v35 = vld [vmem:[#allocation2] ss:$8 sps:$4 sm:$0xff]   ;;  %v5041_v36 = vld [vmem:[#allocation2 + $0xb4] ss:$8 sps:$4 sm:$0xff]  }
  0x6e   :  { %v203_v9 = vsel %vm182_vm0, %v184_v3, %v202_v4  ;;  %v185_v10 = vsel %vm182_vm0, %v183_v6, %v184_v3  ;;  %v6108_v15 = vrot.slane %v210_v5, 2  ;;  %v5043_v37 = vld [vmem:[#allocation2 + $0xb0] ss:$8 sps:$4 sm:$0xff]   ;;  %v5044_v38 = vld [vmem:[#allocation2 + $0xa4] ss:$8 sps:$4 sm:$0xff]   ;;  %s6563_s4 = sld [smem:[#allocation23_spill]] }
  0x6f   :  { %v5007_v12 = vpack.i.bf16 %v202_v4, %v203_v9  ;;  %v5012_v17 = vpack.i.bf16 %v185_v10, %v184_v3  ;;  %v211_v19 = vsel %vm192_vm1, %v194_v14, %v210_v5  ;;  %v195_v21 = vsel %vm192_vm1, %v193_v13, %v194_v14  ;;  %400 = vmatpush1.bf16.msra.mxu0 %v5025_v22  ;;  %v5046_v39 = vld [vmem:[#allocation2 + $0xa0] ss:$8 sps:$4 sm:$0xff]   ;;  %v5047_v40 = vld [vmem:[#allocation2 + $0x94] ss:$8 sps:$4 sm:$0xff]   ;;  %v5049_v41 = vld [vmem:[#allocation2 + $0x90] ss:$8 sps:$4 sm:$0xff]  }
  0x70   :  { %v219_v20 = vrot.slane %v211_v19, 2  ;;  %401 = vmatprep.subr.bf16.mxu0 %v5026_v24  ;;  %v5050_v42 = vld [vmem:[#allocation2 + $0x84] ss:$8 sps:$4 sm:$0xff]   ;;  %v5052_v43 = vld [vmem:[#allocation2 + $0x80] ss:$8 sps:$4 sm:$0xff]   ;;  %v256_v58 = vpack.c.bf16 %v6108_v15, %v6108_v15  ;;  %v5054_v62 = vld [vmem:[#allocation5 + $0x30] sm:$0xff]   ;;  %v259_v10 = vlaneseq }
  0x71   :  { %5008 = vrot.lane.b32.xlu0 %v5007_v12, %s5900_s30  ;;  %4932 = vmatprep.subr.bf16.mxu1 %v5054_v62  ;;  %v5055_v63 = vld [vmem:[#allocation5 + $0x28] sm:$0xff]   ;;  %v5060_v4 = vld [vmem:[#allocation5] sm:$0xff]   ;;  %v5061_v5 = vld [vmem:[#allocation7 + $0x78] sm:$0xff]   ;;  %s6564_s0 = sld [smem:[#allocation25_spill]]  ;;  %vm1494_vm5 = vcmask 1043456   ;;  %vm1956_vm6 = vcmask 1040384  }
  0x72   :  { %v221_v23 = vsel %vm192_vm1, %v219_v20, %v6108_v15  ;;  %4933 = vmatpush3.bf16.msra.mxu1 %v5054_v62  ;;  %v5059_v3 = vld [vmem:[#allocation5 + $0x8] sm:$0xff]   ;;  %v5062_v6 = vld [vmem:[#allocation7 + $0xb8] sm:$0xff]   ;;  %v5065_v8 = vld [vmem:[#allocation7 + $0xb0] sm:$0xff]   ;;  %v6135_v11 = vshrl.u32 %v259_v10, 7  ;;  %s6565_s14 = sld [smem:[#allocation28_spill]]  ;;  %vm4357_vm7 = vcmask 123904  }
  0x73   :  { %v228_v25 = vsel %vm226_vm2, %v194_v14, %v221_v23  ;;  %402 = vmatpush1.bf16.msra.mxu0 %v5028_v27  ;;  %4934 = vmatprep.subr.bf16.mxu1 %v5055_v63  ;;  %v5068_v9 = vld [vmem:[#allocation7 + $0xa8] sm:$0xff]   ;;  %v257_v13 = vld [vmem:[%s6562_s26] sm:$0x3]  ;;  %v5078_v61 = vld [vmem:[#allocation7 + $0x10] sm:$0xff]   ;;  %s6566_s2 = sld [smem:[#allocation27_spill]] }
  0x74   :  { %v254_v26 = vpack.c.bf16 %v228_v25, %v195_v21  ;;  %403 = vmatprep.subr.bf16.mxu0 %v5029_v28  ;;  %v6138_v12 = vsub.s32 1, %v6135_v11  ;;  %v5079_v62 = vld [vmem:[#allocation7 + $0x48] sm:$0xff]   ;;  %s6567_s22 = sld [smem:[#allocation29_spill]] }
  0x75   :  { %5013 = vrot.lane.b32.xlu0 %v5012_v17, %s5900_s30 }
  0x76   :  { %4401 = vmatprep.mubr.msk.bf16.mxu0 %vm198_vm3, %v254_v26  ;;  %4935 = vmatpush3.bf16.msra.mxu1 %v5055_v63  ;;  %v266_v14 = vrot.slane %v257_v13, %v6138_v12  ;;  %v5080_v63 = vld [vmem:[#allocation7 + $0x88] sm:$0xff]  }
  0x77   :  { %404 = vmatpush1.bf16.msra.mxu0 %v5031_v29 }
  0x78   :  { %405 = vmatprep.subr.bf16.mxu0 %v5032_v30 }
  0x7b   :  { %406 = vmatpush1.bf16.msra.mxu0 %v5034_v31 }
  0x7c   :  { %407 = vmatprep.subr.bf16.mxu0 %v5035_v32 }
  0x7f   :  { %408 = vmatpush1.bf16.msra.mxu0 %v5037_v33 }
  0x80   :  { %409 = vmatprep.subr.bf16.mxu0 %v5038_v34 }
  0x83   :  { %410 = vmatpush1.bf16.msra.mxu0 %v5040_v35  ;;  %v6145_v35 = vsub.s32 0, %v6135_v11 }
  0x84   :  { %419 = vmatprep.subr.bf16.mxu0 %v5041_v36 }
  0x85   :  { %v262_v36 = vrot.slane %v257_v13, %v6145_v35 }
  0x87   :  { %420 = vmatpush2.bf16.msra.mxu0 %v5043_v37 }
  0x88   :  { %421 = vmatprep.subr.bf16.mxu0 %v5044_v38 }
  0x8b   :  { %422 = vmatpush2.bf16.msra.mxu0 %v5046_v39 }
  0x8c   :  { %423 = vmatprep.subr.bf16.mxu0 %v5047_v40 }
  0x8f   :  { %424 = vmatpush2.bf16.msra.mxu0 %v5049_v41 }
  0x90   :  { %425 = vmatprep.subr.bf16.mxu0 %v5050_v42 }
  0x93   :  { %426 = vmatpush2.bf16.msra.mxu0 %v5052_v43 }
  0x94   :  { %4950 = vmatprep.subr.bf16.mxu0 %v5912_v7 }
  0xe3   :  { %v5009_v44 = vpop.permute.xlu0 %5008 }
  0xe4   :  { %v5011_v45 = vunpack.i.h.bf16 %v5009_v44  ;;  %v5010_v46 = vunpack.i.l.bf16 %v5009_v44 }
  0xe6   :  { %v213_v47 = vsel %vm198_vm3, %v6093_v1, %v5011_v45  ;;  %v212_v48 = vsel %vm198_vm3, %v6088_v0, %v5010_v46  ;;  %v5057_v1 = vld [vmem:[#allocation5 + $0x18] sm:$0xff]  }
  0xe7   :  { %v217_v49 = vrot.slane %v213_v47, 2  ;;  %v216_v50 = vrot.slane %v212_v48, 2  ;;  %v5014_v51 = vpop.permute.xlu0 %5013  ;;  %v5063_v47 = vld [vmem:[#allocation7 + $0x38] sm:$0xff]  }
  0xe8   :  { %v5016_v52 = vunpack.i.h.bf16 %v5014_v51  ;;  %v5015_v53 = vunpack.i.l.bf16 %v5014_v51  ;;  %v5067_v51 = vld [vmem:[#allocation7 + $0x68] sm:$0xff]  }
  0xe9   :  { %v218_v54 = vsel %vm192_vm1, %v216_v50, %v217_v49  ;;  %v255_v60 = vpack.c.bf16 %v217_v49, %v217_v49  ;;  %v5064_v49 = vld [vmem:[#allocation7 + $0x70] sm:$0xff]  }
  0xea   :  { %v200_v55 = vsel %vm198_vm3, %v6088_v0, %v5015_v53  ;;  %v199_v56 = vsel %vm198_vm3, %v6098_v2, %v5016_v52  ;;  %v5056_v0 = vld [vmem:[#allocation5 + $0x20] sm:$0xff]   ;;  %v5058_v2 = vld [vmem:[#allocation5 + $0x10] sm:$0xff]   ;;  %v5069_v52 = vld [vmem:[#allocation7 + $0x28] sm:$0xff]  }
  0xeb   :  { %v227_v57 = vsel %vm226_vm2, %v200_v55, %v218_v54  ;;  %4936 = vmatprep.subr.bf16.mxu1 %v5056_v0  ;;  %v5066_v50 = vld [vmem:[#allocation7 + $0x30] sm:$0xff]   ;;  %v5070_v53 = vld [vmem:[#allocation7 + $0x60] sm:$0xff]  }
  0xec   :  { %v253_v59 = vpack.c.bf16 %v227_v57, %v199_v56  ;;  %4937 = vmatpush3.bf16.msra.mxu1 %v5056_v0  ;;  %v5071_v54 = vld [vmem:[#allocation7 + $0xa0] sm:$0xff]   ;;  %v5073_v56 = vld [vmem:[#allocation7 + $0x58] sm:$0xff]   ;;  %v5081_v0 = vld [vmem:[#allocation7 + $0x8] sm:$0xff]  }
  0xed   :  { %4938 = vmatprep.subr.bf16.mxu1 %v5057_v1  ;;  %v5072_v55 = vld [vmem:[#allocation7 + $0x20] sm:$0xff]   ;;  %v5074_v57 = vld [vmem:[#allocation7 + $0x98] sm:$0xff]  }
  0xee   :  { %428 = vmatmul.mubr.bf16.vlgmr.msra.gmra.mxu0 %v253_v59  ;;  %v5076_v59 = vld [vmem:[#allocation7 + $0x50] sm:$0xff]  }
  0xef   :  { %4402 = vmatprep.mubr.msk.bf16.mxu0 %vm198_vm3, %v256_v58  ;;  %4951 = vmatpush3.bf16.msra.mxu0 %v5062_v6  ;;  %v5075_v58 = vld [vmem:[#allocation7 + $0x18] sm:$0xff]  }
  0xf0   :  { %4939 = vmatpush3.bf16.msra.mxu1 %v5057_v1  ;;  %4952 = vmatprep.subr.bf16.mxu0 %v5912_v7  ;;  %v5082_v1 = vld [vmem:[#allocation7 + $0x40] sm:$0xff]  }
  0xf1   :  { %4940 = vmatprep.subr.bf16.mxu1 %v5058_v2 }
  0xf3   :  { %4953 = vmatpush3.bf16.msra.mxu0 %v5065_v8 }
  0xf4   :  { %4941 = vmatpush3.bf16.msra.mxu1 %v5058_v2  ;;  %4954 = vmatprep.subr.bf16.mxu0 %v5912_v7  ;;  %v5083_v2 = vld [vmem:[#allocation7 + $0x80] sm:$0xff]  }
  0xf5   :  { %4942 = vmatprep.subr.bf16.mxu1 %v5059_v3 }
  0xf6   :  { %438 = vmatmul.mubr.bf16.gmra.mxu0 %v255_v60  ;;  %v5077_v60 = vld [vmem:[#allocation7 + $0x90] sm:$0xff]  }
  0xf7   :  { %4955 = vmatpush3.bf16.msra.mxu0 %v5068_v9  ;;  %4966 = vmatprep.mubr.msk.bf16.mxu0 %vm5913_vm4, %v5912_v7 }
  0xf8   :  { %4943 = vmatpush3.bf16.msra.mxu1 %v5059_v3  ;;  %4956 = vmatprep.subr.bf16.mxu0 %v5912_v7  ;;  %v5084_v3 = vld [vmem:[#allocation7] sm:$0xff]  }
  0xf9   :  { %4944 = vmatprep.subr.bf16.mxu1 %v5060_v4 }
  0xfb   :  { %4957 = vmatpush3.bf16.msra.mxu0 %v5071_v54 }
  0xfc   :  { %4945 = vmatpush3.bf16.msra.mxu1 %v5060_v4  ;;  %4958 = vmatprep.subr.bf16.mxu0 %v5912_v7  ;;  %v4406_v4 = vld [vmem:[%s6563_s4] ss:$0 sm:$0xff] }
  0xfd   :  { %4868 = vmatprep.subr.bf16.mxu1 %v5061_v5 }
  0xff   :  { %4959 = vmatpush3.bf16.msra.mxu0 %v5074_v57  ;;  %v5090_v57 = vld [vmem:[%s6531_s10 + $0x64] ss:$8 sps:$4 sm:$0xff]  }
 0x100   :  { %4960 = vmatprep.subr.bf16.mxu0 %v5912_v7 }
 0x103   :  { %4961 = vmatpush3.bf16.msra.mxu0 %v5077_v60  ;;  %v5091_v60 = vld [vmem:[%s6531_s10 + $0x50] ss:$8 sps:$4 sm:$0xff]  }
 0x104   :  { %4962 = vmatprep.subr.bf16.mxu0 %v5912_v7 }
 0x107   :  { %4963 = vmatpush3.bf16.msra.mxu0 %v5080_v63  ;;  %v5099_v63 = vld [vmem:[%s6531_s10 + $0x34] ss:$8 sps:$4 sm:$0xff]  }
 0x108   :  { %4964 = vmatprep.subr.bf16.mxu0 %v5912_v7 }
 0x10b   :  { %4965 = vmatpush3.bf16.msra.mxu0 %v5083_v2  ;;  %v5100_v2 = vld [vmem:[%s6531_s10 + $0x20] ss:$8 sps:$4 sm:$0xff]  }
 0x1ae   :  { %v429_v15 = vpop.f32.mrf.mxu0 }
 0x1af   :  { %v430_v38 = vadd.f32 %v429_v15, %v262_v36 }
 0x1b0   :  { %v431_v16 = vpop.f32.mrf.mxu0 }
 0x1b1   :  { %v432_v17 = vadd.f32 %v431_v16, %v266_v14 }
 0x1b2   :  { %v433_v18 = vpop.f32.mrf.mxu0 }
 0x1b3   :  { %v4403_v19 = vmul.f32 -1.442695, %v432_v17  ;;  %v434_v39 = vadd.f32 %v433_v18, %v262_v36 }
 0x1b4   :  { %v435_v20 = vpop.f32.mrf.mxu0 }
 0x1b5   :  { %5685 = vpow2.f32 %v4403_v19  ;;  %v436_v21 = vadd.f32 %v435_v20, %v266_v14 }
 0x1b6   :  { %v439_v22 = vpop.f32.mrf.mxu0 }
 0x1b7   :  { %v4404_v23 = vmul.f32 -1.442695, %v436_v21  ;;  %v440_v43 = vadd.f32 %v439_v22, %v262_v36 }
 0x1b8   :  { %v441_v24 = vpop.f32.mrf.mxu0 }
 0x1b9   :  { %5687 = vpow2.f32 %v4404_v23  ;;  %v442_v25 = vadd.f32 %v441_v24, %v266_v14 }
 0x1ba   :  { %v443_v26 = vpop.f32.mrf.mxu0 }
 0x1bb   :  { %v4405_v27 = vmul.f32 -1.442695, %v442_v25 }
 0x1bc   :  { %v444_v28 = vpop.f32.mrf.mxu0 }
 0x1bd   :  { %5689 = vpow2.f32 %v4405_v27 }
 0x1c2   :  { %v5686_v29 = vpop.eup %5685 }
 0x1c3   :  { %v455_v30 = vadd.f32 1.0, %v5686_v29 }
 0x1c5   :  { %5691 = vrcp.f32 %v455_v30 }
 0x1c6   :  { %v5688_v31 = vpop.eup %5687 }
 0x1c7   :  { %v456_v32 = vadd.f32 1.0, %v5688_v31 }
 0x1c9   :  { %5693 = vrcp.f32 %v456_v32 }
 0x1ca   :  { %v5690_v33 = vpop.eup %5689 }
 0x1cb   :  { %v457_v34 = vadd.f32 1.0, %v5690_v33 }
 0x1cd   :  { %5695 = vrcp.f32 %v457_v34 }
 0x1d2   :  { %v5692_v37 = vpop.eup %5691 }
 0x1d3   :  { %v464_v41 = vmul.f32 %v5692_v37, %v430_v38 }
 0x1d6   :  { %v5694_v40 = vpop.eup %5693 }
 0x1d7   :  { %v465_v42 = vmul.f32 %v5694_v40, %v434_v39 }
 0x1d9   :  { %v483_v44 = vpack.c.bf16 %v465_v42, %v464_v41 }
 0x1da   :  { %v5696_v45 = vpop.eup %5695 }
 0x1db   :  { %4946 = vmatprep.mubr.bf16.mxu1 %v483_v44  ;;  %v466_v46 = vmul.f32 %v5696_v45, %v440_v43 }
 0x1dd   :  { %v484_v48 = vpack.c.bf16 %v466_v46, %v466_v46  ;;  %v4415_v46 = vld [vmem:[%s6564_s0] ss:$0 sm:$0xff] }
 0x1df   :  { %4947 = vmatmul.mubr.bf16.vlgmr.msra.gmra.mxu1 %v484_v48 }
 0x1e0   :  { %4869 = vmatpush3.bf16.msra.mxu1 %v5063_v47 }
 0x1e1   :  { %4870 = vmatprep.subr.bf16.mxu1 %v5064_v49 }
 0x1e4   :  { %4871 = vmatpush3.bf16.msra.mxu1 %v5066_v50 }
 0x1e5   :  { %4872 = vmatprep.subr.bf16.mxu1 %v5067_v51 }
 0x1e8   :  { %4873 = vmatpush3.bf16.msra.mxu1 %v5069_v52 }
 0x1e9   :  { %4874 = vmatprep.subr.bf16.mxu1 %v5070_v53 }
 0x1ec   :  { %4875 = vmatpush3.bf16.msra.mxu1 %v5072_v55  ;;  %v5085_v55 = vld [vmem:[%s6531_s10 + $0x70] ss:$8 sps:$4 sm:$0xff]  }
 0x1ed   :  { %4876 = vmatprep.subr.bf16.mxu1 %v5073_v56  ;;  %v5087_v56 = vld [vmem:[%s6531_s10 + $0x74] ss:$8 sps:$4 sm:$0xff]  }
 0x1f0   :  { %4877 = vmatpush3.bf16.msra.mxu1 %v5075_v58  ;;  %v5088_v58 = vld [vmem:[%s6531_s10 + $0x60] ss:$8 sps:$4 sm:$0xff]  }
 0x1f1   :  { %4878 = vmatprep.subr.bf16.mxu1 %v5076_v59  ;;  %v5093_v59 = vld [vmem:[%s6531_s10 + $0x54] ss:$8 sps:$4 sm:$0xff]  }
 0x1f4   :  { %4879 = vmatpush3.bf16.msra.mxu1 %v5078_v61  ;;  %v5096_v61 = vld [vmem:[%s6531_s10 + $0x44] ss:$8 sps:$4 sm:$0xff]  }
 0x1f5   :  { %4880 = vmatprep.subr.bf16.mxu1 %v5079_v62  ;;  %v5094_v62 = vld [vmem:[%s6531_s10 + $0x40] ss:$8 sps:$4 sm:$0xff]  }
 0x1f8   :  { %4881 = vmatpush3.bf16.msra.mxu1 %v5081_v0  ;;  %v5097_v0 = vld [vmem:[%s6531_s10 + $0x30] ss:$8 sps:$4 sm:$0xff]  }
 0x1f9   :  { %4882 = vmatprep.subr.bf16.mxu1 %v5082_v1  ;;  %v5102_v1 = vld [vmem:[%s6531_s10 + $0x24] ss:$8 sps:$4 sm:$0xff]  }
 0x1fc   :  { %4883 = vmatpush3.bf16.msra.mxu1 %v5084_v3  ;;  %v5105_v3 = vld [vmem:[%s6531_s10 + $0x14] ss:$8 sps:$4 sm:$0xff]  }
 0x1fd   :  { %1261 = vmatprep.subr.bf16.mxu1 %v5087_v56 }
 0x29f   :  { %v4948_v5 = vpop.f32.mrf.mxu1 }
 0x2a0   :  { %v583_v6 = vadd.f32 %v4948_v5, %v4406_v4  ;;  %v5108_v5 = vld [vmem:[%s6531_s10 + $0x4] ss:$8 sps:$4 sm:$0xff]  }
 0x2a1   :  { %v574_v8 = vpop.f32.mrf.mxu1 }
 0x2a2   :  { %v590_v10 = vmax.f32 %v583_v6, 0.0  ;;  %v575_v14 = vadd.f32 %v4406_v4, %v574_v8  ;;  %v5106_v6 = vld [vmem:[%s6531_s10] ss:$8 sps:$4 sm:$0xff]  }
 0x2a3   :  { %v4949_v9 = vpop.f32.mrf.mxu1 }
 0x2a4   :  { %v602_v16 = vrot.slane %v590_v10, 1  ;;  %v604_v17 = vrot.slane %v590_v10, 2  ;;  %v588_v19 = vmax.f32 %v575_v14, 0.0 }
 0x2a5   :  { %v577_v13 = vpop.f32.mrf.mxu1 }
 0x2a6   :  { %v578_v15 = vadd.f32 %v4406_v4, %v577_v13  ;;  %v607_v22 = vrot.slane %v602_v16, 2  ;;  %v610_v23 = vrot.slane %v604_v17, 2  ;;  %v593_v26 = vrot.slane %v588_v19, 1  ;;  %v5103_v4 = vld [vmem:[%s6531_s10 + $0x10] ss:$8 sps:$4 sm:$0xff]  }
 0x2a7   :  { %v597_v27 = vrot.slane %v588_v19, 2 }
 0x2a8   :  { %v589_v18 = vmax.f32 %v578_v15, 0.0 }
 0x2aa   :  { %v594_v20 = vrot.slane %v589_v18, 1  ;;  %v598_v21 = vrot.slane %v589_v18, 2  ;;  %v5111_v18 = vld [vmem:[%s6531_s10 + $0x174] ss:$8 sps:$4 sm:$0xff]  }
 0x2ab   :  { %1304 = vmatprep.subr.bf16.mxu0 %v5111_v18 }
 0x2ac   :  { %v603_v24 = vsel %vm182_vm0, %v594_v20, %v602_v16  ;;  %v605_v25 = vsel %vm192_vm1, %v598_v21, %v604_v17  ;;  %v599_v30 = vsel %vm192_vm1, %v597_v27, %v598_v21  ;;  %v595_v32 = vsel %vm182_vm0, %v593_v26, %v594_v20  ;;  %v5114_v20 = vld [vmem:[%s6531_s10 + $0xf4] ss:$8 sps:$4 sm:$0xff]   ;;  %v5112_v21 = vld [vmem:[%s6531_s10 + $0xf0] ss:$8 sps:$4 sm:$0xff]  }
 0x2ad   :  { %v606_v28 = vrot.slane %v603_v24, 2  ;;  %v609_v29 = vrot.slane %v605_v25, 2  ;;  %v663_v37 = vpack.c.bf16 %v605_v25, %v588_v19  ;;  %v5109_v19 = vld [vmem:[%s6531_s10 + $0x170] ss:$8 sps:$4 sm:$0xff]   ;;  %v5120_v24 = vld [vmem:[%s6531_s10 + $0xe4] ss:$8 sps:$4 sm:$0xff]  }
 0x2ae   :  { %v5118_v25 = vld [vmem:[%s6531_s10 + $0xe0] ss:$8 sps:$4 sm:$0xff]   ;;  %v5123_v26 = vld [vmem:[%s6531_s10 + $0x154] ss:$8 sps:$4 sm:$0xff]   ;;  %v5121_v27 = vld [vmem:[%s6531_s10 + $0x150] ss:$8 sps:$4 sm:$0xff]  }
 0x2af   :  { %v611_v31 = vsel %vm192_vm1, %v609_v29, %v610_v23  ;;  %v608_v33 = vsel %vm192_vm1, %v606_v28, %v607_v22  ;;  %v5117_v22 = vld [vmem:[%s6531_s10 + $0x164] ss:$8 sps:$4 sm:$0xff]   ;;  %v5115_v23 = vld [vmem:[%s6531_s10 + $0x160] ss:$8 sps:$4 sm:$0xff]   ;;  %v5124_v28 = vld [vmem:[%s6531_s10 + $0xd0] ss:$8 sps:$4 sm:$0xff]  }
 0x2b0   :  { %v665_v34 = vpack.c.bf16 %v611_v31, %v599_v30  ;;  %v664_v36 = vpack.c.bf16 %v608_v33, %v595_v32  ;;  %v5126_v29 = vld [vmem:[%s6531_s10 + $0xd4] ss:$8 sps:$4 sm:$0xff]   ;;  %v5129_v30 = vld [vmem:[%s6531_s10 + $0x144] ss:$8 sps:$4 sm:$0xff]   ;;  %v5127_v31 = vld [vmem:[%s6531_s10 + $0x140] ss:$8 sps:$4 sm:$0xff]  }
 0x2b1   :  { %v5132_v32 = vld [vmem:[%s6531_s10 + $0xc4] ss:$8 sps:$4 sm:$0xff]   ;;  %v5130_v33 = vld [vmem:[%s6531_s10 + $0xc0] ss:$8 sps:$4 sm:$0xff]  }
 0x2b2   :  { %849 = vmatprep.mubr.bf16.mxu1 %v664_v36  ;;  %4967 = vmatmul.mubr.bf16.vlgmr.msra.gmra.mxu0 %v665_v34  ;;  %v5135_v34 = vld [vmem:[%s6531_s10 + $0x134] ss:$8 sps:$4 sm:$0xff]  }
 0x2b3   :  { %850 = vmatmul.mubr.bf16.vlgmr.msra.gmra.mxu1 %v663_v37  ;;  %1305 = vmatpush1.bf16.msra.mxu0 %v5109_v19  ;;  %v5138_v36 = vld [vmem:[%s6531_s10 + $0xb4] ss:$8 sps:$4 sm:$0xff]   ;;  %v5133_v37 = vld [vmem:[%s6531_s10 + $0x130] ss:$8 sps:$4 sm:$0xff]  }
 0x2b4   :  { %1262 = vmatpush1.bf16.msra.mxu1 %v5085_v55  ;;  %1306 = vmatprep.subr.bf16.mxu0 %v5117_v22  ;;  %v5160_v22 = vld [vmem:[#allocation8 + $0x20] sm:$0xff]  }
 0x2b5   :  { %1263 = vmatprep.subr.bf16.mxu1 %v5090_v57 }
 0x2b7   :  { %1307 = vmatpush1.bf16.msra.mxu0 %v5115_v23  ;;  %v5161_v23 = vld [vmem:[#allocation8 + $0x18] sm:$0xff]  }
 0x2b8   :  { %1264 = vmatpush1.bf16.msra.mxu1 %v5088_v58  ;;  %1308 = vmatprep.subr.bf16.mxu0 %v5123_v26  ;;  %v5164_v26 = vld [vmem:[#allocation8] sm:$0xff]  }
 0x2b9   :  { %1265 = vmatprep.subr.bf16.mxu1 %v5093_v59  ;;  %v4440_v59 = vld [vmem:[%s6565_s14] ss:$0 sm:$0xff] }
 0x2bb   :  { %1309 = vmatpush1.bf16.msra.mxu0 %v5121_v27  ;;  %v5165_v27 = vld [vmem:[#allocation10 + $0x70] ss:$8 sps:$4 sm:$0xff]  }
 0x2bc   :  { %1266 = vmatpush1.bf16.msra.mxu1 %v5091_v60  ;;  %1310 = vmatprep.subr.bf16.mxu0 %v5129_v30  ;;  %v5168_v30 = vld [vmem:[#allocation10 + $0x60] ss:$8 sps:$4 sm:$0xff]  }
 0x2bd   :  { %1267 = vmatprep.subr.bf16.mxu1 %v5096_v61  ;;  %v4441_v61 = vld [vmem:[%s6566_s2] ss:$0 sm:$0xff] }
 0x2bf   :  { %1311 = vmatpush1.bf16.msra.mxu0 %v5127_v31  ;;  %v5173_v31 = vld [vmem:[#allocation10 + $0x54] ss:$8 sps:$4 sm:$0xff]  }
 0x2c0   :  { %1268 = vmatpush1.bf16.msra.mxu1 %v5094_v62  ;;  %1312 = vmatprep.subr.bf16.mxu0 %v5135_v34  ;;  %v5176_v34 = vld [vmem:[#allocation10 + $0x44] ss:$8 sps:$4 sm:$0xff]  }
 0x2c1   :  { %1269 = vmatprep.subr.bf16.mxu1 %v5099_v63 }
 0x2c3   :  { %1313 = vmatpush1.bf16.msra.mxu0 %v5133_v37  ;;  %v5179_v37 = vld [vmem:[#allocation10 + $0x34] ss:$8 sps:$4 sm:$0xff]  }
 0x2c4   :  { %1270 = vmatpush1.bf16.msra.mxu1 %v5097_v0 }
 0x2c5   :  { %1271 = vmatprep.subr.bf16.mxu1 %v5102_v1 }
 0x2c8   :  { %1272 = vmatpush1.bf16.msra.mxu1 %v5100_v2 }
 0x2c9   :  { %1273 = vmatprep.subr.bf16.mxu1 %v5105_v3 }
 0x2cc   :  { %1274 = vmatpush1.bf16.msra.mxu1 %v5103_v4 }
 0x2cd   :  { %1275 = vmatprep.subr.bf16.mxu1 %v5108_v5 }
 0x2d0   :  { %1276 = vmatpush1.bf16.msra.mxu1 %v5106_v6 }
 0x2d1   :  { %1277 = vmatprep.subr.bf16.mxu1 %v5114_v20  ;;  %v5158_v20 = vld [vmem:[#allocation8 + $0x30] sm:$0xff]  }
 0x2d4   :  { %1278 = vmatpush2.bf16.msra.mxu1 %v5112_v21  ;;  %v5159_v21 = vld [vmem:[#allocation8 + $0x28] sm:$0xff]  }
 0x2d5   :  { %1279 = vmatprep.subr.bf16.mxu1 %v5120_v24  ;;  %v5162_v24 = vld [vmem:[#allocation8 + $0x10] sm:$0xff]  }
 0x2d8   :  { %1280 = vmatpush2.bf16.msra.mxu1 %v5118_v25  ;;  %v5163_v25 = vld [vmem:[#allocation8 + $0x8] sm:$0xff]  }
 0x2d9   :  { %1281 = vmatprep.subr.bf16.mxu1 %v5126_v29  ;;  %v5170_v29 = vld [vmem:[#allocation10 + $0x64] ss:$8 sps:$4 sm:$0xff]  }
 0x2dc   :  { %1282 = vmatpush2.bf16.msra.mxu1 %v5124_v28  ;;  %v5167_v28 = vld [vmem:[#allocation10 + $0x74] ss:$8 sps:$4 sm:$0xff]  }
 0x2dd   :  { %1283 = vmatprep.subr.bf16.mxu1 %v5132_v32  ;;  %v5191_v32 = vld [vmem:[#allocation10 + $0x174] ss:$8 sps:$4 sm:$0xff]  }
 0x2e0   :  { %1284 = vmatpush2.bf16.msra.mxu1 %v5130_v33  ;;  %v5171_v33 = vld [vmem:[#allocation10 + $0x50] ss:$8 sps:$4 sm:$0xff]  }
 0x2e1   :  { %1285 = vmatprep.subr.bf16.mxu1 %v5138_v36  ;;  %v5174_v36 = vld [vmem:[#allocation10 + $0x40] ss:$8 sps:$4 sm:$0xff]  }
 0x372   :  { %v892_v38 = vpop.f32.mrf.mxu0 }
 0x373   :  { %v4884_v39 = vpop.f32.mrf.mxu1 }
 0x374   :  { %v4968_v40 = vpop.f32.mrf.mxu0 }
 0x375   :  { %v4885_v41 = vpop.f32.mrf.mxu1  ;;  %v5144_v40 = vld [vmem:[%s6531_s10 + $0xa4] ss:$8 sps:$4 sm:$0xff]  }
 0x376   :  { %v895_v42 = vpop.f32.mrf.mxu0  ;;  %v4886_v44 = vadd.f32 %v4885_v41, %v4884_v39  ;;  %v5141_v39 = vld [vmem:[%s6531_s10 + $0x124] ss:$8 sps:$4 sm:$0xff]   ;;  %v5914_v41 = vmov 0  }
 0x377   :  { %v4887_v43 = vpop.f32.mrf.mxu1  ;;  %1336 = vmatprep.mubr.bf16.mxu0 %v5914_v41  ;;  %1314 = vmatprep.subr.bf16.mxu0 %v5141_v39  ;;  %v5180_v39 = vld [vmem:[#allocation10 + $0x20] ss:$8 sps:$4 sm:$0xff]  }
 0x378   :  { %v4969_v45 = vpop.f32.mrf.mxu0  ;;  %v852_v49 = vadd.f32 %v4886_v44, %v4415_v46  ;;  %v5147_v44 = vld [vmem:[%s6531_s10 + $0x114] ss:$8 sps:$4 sm:$0xff]  }
 0x379   :  { %v4888_v47 = vpop.f32.mrf.mxu1  ;;  %v5150_v45 = vld [vmem:[%s6531_s10 + $0x94] ss:$8 sps:$4 sm:$0xff]  }
 0x37a   :  { %v4889_v48 = vadd.f32 %v4888_v47, %v4887_v43  ;;  %v893_v53 = vadd.f32 %v892_v38, %v852_v49  ;;  %v5136_v38 = vld [vmem:[%s6531_s10 + $0xb0] ss:$8 sps:$4 sm:$0xff]   ;;  %v5142_v43 = vld [vmem:[%s6531_s10 + $0xa0] ss:$8 sps:$4 sm:$0xff]   ;;  %v5156_v49 = vld [vmem:[%s6531_s10 + $0x84] ss:$8 sps:$4 sm:$0xff]  }
 0x37b   :  { %1286 = vmatpush2.bf16.msra.mxu1 %v5136_v38  ;;  %v5148_v47 = vld [vmem:[%s6531_s10 + $0x90] ss:$8 sps:$4 sm:$0xff]   ;;  %v5182_v38 = vld [vmem:[#allocation10 + $0x24] ss:$8 sps:$4 sm:$0xff]  }
 0x37c   :  { %v855_v50 = vadd.f32 %v4889_v48, %v4415_v46  ;;  %v899_v54 = vmax.f32 %v893_v53, 0.0  ;;  %1287 = vmatprep.subr.bf16.mxu1 %v5144_v40  ;;  %v5145_v46 = vld [vmem:[%s6531_s10 + $0x110] ss:$8 sps:$4 sm:$0xff]   ;;  %v5153_v48 = vld [vmem:[%s6531_s10 + $0x104] ss:$8 sps:$4 sm:$0xff]  }
 0x37d   :  { %v5185_v40 = vld [vmem:[#allocation10 + $0x14] ss:$8 sps:$4 sm:$0xff]  }
 0x37e   :  { %v896_v51 = vadd.f32 %v895_v42, %v855_v50  ;;  %v5139_v42 = vld [vmem:[%s6531_s10 + $0x120] ss:$8 sps:$4 sm:$0xff]  }
 0x37f   :  { %1315 = vmatpush1.bf16.msra.mxu0 %v5139_v42  ;;  %1288 = vmatpush2.bf16.msra.mxu1 %v5142_v43  ;;  %v5151_v50 = vld [vmem:[%s6531_s10 + $0x100] ss:$8 sps:$4 sm:$0xff]   ;;  %v5183_v42 = vld [vmem:[#allocation10 + $0x10] ss:$8 sps:$4 sm:$0xff]   ;;  %v5188_v43 = vld [vmem:[#allocation10 + $0x4] ss:$8 sps:$4 sm:$0xff]  }
 0x380   :  { %v900_v52 = vmax.f32 %v896_v51, 0.0  ;;  %1316 = vmatprep.subr.bf16.mxu0 %v5147_v44  ;;  %1289 = vmatprep.subr.bf16.mxu1 %v5150_v45  ;;  %v5154_v51 = vld [vmem:[%s6531_s10 + $0x80] ss:$8 sps:$4 sm:$0xff]   ;;  %v5194_v45 = vld [vmem:[#allocation10 + $0xf4] ss:$8 sps:$4 sm:$0xff]   ;;  %s5915_s10 = smov [#allocation14]  }
 0x381   :  { %v5186_v44 = vld [vmem:[#allocation10] ss:$8 sps:$4 sm:$0xff]   ;;  %s4365_s29 = sshll.u32 %s5915_s10, 4  ;;  %s4366_s29 = int_to_ptr.vmem [resolvable:$true] %s4365_s29 }
 0x382   :  { %903 = vadd.xlane.f32.xlu1 %v900_v52  ;;  %s5869_s2 = scalar_lea.vmem %s4366_s29, 32  ;;  %p5874_p8 = scmp.lt.s32.totalorder %s4366_s29, %s4366_s29 }
 0x383   :  { %1317 = vmatpush1.bf16.msra.mxu0 %v5145_v46  ;;  %1290 = vmatpush2.bf16.msra.mxu1 %v5148_v47  ;;  %v5192_v46 = vld [vmem:[#allocation10 + $0xf0] ss:$8 sps:$4 sm:$0xff]   ;;  %v5200_v47 = vld [vmem:[#allocation10 + $0xe4] ss:$8 sps:$4 sm:$0xff]   ;;  %p5870_p7 = scmp.ne.s32.totalorder %s4366_s29, %s5869_s2  ;;  %p5875_p9 = scmp.lt.s32.totalorder %s5869_s2, %s5869_s2 }
 0x384   :  { %1318 = vmatprep.subr.bf16.mxu0 %v5153_v48  ;;  %1291 = vmatprep.subr.bf16.mxu1 %v5156_v49  ;;  %v5198_v48 = vld [vmem:[#allocation10 + $0xe0] ss:$8 sps:$4 sm:$0xff]   ;;  %v5206_v49 = vld [vmem:[#allocation10 + $0xd4] ss:$8 sps:$4 sm:$0xff]  }
 0x385   :  { %p5876_p10 = por %p5875_p9, %p5874_p8 }
 0x386   :  { %901 = vadd.xlane.f32.xlu1 %v899_v54 }
 0x387   :  { %1319 = vmatpush1.bf16.msra.mxu0 %v5151_v50  ;;  %1292 = vmatpush2.bf16.msra.mxu1 %v5154_v51  ;;  %v5204_v50 = vld [vmem:[#allocation10 + $0xd0] ss:$8 sps:$4 sm:$0xff]   ;;  %v5212_v51 = vld [vmem:[#allocation10 + $0xc4] ss:$8 sps:$4 sm:$0xff]   ;;  %p5877_p11 = pnand %p5876_p10, %p5870_p7 }
 0x388   :  { %4970 = vmatprep.subr.bf16.mxu0 %v5912_v7  ;;  %1801 = vmatprep.subr.bf16.mxu1 %v5167_v28  ;;  %v5207_v28 = vld [vmem:[#allocation10 + $0x140] ss:$8 sps:$4 sm:$0xff]  }
 0x40b   :  { %v904_v8 = vpop.xlane.xlu1 %903 }
 0x40c   :  { %v907_v9 = vmul.f32 0.0078125, %v904_v8 }
 0x40e   :  { %v6214_v10 = vsub.f32 %v900_v52, %v907_v9 }
 0x40f   :  { %v902_v13 = vpop.xlane.xlu1 %901 }
 0x410   :  { %v906_v14 = vmul.f32 0.0078125, %v902_v13  ;;  %v911_v15 = vmul.f32 %v6214_v10, %v6214_v10 }
 0x412   :  { %v6218_v16 = vsub.f32 %v899_v54, %v906_v14  ;;  %914 = vadd.xlane.f32.xlu0 %v911_v15 }
 0x414   :  { %v910_v17 = vmul.f32 %v6218_v16, %v6218_v16 }
 0x416   :  { %912 = vadd.xlane.f32.xlu1 %v910_v17 }
 0x49b   :  { %v915_v52 = vpop.xlane.xlu0 %914 }
 0x49c   :  { %v917_v53 = vmul.f32 0.0078125, %v915_v52  ;;  %v5210_v52 = vld [vmem:[#allocation10 + $0xc0] ss:$8 sps:$4 sm:$0xff]  }
 0x49e   :  { %v919_v54 = vadd.f32 1e-05, %v917_v53  ;;  %v1009_v53 = vld [vmem:[%s6567_s22] sm:$0x3] }
 0x49f   :  { %v913_v55 = vpop.xlane.xlu1 %912 }
 0x4a0   :  { %5697 = vrsqrt.f32 %v919_v54  ;;  %v916_v56 = vmul.f32 0.0078125, %v913_v55  ;;  %v1018_v55 = vrot.slane %v1009_v53, %v6138_v12 }
 0x4a2   :  { %v918_v57 = vadd.f32 1e-05, %v916_v56 }
 0x4a4   :  { %5699 = vrsqrt.f32 %v918_v57 }
 0x4ad   :  { %v5698_v58 = vpop.eup %5697 }
 0x4ae   :  { %v923_v60 = vmul.f32 %v5698_v58, %v6214_v10 }
 0x4b0   :  { %v932_v62 = vmul.f32 %v4440_v59, %v923_v60 }
 0x4b1   :  { %v5700_v63 = vpop.eup %5699 }
 0x4b2   :  { %v922_v0 = vmul.f32 %v5700_v63, %v6218_v16  ;;  %v941_v1 = vadd.f32 %v4441_v61, %v932_v62  ;;  %v5157_v16 = vld [vmem:[#allocation8 + $0x38] sm:$0xff]  }
 0x4b4   :  { %v931_v2 = vmul.f32 %v4440_v59, %v922_v0  ;;  %v948_v3 = vrot.slane %v941_v1, 1  ;;  %v949_v4 = vrot.slane %v941_v1, 2 }
 0x4b6   :  { %v940_v5 = vadd.f32 %v4441_v61, %v931_v2  ;;  %v950_v8 = vrot.slane %v948_v3, 2  ;;  %v951_v13 = vrot.slane %v949_v4, 2 }
 0x4b8   :  { %v943_v6 = vrot.slane %v940_v5, 1  ;;  %v945_v9 = vrot.slane %v940_v5, 2  ;;  %v955_v14 = vsel %vm192_vm1, %v940_v5, %v949_v4 }
 0x4b9   :  { %v1006_v19 = vpack.c.bf16 %v949_v4, %v955_v14 }
 0x4ba   :  { %v956_v10 = vsel %vm192_vm1, %v943_v6, %v950_v8  ;;  %v957_v15 = vsel %vm192_vm1, %v945_v9, %v951_v13 }
 0x4bb   :  { %v1007_v17 = vpack.c.bf16 %v950_v8, %v956_v10  ;;  %v1008_v18 = vpack.c.bf16 %v951_v13, %v957_v15  ;;  %v1014_v13 = vrot.slane %v1009_v53, %v6145_v35 }
 0x4bd   :  { %1293 = vmatprep.mubr.bf16.mxu1 %v1007_v17  ;;  %1337 = vmatmul.mubr.bf16.vlgmr.msra.gmra.mxu0 %v1008_v18 }
 0x4be   :  { %1294 = vmatmul.mubr.bf16.vlgmr.msra.gmra.mxu1 %v1006_v19  ;;  %4986 = vmatprep.mubr.msk.bf16.mxu0 %vm5913_vm4, %v5912_v7 }
 0x4bf   :  { %4971 = vmatpush3.bf16.msra.mxu0 %v5157_v16  ;;  %1802 = vmatpush1.bf16.msra.mxu1 %v5165_v27  ;;  %v5209_v27 = vld [vmem:[#allocation10 + $0x144] ss:$8 sps:$4 sm:$0xff]  }
 0x4c0   :  { %4972 = vmatprep.subr.bf16.mxu0 %v5912_v7  ;;  %1803 = vmatprep.subr.bf16.mxu1 %v5170_v29  ;;  %v5215_v29 = vld [vmem:[#allocation10 + $0x134] ss:$8 sps:$4 sm:$0xff]  }
 0x4c3   :  { %4973 = vmatpush3.bf16.msra.mxu0 %v5158_v20  ;;  %1804 = vmatpush1.bf16.msra.mxu1 %v5168_v30  ;;  %v5213_v30 = vld [vmem:[#allocation10 + $0x130] ss:$8 sps:$4 sm:$0xff]  }
 0x4c4   :  { %4974 = vmatprep.subr.bf16.mxu0 %v5912_v7  ;;  %1805 = vmatprep.subr.bf16.mxu1 %v5173_v31  ;;  %v5218_v31 = vld [vmem:[#allocation10 + $0xb4] ss:$8 sps:$4 sm:$0xff]  }
 0x4c7   :  { %4975 = vmatpush3.bf16.msra.mxu0 %v5159_v21  ;;  %1806 = vmatpush1.bf16.msra.mxu1 %v5171_v33  ;;  %v5189_v21 = vld [vmem:[#allocation10 + $0x170] ss:$8 sps:$4 sm:$0xff]   ;;  %v5221_v33 = vld [vmem:[#allocation10 + $0x124] ss:$8 sps:$4 sm:$0xff]  }
 0x4c8   :  { %4976 = vmatprep.subr.bf16.mxu0 %v5912_v7  ;;  %1807 = vmatprep.subr.bf16.mxu1 %v5176_v34  ;;  %v5219_v34 = vld [vmem:[#allocation10 + $0x120] ss:$8 sps:$4 sm:$0xff]  }
 0x4cb   :  { %4977 = vmatpush3.bf16.msra.mxu0 %v5160_v22  ;;  %1808 = vmatpush1.bf16.msra.mxu1 %v5174_v36  ;;  %v5222_v36 = vld [vmem:[#allocation10 + $0xa0] ss:$8 sps:$4 sm:$0xff]  }
 0x4cc   :  { %4978 = vmatprep.subr.bf16.mxu0 %v5912_v7  ;;  %1809 = vmatprep.subr.bf16.mxu1 %v5179_v37  ;;  %v5227_v37 = vld [vmem:[#allocation10 + $0x114] ss:$8 sps:$4 sm:$0xff]  }
 0x4cf   :  { %4979 = vmatpush3.bf16.msra.mxu0 %v5161_v23  ;;  %v5197_v23 = vld [vmem:[#allocation10 + $0x164] ss:$8 sps:$4 sm:$0xff]  }
 0x4d0   :  { %4980 = vmatprep.subr.bf16.mxu0 %v5912_v7 }
 0x4d3   :  { %4981 = vmatpush3.bf16.msra.mxu0 %v5162_v24  ;;  %v5195_v24 = vld [vmem:[#allocation10 + $0x160] ss:$8 sps:$4 sm:$0xff]  }
 0x4d4   :  { %4982 = vmatprep.subr.bf16.mxu0 %v5912_v7 }
 0x4d7   :  { %4983 = vmatpush3.bf16.msra.mxu0 %v5163_v25  ;;  %v5203_v25 = vld [vmem:[#allocation10 + $0x154] ss:$8 sps:$4 sm:$0xff]  }
 0x4d8   :  { %4984 = vmatprep.subr.bf16.mxu0 %v5912_v7  ;;  %v5177_v7 = vld [vmem:[#allocation10 + $0x30] ss:$8 sps:$4 sm:$0xff]  }
 0x4d9   :  { %1810 = vmatpush1.bf16.msra.mxu1 %v5177_v7  ;;  %v5225_v7 = vld [vmem:[#allocation10 + $0x110] ss:$8 sps:$4 sm:$0xff]  }
 0x4da   :  { %1811 = vmatprep.subr.bf16.mxu1 %v5182_v38  ;;  %v5230_v38 = vld [vmem:[#allocation10 + $0x94] ss:$8 sps:$4 sm:$0xff]  }
 0x4db   :  { %4985 = vmatpush3.bf16.msra.mxu0 %v5164_v26  ;;  %v5201_v26 = vld [vmem:[#allocation10 + $0x150] ss:$8 sps:$4 sm:$0xff]  }
 0x4dc   :  { %1842 = vmatprep.subr.bf16.mxu0 %v5191_v32  ;;  %v5216_v32 = vld [vmem:[#allocation10 + $0xb0] ss:$8 sps:$4 sm:$0xff]  }
 0x4dd   :  { %1812 = vmatpush1.bf16.msra.mxu1 %v5180_v39  ;;  %v5228_v39 = vld [vmem:[#allocation10 + $0x90] ss:$8 sps:$4 sm:$0xff]  }
 0x4de   :  { %1813 = vmatprep.subr.bf16.mxu1 %v5185_v40  ;;  %v5233_v40 = vld [vmem:[#allocation10 + $0x104] ss:$8 sps:$4 sm:$0xff]  }
 0x4e1   :  { %1814 = vmatpush1.bf16.msra.mxu1 %v5183_v42  ;;  %v5231_v42 = vld [vmem:[#allocation10 + $0x100] ss:$8 sps:$4 sm:$0xff]  }
 0x4e2   :  { %1815 = vmatprep.subr.bf16.mxu1 %v5188_v43  ;;  %v5234_v43 = vld [vmem:[#allocation10 + $0x80] ss:$8 sps:$4 sm:$0xff]  }
 0x4e5   :  { %1816 = vmatpush1.bf16.msra.mxu1 %v5186_v44  ;;  %v5236_v44 = vld [vmem:[#allocation10 + $0x84] ss:$8 sps:$4 sm:$0xff]  }
 0x4e6   :  { %1817 = vmatprep.subr.bf16.mxu1 %v5194_v45  ;;  %v4492_v45 = vld [vmem:[%s6532_s11] ss:$0 sm:$0xff] }
 0x4e9   :  { %1818 = vmatpush2.bf16.msra.mxu1 %v5192_v46 }
 0x4ea   :  { %1819 = vmatprep.subr.bf16.mxu1 %v5200_v47 }
 0x4ed   :  { %1820 = vmatpush2.bf16.msra.mxu1 %v5198_v48 }
 0x4ee   :  { %1821 = vmatprep.subr.bf16.mxu1 %v5206_v49 }
 0x4f1   :  { %1822 = vmatpush2.bf16.msra.mxu1 %v5204_v50 }
 0x4f2   :  { %1823 = vmatprep.subr.bf16.mxu1 %v5212_v51 }
 0x4f5   :  { %1824 = vmatpush2.bf16.msra.mxu1 %v5210_v52 }
 0x4f6   :  { %1825 = vmatprep.subr.bf16.mxu1 %v5218_v31  ;;  %v5245_v31 = vld [vmem:[#allocation11 + $0xc4] ss:$16 sps:$4 sm:$0xff]  }
 0x4f9   :  { %1826 = vmatpush2.bf16.msra.mxu1 %v5216_v32  ;;  %v5248_v32 = vld [vmem:[#allocation11 + $0x2c4] ss:$16 sps:$4 sm:$0xff]  }
 0x57d   :  { %v1338_v54 = vpop.f32.mrf.mxu0 }
 0x57e   :  { %v1295_v56 = vpop.f32.mrf.mxu1 }
 0x57f   :  { %v1340_v57 = vpop.f32.mrf.mxu0  ;;  %v1296_v14 = vadd.f32 %v1295_v56, %v1014_v13 }
 0x580   :  { %v1297_v58 = vpop.f32.mrf.mxu1 }
 0x581   :  { %v1298_v59 = vadd.f32 %v1297_v58, %v1018_v55  ;;  %v1342_v60 = vpop.f32.mrf.mxu0  ;;  %v1339_v17 = vadd.f32 %v1338_v54, %v1296_v14 }
 0x582   :  { %v1299_v61 = vpop.f32.mrf.mxu1 }
 0x583   :  { %v1341_v62 = vadd.f32 %v1340_v57, %v1298_v59  ;;  %v1344_v2 = vpop.f32.mrf.mxu0  ;;  %v1300_v10 = vadd.f32 %v1299_v61, %v1014_v13 }
 0x584   :  { %v1301_v63 = vpop.f32.mrf.mxu1 }
 0x585   :  { %v4490_v0 = vmul.f32 -1.442695, %v1341_v62  ;;  %v1302_v1 = vadd.f32 %v1301_v63, %v1018_v55  ;;  %v1343_v18 = vadd.f32 %v1342_v60, %v1300_v10 }
 0x587   :  { %5701 = vpow2.f32 %v4490_v0  ;;  %v1345_v3 = vadd.f32 %v1344_v2, %v1302_v1 }
 0x589   :  { %v4491_v4 = vmul.f32 -1.442695, %v1345_v3 }
 0x58b   :  { %5703 = vpow2.f32 %v4491_v4 }
 0x594   :  { %v5702_v5 = vpop.eup %5701 }
 0x595   :  { %v1353_v6 = vadd.f32 1.0, %v5702_v5 }
 0x597   :  { %5705 = vrcp.f32 %v1353_v6  ;;  %v1549_v6 = vld [vmem:[%s6534_s13] sm:$0x3] }
 0x598   :  { %v5704_v8 = vpop.eup %5703  ;;  %v1558_v14 = vrot.slane %v1549_v6, %v6138_v12 }
 0x599   :  { %v1354_v9 = vadd.f32 1.0, %v5704_v8 }
 0x59b   :  { %5707 = vrcp.f32 %v1354_v9  ;;  %v1554_v9 = vrot.slane %v1549_v6, %v6145_v35  ;;  %v5293_v6 = vld [vmem:[#allocation11 + $0x1c4] ss:$16 sps:$4 sm:$0xff]  }
 0x5a4   :  { %v5706_v15 = vpop.eup %5705 }
 0x5a5   :  { %v1359_v16 = vmul.f32 %v5706_v15, %v1339_v17 }
 0x5a8   :  { %v5708_v19 = vpop.eup %5707 }
 0x5a9   :  { %v1360_v20 = vmul.f32 %v5708_v19, %v1343_v18 }
 0x5ab   :  { %v1377_v22 = vpack.c.bf16 %v1360_v20, %v1359_v16 }
 0x5ad   :  { %4987 = vmatmul.mubr.bf16.vlgmr.msra.gmra.mxu0 %v1377_v22 }
 0x5ae   :  { %1843 = vmatpush1.bf16.msra.mxu0 %v5189_v21  ;;  %1874 = vmatprep.mubr.bf16.mxu0 %v5914_v41  ;;  %v5224_v41 = vld [vmem:[#allocation10 + $0xa4] ss:$8 sps:$4 sm:$0xff]  }
 0x5af   :  { %1844 = vmatprep.subr.bf16.mxu0 %v5197_v23  ;;  %1827 = vmatprep.subr.bf16.mxu1 %v5224_v41  ;;  %v5251_v41 = vld [vmem:[#allocation11 + $0xa4] ss:$16 sps:$4 sm:$0xff]  }
 0x5b0   :  { %1828 = vmatpush2.bf16.msra.mxu1 %v5222_v36  ;;  %v5254_v36 = vld [vmem:[#allocation11 + $0x2a4] ss:$16 sps:$4 sm:$0xff]  }
 0x5b1   :  { %1829 = vmatprep.subr.bf16.mxu1 %v5230_v38  ;;  %v5257_v38 = vld [vmem:[#allocation11 + $0x84] ss:$16 sps:$4 sm:$0xff]  }
 0x5b2   :  { %1845 = vmatpush1.bf16.msra.mxu0 %v5195_v24 }
 0x5b3   :  { %1846 = vmatprep.subr.bf16.mxu0 %v5203_v25 }
 0x5b4   :  { %1830 = vmatpush2.bf16.msra.mxu1 %v5228_v39  ;;  %v5260_v39 = vld [vmem:[#allocation11 + $0x284] ss:$16 sps:$4 sm:$0xff]  }
 0x5b5   :  { %1831 = vmatprep.subr.bf16.mxu1 %v5236_v44  ;;  %v5266_v44 = vld [vmem:[#allocation11 + $0x264] ss:$16 sps:$4 sm:$0xff]  }
 0x5b6   :  { %1847 = vmatpush1.bf16.msra.mxu0 %v5201_v26 }
 0x5b7   :  { %1848 = vmatprep.subr.bf16.mxu0 %v5209_v27  ;;  %v5237_v27 = vld [vmem:[#allocation11 + $0xe0] ss:$16 sps:$4 sm:$0xff]  }
 0x5b8   :  { %1832 = vmatpush2.bf16.msra.mxu1 %v5234_v43  ;;  %v5263_v43 = vld [vmem:[#allocation11 + $0x64] ss:$16 sps:$4 sm:$0xff]  }
 0x5ba   :  { %1849 = vmatpush1.bf16.msra.mxu0 %v5207_v28  ;;  %v5239_v28 = vld [vmem:[#allocation11 + $0xe4] ss:$16 sps:$4 sm:$0xff]  }
 0x5bb   :  { %1850 = vmatprep.subr.bf16.mxu0 %v5215_v29  ;;  %v5240_v29 = vld [vmem:[#allocation11 + $0x2e0] ss:$16 sps:$4 sm:$0xff]  }
 0x5be   :  { %1851 = vmatpush1.bf16.msra.mxu0 %v5213_v30  ;;  %v5242_v30 = vld [vmem:[#allocation11 + $0x2e4] ss:$16 sps:$4 sm:$0xff]  }
 0x5bf   :  { %1852 = vmatprep.subr.bf16.mxu0 %v5221_v33  ;;  %3572 = vmatprep.subr.bf16.mxu1 %v5242_v30  ;;  %v5243_v33 = vld [vmem:[#allocation11 + $0xc0] ss:$16 sps:$4 sm:$0xff]   ;;  %v5323_v30 = vld [vmem:[#allocation11 + $0x124] ss:$16 sps:$4 sm:$0xff]  }
 0x5c2   :  { %1853 = vmatpush1.bf16.msra.mxu0 %v5219_v34  ;;  %v5246_v34 = vld [vmem:[#allocation11 + $0x2c0] ss:$16 sps:$4 sm:$0xff]  }
 0x5c3   :  { %1854 = vmatprep.subr.bf16.mxu0 %v5227_v37  ;;  %v5249_v37 = vld [vmem:[#allocation11 + $0xa0] ss:$16 sps:$4 sm:$0xff]  }
 0x5c6   :  { %1855 = vmatpush1.bf16.msra.mxu0 %v5225_v7  ;;  %v5252_v7 = vld [vmem:[#allocation11 + $0x2a0] ss:$16 sps:$4 sm:$0xff]  }
 0x5c7   :  { %1856 = vmatprep.subr.bf16.mxu0 %v5233_v40  ;;  %v5255_v40 = vld [vmem:[#allocation11 + $0x80] ss:$16 sps:$4 sm:$0xff]  }
 0x5ca   :  { %1857 = vmatpush1.bf16.msra.mxu0 %v5231_v42  ;;  %v5258_v42 = vld [vmem:[#allocation11 + $0x280] ss:$16 sps:$4 sm:$0xff]  }
 0x5cb   :  { %3531 = vmatprep.subr.bf16.mxu0 %v5239_v28  ;;  %v5318_v28 = vld [vmem:[#allocation11 + $0x340] ss:$16 sps:$4 sm:$0xff]  }
 0x66d   :  { %v1467_v46 = vpop.f32.mrf.mxu0 }
 0x66e   :  { %v1468_v47 = vadd.f32 %v4492_v45, %v1467_v46  ;;  %v5264_v46 = vld [vmem:[#allocation11 + $0x260] ss:$16 sps:$4 sm:$0xff]  }
 0x66f   :  { %v4988_v48 = vpop.f32.mrf.mxu0 }
 0x670   :  { %v1474_v50 = vmax.f32 %v1468_v47, 0.0  ;;  %v5269_v47 = vld [vmem:[#allocation11 + $0x44] ss:$16 sps:$4 sm:$0xff]  }
 0x671   :  { %v1470_v49 = vpop.f32.mrf.mxu0  ;;  %v5272_v48 = vld [vmem:[#allocation11 + $0x244] ss:$16 sps:$4 sm:$0xff]  }
 0x672   :  { %v1471_v51 = vadd.f32 %v4492_v45, %v1470_v49  ;;  %v1477_v54 = vrot.slane %v1474_v50, 1  ;;  %v1479_v55 = vrot.slane %v1474_v50, 2  ;;  %v5261_v45 = vld [vmem:[#allocation11 + $0x60] ss:$16 sps:$4 sm:$0xff]  }
 0x673   :  { %v4989_v52 = vpop.f32.mrf.mxu0  ;;  %v5267_v49 = vld [vmem:[#allocation11 + $0x40] ss:$16 sps:$4 sm:$0xff]  }
 0x674   :  { %v1475_v53 = vmax.f32 %v1471_v51, 0.0  ;;  %v5275_v51 = vld [vmem:[#allocation11 + $0x24] ss:$16 sps:$4 sm:$0xff]  }
 0x675   :  { %v5278_v52 = vld [vmem:[#allocation11 + $0x224] ss:$16 sps:$4 sm:$0xff]  }
 0x676   :  { %v1482_v56 = vrot.slane %v1475_v53, 1  ;;  %v1484_v57 = vrot.slane %v1475_v53, 2  ;;  %v5273_v53 = vld [vmem:[#allocation11 + $0x20] ss:$16 sps:$4 sm:$0xff]  }
 0x678   :  { %v1483_v58 = vsel %vm182_vm0, %v1477_v54, %v1482_v56  ;;  %v1485_v59 = vsel %vm192_vm1, %v1479_v55, %v1484_v57  ;;  %v1487_v60 = vrot.slane %v1482_v56, 2  ;;  %v1489_v61 = vrot.slane %v1484_v57, 2  ;;  %v5284_v56 = vld [vmem:[#allocation11 + $0x204] ss:$16 sps:$4 sm:$0xff]   ;;  %v5279_v57 = vld [vmem:[#allocation11] ss:$16 sps:$4 sm:$0xff]  }
 0x679   :  { %v1486_v62 = vrot.slane %v1483_v58, 2  ;;  %v1495_v2 = vsel %vm1494_vm5, %v1474_v50, %v1485_v59  ;;  %v5270_v50 = vld [vmem:[#allocation11 + $0x240] ss:$16 sps:$4 sm:$0xff]   ;;  %v5287_v59 = vld [vmem:[#allocation11 + $0x1e4] ss:$16 sps:$4 sm:$0xff]  }
 0x67a   :  { %v1497_v63 = vsel %vm1494_vm5, %v1479_v55, %v1489_v61  ;;  %v1546_v5 = vpack.c.bf16 %v1495_v2, %v1495_v2  ;;  %v5281_v55 = vld [vmem:[#allocation11 + $0x4] ss:$16 sps:$4 sm:$0xff]   ;;  %v5282_v58 = vld [vmem:[#allocation11 + $0x200] ss:$16 sps:$4 sm:$0xff]  }
 0x67b   :  { %v1548_v0 = vpack.c.bf16 %v1497_v63, %v1497_v63  ;;  %v1488_v1 = vsel %vm192_vm1, %v1486_v62, %v1487_v60  ;;  %v5290_v60 = vld [vmem:[#allocation11 + $0x3e4] ss:$16 sps:$4 sm:$0xff]   ;;  %v5285_v61 = vld [vmem:[#allocation11 + $0x1e0] ss:$16 sps:$4 sm:$0xff]  }
 0x67c   :  { %v1496_v3 = vsel %vm1494_vm5, %v1477_v54, %v1488_v1  ;;  %v5276_v54 = vld [vmem:[#allocation11 + $0x220] ss:$16 sps:$4 sm:$0xff]  }
 0x67d   :  { %1875 = vmatmul.mubr.bf16.vlgmr.msra.gmra.mxu0 %v1548_v0  ;;  %v1547_v4 = vpack.c.bf16 %v1496_v3, %v1496_v3  ;;  %v5288_v62 = vld [vmem:[#allocation11 + $0x3e0] ss:$16 sps:$4 sm:$0xff]  }
 0x67e   :  { %3532 = vmatpush1.bf16.msra.mxu0 %v5237_v27  ;;  %v5320_v27 = vld [vmem:[#allocation11 + $0x344] ss:$16 sps:$4 sm:$0xff]  }
 0x67f   :  { %1833 = vmatprep.mubr.bf16.mxu1 %v1547_v4  ;;  %3533 = vmatprep.subr.bf16.mxu0 %v5245_v31  ;;  %v5326_v31 = vld [vmem:[#allocation11 + $0x324] ss:$16 sps:$4 sm:$0xff]  }
 0x680   :  { %1834 = vmatmul.mubr.bf16.vlgmr.msra.gmra.mxu1 %v1546_v5 }
 0x681   :  { %3573 = vmatpush1.bf16.msra.mxu1 %v5240_v29  ;;  %v5321_v29 = vld [vmem:[#allocation11 + $0x120] ss:$16 sps:$4 sm:$0xff]  }
 0x682   :  { %3574 = vmatprep.subr.bf16.mxu1 %v5248_v32  ;;  %3534 = vmatpush1.bf16.msra.mxu0 %v5243_v33  ;;  %v5324_v32 = vld [vmem:[#allocation11 + $0x320] ss:$16 sps:$4 sm:$0xff]   ;;  %v5329_v33 = vld [vmem:[#allocation11 + $0x104] ss:$16 sps:$4 sm:$0xff]  }
 0x683   :  { %3535 = vmatprep.subr.bf16.mxu0 %v5251_v41  ;;  %v5327_v41 = vld [vmem:[#allocation11 + $0x100] ss:$16 sps:$4 sm:$0xff]  }
 0x685   :  { %3575 = vmatpush1.bf16.msra.mxu1 %v5246_v34  ;;  %v5332_v34 = vld [vmem:[#allocation11 + $0x304] ss:$16 sps:$4 sm:$0xff]  }
 0x686   :  { %3576 = vmatprep.subr.bf16.mxu1 %v5254_v36  ;;  %3536 = vmatpush1.bf16.msra.mxu0 %v5249_v37  ;;  %v5330_v36 = vld [vmem:[#allocation11 + $0x300] ss:$16 sps:$4 sm:$0xff]   ;;  %v5335_v37 = vld [vmem:[#allocation11 + $0x4e4] ss:$16 sps:$4 sm:$0xff]  }
 0x687   :  { %3537 = vmatprep.subr.bf16.mxu0 %v5257_v38 }
 0x689   :  { %3577 = vmatpush1.bf16.msra.mxu1 %v5252_v7  ;;  %v5338_v7 = vld [vmem:[#allocation11 + $0x6e4] ss:$16 sps:$4 sm:$0xff]  }
 0x68a   :  { %3578 = vmatprep.subr.bf16.mxu1 %v5260_v39  ;;  %3538 = vmatpush1.bf16.msra.mxu0 %v5255_v40 }
 0x68b   :  { %3539 = vmatprep.subr.bf16.mxu0 %v5263_v43  ;;  %v1916_v43 = vld [vmem:[%s6536_s15] sm:$0x3] }
 0x68d   :  { %3579 = vmatpush1.bf16.msra.mxu1 %v5258_v42  ;;  %v1902_v42 = vld [vmem:[%s6537_s16] sm:$0x3] }
 0x68e   :  { %3580 = vmatprep.subr.bf16.mxu1 %v5266_v44  ;;  %3540 = vmatpush1.bf16.msra.mxu0 %v5261_v45  ;;  %v1907_v44 = vrot.slane %v1902_v42, %v6145_v35  ;;  %v1911_v45 = vrot.slane %v1902_v42, %v6138_v12  ;;  %v5377_v42 = vld [vmem:[#allocation11 + $0x404] ss:$16 sps:$4 sm:$0xff]  }
 0x68f   :  { %3541 = vmatprep.subr.bf16.mxu0 %v5269_v47 }
 0x691   :  { %3581 = vmatpush1.bf16.msra.mxu1 %v5264_v46 }
 0x692   :  { %3582 = vmatprep.subr.bf16.mxu1 %v5272_v48  ;;  %3542 = vmatpush1.bf16.msra.mxu0 %v5267_v49  ;;  %v1921_v49 = vrot.slane %v1916_v43, %v6145_v35 }
 0x693   :  { %3543 = vmatprep.subr.bf16.mxu0 %v5275_v51 }
 0x695   :  { %3583 = vmatpush1.bf16.msra.mxu1 %v5270_v50  ;;  %v1925_v50 = vrot.slane %v1916_v43, %v6138_v12  ;;  %v5372_v43 = vld [vmem:[#allocation11 + $0x620] ss:$16 sps:$4 sm:$0xff]  }
 0x696   :  { %3584 = vmatprep.subr.bf16.mxu1 %v5278_v52  ;;  %3544 = vmatpush1.bf16.msra.mxu0 %v5273_v53 }
 0x697   :  { %3545 = vmatprep.subr.bf16.mxu0 %v5281_v55 }
 0x699   :  { %3585 = vmatpush1.bf16.msra.mxu1 %v5276_v54 }
 0x69a   :  { %3586 = vmatprep.subr.bf16.mxu1 %v5284_v56  ;;  %3546 = vmatpush1.bf16.msra.mxu0 %v5279_v57 }
 0x69b   :  { %3547 = vmatprep.subr.bf16.mxu0 %v5287_v59 }
 0x69d   :  { %3587 = vmatpush1.bf16.msra.mxu1 %v5282_v58 }
 0x69e   :  { %3588 = vmatprep.subr.bf16.mxu1 %v5290_v60  ;;  %3548 = vmatpush2.bf16.msra.mxu0 %v5285_v61 }
 0x69f   :  { %3549 = vmatprep.subr.bf16.mxu0 %v5293_v6 }
 0x6a1   :  { %3589 = vmatpush2.bf16.msra.mxu1 %v5288_v62 }
 0x73d   :  { %v1876_v8 = vpop.f32.mrf.mxu0 }
 0x73f   :  { %v1878_v13 = vpop.f32.mrf.mxu0 }
 0x740   :  { %v1835_v10 = vpop.f32.mrf.mxu1 }
 0x741   :  { %v1836_v15 = vadd.f32 %v1835_v10, %v1554_v9  ;;  %v1880_v17 = vpop.f32.mrf.mxu0  ;;  %v5296_v9 = vld [vmem:[#allocation11 + $0x3c4] ss:$16 sps:$4 sm:$0xff]   ;;  %v5297_v10 = vld [vmem:[#allocation11 + $0x1a0] ss:$16 sps:$4 sm:$0xff]  }
 0x742   :  { %v1837_v18 = vpop.f32.mrf.mxu1  ;;  %3590 = vmatprep.subr.bf16.mxu1 %v5296_v9  ;;  %v5300_v17 = vld [vmem:[#allocation11 + $0x3a0] ss:$16 sps:$4 sm:$0xff]  }
 0x743   :  { %v6357_v19 = vadd.f32 %v1876_v8, %v1836_v15  ;;  %v1838_v16 = vadd.f32 %v1837_v18, %v1558_v14  ;;  %v1881_v20 = vpop.f32.mrf.mxu0  ;;  %v5291_v8 = vld [vmem:[#allocation11 + $0x1c0] ss:$16 sps:$4 sm:$0xff]   ;;  %v5299_v14 = vld [vmem:[#allocation11 + $0x1a4] ss:$16 sps:$4 sm:$0xff]  }
 0x744   :  { %v1839_v21 = vpop.f32.mrf.mxu1  ;;  %3550 = vmatpush2.bf16.msra.mxu0 %v5291_v8  ;;  %v5302_v15 = vld [vmem:[#allocation11 + $0x3a4] ss:$16 sps:$4 sm:$0xff]   ;;  %v5306_v20 = vld [vmem:[#allocation11 + $0x380] ss:$16 sps:$4 sm:$0xff]  }
 0x745   :  { %v6359_v22 = vadd.f32 %v1878_v13, %v1838_v16  ;;  %v1883_v24 = vmax.f32 %v6357_v19, 0.0  ;;  %v5294_v13 = vld [vmem:[#allocation11 + $0x3c0] ss:$16 sps:$4 sm:$0xff]   ;;  %3551 = vmatprep.subr.bf16.mxu0 %v5299_v14  ;;  %v5305_v18 = vld [vmem:[#allocation11 + $0x184] ss:$16 sps:$4 sm:$0xff]  }
 0x746   :  { %v1840_v23 = vpop.f32.mrf.mxu1  ;;  %3591 = vmatpush2.bf16.msra.mxu1 %v5294_v13  ;;  %v5303_v19 = vld [vmem:[#allocation11 + $0x180] ss:$16 sps:$4 sm:$0xff]   ;;  %v5308_v16 = vld [vmem:[#allocation11 + $0x384] ss:$16 sps:$4 sm:$0xff]  }
 0x747   :  { %v1884_v25 = vmax.f32 %v6359_v22, 0.0  ;;  %3592 = vmatprep.subr.bf16.mxu1 %v5302_v15  ;;  %v5311_v21 = vld [vmem:[#allocation11 + $0x164] ss:$16 sps:$4 sm:$0xff]   ;;  %v5309_v22 = vld [vmem:[#allocation11 + $0x160] ss:$16 sps:$4 sm:$0xff]  }
 0x748   :  { %3552 = vmatpush2.bf16.msra.mxu0 %v5297_v10  ;;  %v5314_v23 = vld [vmem:[#allocation11 + $0x364] ss:$16 sps:$4 sm:$0xff]   ;;  %v5336_v14 = vld [vmem:[#allocation11 + $0x6e0] ss:$16 sps:$4 sm:$0xff]  }
 0x749   :  { %v1885_v26 = vadd.f32 %v1884_v25, %v1883_v24  ;;  %3553 = vmatprep.subr.bf16.mxu0 %v5305_v18  ;;  %v5341_v15 = vld [vmem:[#allocation11 + $0x4c4] ss:$16 sps:$4 sm:$0xff]  }
 0x74a   :  { %3593 = vmatpush2.bf16.msra.mxu1 %v5300_v17 }
 0x74b   :  { %1886 = vadd.xlane.f32.xlu1 %v1885_v26  ;;  %3594 = vmatprep.subr.bf16.mxu1 %v5308_v16  ;;  %v5315_v26 = vld [vmem:[#allocation11 + $0x140] ss:$16 sps:$4 sm:$0xff]  }
 0x74c   :  { %3554 = vmatpush2.bf16.msra.mxu0 %v5303_v19  ;;  %v5344_v19 = vld [vmem:[#allocation11 + $0x6c4] ss:$16 sps:$4 sm:$0xff]  }
 0x74d   :  { %3555 = vmatprep.subr.bf16.mxu0 %v5311_v21 }
 0x74e   :  { %3595 = vmatpush2.bf16.msra.mxu1 %v5306_v20  ;;  %v5339_v20 = vld [vmem:[#allocation11 + $0x4c0] ss:$16 sps:$4 sm:$0xff]  }
 0x74f   :  { %3596 = vmatprep.subr.bf16.mxu1 %v5314_v23  ;;  %v5342_v23 = vld [vmem:[#allocation11 + $0x6c0] ss:$16 sps:$4 sm:$0xff]  }
 0x750   :  { %3556 = vmatpush2.bf16.msra.mxu0 %v5309_v22  ;;  %v5347_v22 = vld [vmem:[#allocation11 + $0x4a4] ss:$16 sps:$4 sm:$0xff]  }
 0x7d4   :  { %v1887_v63 = vpop.xlane.xlu1 %1886 }
 0x7d5   :  { %v1889_v0 = vmul.f32 0.00390625, %v1887_v63 }
 0x7d7   :  { %v6369_v1 = vsub.f32 %v1883_v24, %v1889_v0  ;;  %v6373_v2 = vsub.f32 %v1884_v25, %v1889_v0  ;;  %v5312_v24 = vld [vmem:[#allocation11 + $0x360] ss:$16 sps:$4 sm:$0xff]   ;;  %v5317_v25 = vld [vmem:[#allocation11 + $0x144] ss:$16 sps:$4 sm:$0xff]  }
 0x7d8   :  { %3597 = vmatpush2.bf16.msra.mxu1 %v5312_v24  ;;  %3557 = vmatprep.subr.bf16.mxu0 %v5317_v25  ;;  %v5350_v24 = vld [vmem:[#allocation11 + $0x6a4] ss:$16 sps:$4 sm:$0xff]   ;;  %v5345_v25 = vld [vmem:[#allocation11 + $0x4a0] ss:$16 sps:$4 sm:$0xff]  }
 0x7d9   :  { %v1892_v3 = vmul.f32 %v6369_v1, %v6369_v1  ;;  %v1893_v4 = vmul.f32 %v6373_v2, %v6373_v2  ;;  %3558 = vmatpush2.bf16.msra.mxu0 %v5315_v26  ;;  %3598 = vmatprep.subr.bf16.mxu1 %v5320_v27  ;;  %v5353_v26 = vld [vmem:[#allocation11 + $0x484] ss:$16 sps:$4 sm:$0xff]   ;;  %v5348_v27 = vld [vmem:[#allocation11 + $0x6a0] ss:$16 sps:$4 sm:$0xff]  }
 0x7da   :  { %3559 = vmatprep.subr.bf16.mxu0 %v5323_v30  ;;  %v5359_v30 = vld [vmem:[#allocation11 + $0x464] ss:$16 sps:$4 sm:$0xff]  }
 0x7db   :  { %v1894_v5 = vadd.f32 %v1893_v4, %v1892_v3 }
 0x7dc   :  { %3599 = vmatpush2.bf16.msra.mxu1 %v5318_v28  ;;  %v5356_v28 = vld [vmem:[#allocation11 + $0x684] ss:$16 sps:$4 sm:$0xff]  }
 0x7dd   :  { %1895 = vadd.xlane.f32.xlu1 %v1894_v5  ;;  %3600 = vmatprep.subr.bf16.mxu1 %v5326_v31  ;;  %v5354_v31 = vld [vmem:[#allocation11 + $0x680] ss:$16 sps:$4 sm:$0xff]  }
 0x7de   :  { %3560 = vmatpush2.bf16.msra.mxu0 %v5321_v29  ;;  %v5351_v29 = vld [vmem:[#allocation11 + $0x480] ss:$16 sps:$4 sm:$0xff]  }
 0x7df   :  { %3561 = vmatprep.subr.bf16.mxu0 %v5329_v33  ;;  %v5357_v33 = vld [vmem:[#allocation11 + $0x460] ss:$16 sps:$4 sm:$0xff]  }
 0x7e0   :  { %3601 = vmatpush2.bf16.msra.mxu1 %v5324_v32  ;;  %v5362_v32 = vld [vmem:[#allocation11 + $0x664] ss:$16 sps:$4 sm:$0xff]  }
 0x7e1   :  { %3602 = vmatprep.subr.bf16.mxu1 %v5332_v34  ;;  %v5365_v34 = vld [vmem:[#allocation11 + $0x444] ss:$16 sps:$4 sm:$0xff]  }
 0x7e2   :  { %3562 = vmatpush2.bf16.msra.mxu0 %v5327_v41  ;;  %v5360_v41 = vld [vmem:[#allocation11 + $0x660] ss:$16 sps:$4 sm:$0xff]  }
 0x7e3   :  { %3613 = vmatprep.subr.bf16.mxu0 %v5335_v37  ;;  %v5363_v37 = vld [vmem:[#allocation11 + $0x440] ss:$16 sps:$4 sm:$0xff]  }
 0x7e4   :  { %3603 = vmatpush2.bf16.msra.mxu1 %v5330_v36  ;;  %v5368_v36 = vld [vmem:[#allocation11 + $0x644] ss:$16 sps:$4 sm:$0xff]  }
 0x7e5   :  { %3654 = vmatprep.subr.bf16.mxu1 %v5338_v7  ;;  %v5371_v7 = vld [vmem:[#allocation11 + $0x424] ss:$16 sps:$4 sm:$0xff]  }
 0x866   :  { %v1896_v38 = vpop.xlane.xlu1 %1895 }
 0x867   :  { %v1897_v39 = vmul.f32 0.00390625, %v1896_v38  ;;  %v5366_v38 = vld [vmem:[#allocation11 + $0x640] ss:$16 sps:$4 sm:$0xff]  }
 0x869   :  { %v1898_v40 = vadd.f32 1e-05, %v1897_v39  ;;  %v5374_v39 = vld [vmem:[#allocation11 + $0x624] ss:$16 sps:$4 sm:$0xff]  }
 0x86b   :  { %5709 = vrsqrt.f32 %v1898_v40  ;;  %v5369_v40 = vld [vmem:[#allocation11 + $0x420] ss:$16 sps:$4 sm:$0xff]  }
 0x878   :  { %v5710_v46 = vpop.eup %5709 }
 0x879   :  { %v1900_v47 = vmul.f32 %v5710_v46, %v6369_v1  ;;  %v1901_v48 = vmul.f32 %v5710_v46, %v6373_v2  ;;  %v5333_v1 = vld [vmem:[#allocation11 + $0x4e0] ss:$16 sps:$4 sm:$0xff]   ;;  %v5383_v46 = vld [vmem:[#allocation11 + $0x5e4] ss:$16 sps:$4 sm:$0xff]  }
 0x87b   :  { %v1915_v51 = vmul.f32 %v1911_v45, %v1901_v48  ;;  %v1914_v52 = vmul.f32 %v1907_v44, %v1900_v47  ;;  %v5380_v44 = vld [vmem:[#allocation11 + $0x604] ss:$16 sps:$4 sm:$0xff]   ;;  %v5375_v45 = vld [vmem:[#allocation11 + $0x400] ss:$16 sps:$4 sm:$0xff]  }
 0x87c   :  { %v5378_v47 = vld [vmem:[#allocation11 + $0x600] ss:$16 sps:$4 sm:$0xff]   ;;  %v5386_v48 = vld [vmem:[#allocation11 + $0x7e4] ss:$16 sps:$4 sm:$0xff]  }
 0x87d   :  { %v1929_v53 = vadd.f32 %v1925_v50, %v1915_v51  ;;  %v6391_v54 = vadd.f32 %v1921_v49, %v1914_v52  ;;  %v5381_v49 = vld [vmem:[#allocation11 + $0x5e0] ss:$16 sps:$4 sm:$0xff]   ;;  %v5389_v50 = vld [vmem:[#allocation11 + $0x5c4] ss:$16 sps:$4 sm:$0xff]  }
 0x87e   :  { %v5384_v51 = vld [vmem:[#allocation11 + $0x7e0] ss:$16 sps:$4 sm:$0xff]   ;;  %v5392_v52 = vld [vmem:[#allocation11 + $0x7c4] ss:$16 sps:$4 sm:$0xff]  }
 0x87f   :  { %v1941_v55 = vrot.slane %v1929_v53, 3  ;;  %v1940_v56 = vrot.slane %v6391_v54, 3  ;;  %v1933_v57 = vrot.slane %v1929_v53, 1  ;;  %v1937_v58 = vrot.slane %v1929_v53, 2 }
 0x880   :  { %v1932_v59 = vrot.slane %v6391_v54, 1 }
 0x881   :  { %v1958_v60 = vsel %vm1956_vm6, %v1929_v53, %v1941_v55  ;;  %v1957_v61 = vsel %vm1956_vm6, %v6391_v54, %v1940_v56  ;;  %v1945_v62 = vrot.slane %v1933_v57, 3  ;;  %v1947_v63 = vrot.slane %v1937_v58, 3  ;;  %v5387_v53 = vld [vmem:[#allocation11 + $0x5c0] ss:$16 sps:$4 sm:$0xff]  }
 0x882   :  { %v6398_v0 = vpack.c.bf16 %v1958_v60, %v1958_v60  ;;  %v6400_v2 = vpack.c.bf16 %v1957_v61, %v1957_v61  ;;  %v1944_v3 = vrot.slane %v1932_v59, 3  ;;  %v1949_v4 = vrot.slane %v1941_v55, 3  ;;  %v5396_v60 = vld [vmem:[#allocation11 + $0x7a0] ss:$16 sps:$4 sm:$0xff]   ;;  %v5404_v61 = vld [vmem:[#allocation11 + $0x784] ss:$16 sps:$4 sm:$0xff]  }
 0x883   :  { %v1960_v5 = vsel %vm1956_vm6, %v1933_v57, %v1945_v62  ;;  %v1962_v6 = vsel %vm1956_vm6, %v1937_v58, %v1947_v63  ;;  %v1948_v8 = vrot.slane %v1940_v56, 3  ;;  %v5398_v57 = vld [vmem:[#allocation11 + $0x7a4] ss:$16 sps:$4 sm:$0xff]   ;;  %v5393_v58 = vld [vmem:[#allocation11 + $0x5a0] ss:$16 sps:$4 sm:$0xff]  }
 0x884   :  { %3563 = vmatprep.mubr.bf16.mxu0 %v6398_v0  ;;  %v6405_v9 = vpack.c.bf16 %v1960_v5, %v1960_v5  ;;  %v6407_v13 = vpack.c.bf16 %v1962_v6, %v1962_v6  ;;  %v1959_v10 = vsel %vm1956_vm6, %v1932_v59, %v1944_v3  ;;  %v1964_v17 = vsel %vm1956_vm6, %v1941_v55, %v1949_v4  ;;  %v5395_v55 = vld [vmem:[#allocation11 + $0x5a4] ss:$16 sps:$4 sm:$0xff]   ;;  %v5399_v62 = vld [vmem:[#allocation11 + $0x580] ss:$16 sps:$4 sm:$0xff]  }
 0x885   :  { %3564 = vmatmul.mubr.bf16.vlgmr.msra.gmra.mxu0 %v6400_v2  ;;  %v6412_v18 = vpack.c.bf16 %v1959_v10, %v1959_v10  ;;  %v6415_v16 = vsel %vm1956_vm6, %v1940_v56, %v1948_v8  ;;  %v6420_v21 = vpack.c.bf16 %v1964_v17, %v1964_v17  ;;  %v5390_v56 = vld [vmem:[#allocation11 + $0x7c0] ss:$16 sps:$4 sm:$0xff]   ;;  %v5401_v59 = vld [vmem:[#allocation11 + $0x584] ss:$16 sps:$4 sm:$0xff]   ;;  %v1936_v17 = vrot.slane %v6391_v54, 2 }
 0x886   :  { %3614 = vmatpush1.bf16.msra.mxu0 %v5333_v1  ;;  %3604 = vmatprep.mubr.bf16.mxu1 %v6405_v9  ;;  %v5407_v63 = vld [vmem:[#allocation11 + $0x564] ss:$16 sps:$4 sm:$0xff]   ;;  %v5402_v1 = vld [vmem:[#allocation11 + $0x780] ss:$16 sps:$4 sm:$0xff]   ;;  %v5434_v54 = vld [vmem:[#allocation11 + $0x2ec] ss:$16 sps:$4 sm:$0xff]  }
 0x887   :  { %3645 = vmatprep.mubr.bf16.mxu0 %v6407_v13  ;;  %3605 = vmatmul.mubr.bf16.vlgmr.msra.gmra.mxu1 %v6412_v18  ;;  %v5410_v3 = vld [vmem:[#allocation11 + $0x764] ss:$16 sps:$4 sm:$0xff]   ;;  %v5405_v4 = vld [vmem:[#allocation11 + $0x560] ss:$16 sps:$4 sm:$0xff]  }
 0x888   :  { %3655 = vmatpush1.bf16.msra.mxu1 %v5336_v14  ;;  %3615 = vmatprep.subr.bf16.mxu0 %v5341_v15  ;;  %v5413_v5 = vld [vmem:[#allocation11 + $0x544] ss:$16 sps:$4 sm:$0xff]   ;;  %v5408_v6 = vld [vmem:[#allocation11 + $0x760] ss:$16 sps:$4 sm:$0xff]  }
 0x889   :  { %3686 = vmatprep.mubr.bf16.mxu1 %v6420_v21  ;;  %3656 = vmatprep.subr.bf16.mxu1 %v5344_v19  ;;  %v5416_v8 = vld [vmem:[#allocation11 + $0x744] ss:$16 sps:$4 sm:$0xff]   ;;  %v5411_v14 = vld [vmem:[#allocation11 + $0x540] ss:$16 sps:$4 sm:$0xff]  }
 0x88a   :  { %3616 = vmatpush1.bf16.msra.mxu0 %v5339_v20  ;;  %v5419_v10 = vld [vmem:[#allocation11 + $0x524] ss:$16 sps:$4 sm:$0xff]   ;;  %v5414_v15 = vld [vmem:[#allocation11 + $0x740] ss:$16 sps:$4 sm:$0xff]  }
 0x88b   :  { %3617 = vmatprep.subr.bf16.mxu0 %v5347_v22  ;;  %v5422_v19 = vld [vmem:[#allocation11 + $0x724] ss:$16 sps:$4 sm:$0xff]   ;;  %v5417_v20 = vld [vmem:[#allocation11 + $0x520] ss:$16 sps:$4 sm:$0xff]  }
 0x88c   :  { %3657 = vmatpush1.bf16.msra.mxu1 %v5342_v23  ;;  %v5425_v22 = vld [vmem:[#allocation11 + $0x504] ss:$16 sps:$4 sm:$0xff]   ;;  %v5420_v23 = vld [vmem:[#allocation11 + $0x720] ss:$16 sps:$4 sm:$0xff]  }
 0x88d   :  { %3658 = vmatprep.subr.bf16.mxu1 %v5350_v24  ;;  %v1946_v24 = vrot.slane %v1936_v17, 3 }
 0x88e   :  { %3618 = vmatpush1.bf16.msra.mxu0 %v5345_v25  ;;  %v5428_v25 = vld [vmem:[#allocation11 + $0x704] ss:$16 sps:$4 sm:$0xff]  }
 0x88f   :  { %3619 = vmatprep.subr.bf16.mxu0 %v5353_v26  ;;  %v5423_v26 = vld [vmem:[#allocation11 + $0x500] ss:$16 sps:$4 sm:$0xff]  }
 0x890   :  { %3659 = vmatpush1.bf16.msra.mxu1 %v5348_v27  ;;  %v5431_v27 = vld [vmem:[#allocation11 + $0xec] ss:$16 sps:$4 sm:$0xff]  }
 0x891   :  { %3660 = vmatprep.subr.bf16.mxu1 %v5356_v28  ;;  %v5426_v28 = vld [vmem:[#allocation11 + $0x700] ss:$16 sps:$4 sm:$0xff]  }
 0x892   :  { %3620 = vmatpush1.bf16.msra.mxu0 %v5351_v29  ;;  %v1961_v29 = vsel %vm1956_vm6, %v1936_v17, %v1946_v24  ;;  %v5500_v17 = vld [vmem:[#allocation11 + $0x38c] ss:$16 sps:$4 sm:$0xff]   ;;  %v5501_v24 = vld [vmem:[#allocation11 + $0x168] ss:$16 sps:$4 sm:$0xff]  }
 0x893   :  { %3621 = vmatprep.subr.bf16.mxu0 %v5359_v30  ;;  %v5429_v30 = vld [vmem:[#allocation11 + $0xe8] ss:$16 sps:$4 sm:$0xff]  }
 0x894   :  { %3661 = vmatpush1.bf16.msra.mxu1 %v5354_v31  ;;  %v6425_v31 = vpack.c.bf16 %v1961_v29, %v1961_v29  ;;  %v5515_v29 = vld [vmem:[#allocation11 + $0x12c] ss:$16 sps:$4 sm:$0xff]  }
 0x895   :  { %3662 = vmatprep.subr.bf16.mxu1 %v5362_v32  ;;  %v5437_v32 = vld [vmem:[#allocation11 + $0xcc] ss:$16 sps:$4 sm:$0xff]  }
 0x896   :  { %3622 = vmatpush1.bf16.msra.mxu0 %v5357_v33  ;;  %v5432_v33 = vld [vmem:[#allocation11 + $0x2e8] ss:$16 sps:$4 sm:$0xff]  }
 0x897   :  { %3623 = vmatprep.subr.bf16.mxu0 %v5365_v34  ;;  %v6430_v34 = vpack.c.bf16 %v6415_v16, %v6415_v16  ;;  %v5449_v16 = vld [vmem:[#allocation11 + $0x8c] ss:$16 sps:$4 sm:$0xff]  }
 0x898   :  { %3663 = vmatpush1.bf16.msra.mxu1 %v5360_v41  ;;  %v5440_v41 = vld [vmem:[#allocation11 + $0x2cc] ss:$16 sps:$4 sm:$0xff]  }
 0x899   :  { %3664 = vmatprep.subr.bf16.mxu1 %v5368_v36  ;;  %v5435_v36 = vld [vmem:[#allocation11 + $0xc8] ss:$16 sps:$4 sm:$0xff]  }
 0x89a   :  { %3624 = vmatpush1.bf16.msra.mxu0 %v5363_v37  ;;  %v5443_v37 = vld [vmem:[#allocation11 + $0xac] ss:$16 sps:$4 sm:$0xff]  }
 0x89b   :  { %3625 = vmatprep.subr.bf16.mxu0 %v5371_v7  ;;  %v5438_v7 = vld [vmem:[#allocation11 + $0x2c8] ss:$16 sps:$4 sm:$0xff]  }
 0x89c   :  { %3665 = vmatpush1.bf16.msra.mxu1 %v5366_v38  ;;  %v5446_v38 = vld [vmem:[#allocation11 + $0x2ac] ss:$16 sps:$4 sm:$0xff]  }
 0x89d   :  { %3666 = vmatprep.subr.bf16.mxu1 %v5374_v39  ;;  %v5441_v39 = vld [vmem:[#allocation11 + $0xa8] ss:$16 sps:$4 sm:$0xff]  }
 0x89e   :  { %3626 = vmatpush1.bf16.msra.mxu0 %v5369_v40  ;;  %v5444_v40 = vld [vmem:[#allocation11 + $0x2a8] ss:$16 sps:$4 sm:$0xff]  }
 0x89f   :  { %3627 = vmatprep.subr.bf16.mxu0 %v5377_v42  ;;  %v5452_v42 = vld [vmem:[#allocation11 + $0x28c] ss:$16 sps:$4 sm:$0xff]  }
 0x8a0   :  { %3667 = vmatpush1.bf16.msra.mxu1 %v5372_v43  ;;  %v5455_v43 = vld [vmem:[#allocation11 + $0x6c] ss:$16 sps:$4 sm:$0xff]  }
 0x8a1   :  { %3668 = vmatprep.subr.bf16.mxu1 %v5380_v44  ;;  %v5450_v44 = vld [vmem:[#allocation11 + $0x288] ss:$16 sps:$4 sm:$0xff]  }
 0x8a2   :  { %3628 = vmatpush1.bf16.msra.mxu0 %v5375_v45  ;;  %v5458_v45 = vld [vmem:[#allocation11 + $0x26c] ss:$16 sps:$4 sm:$0xff]  }
 0x8a3   :  { %3629 = vmatprep.subr.bf16.mxu0 %v5383_v46  ;;  %v5461_v46 = vld [vmem:[#allocation11 + $0x4c] ss:$16 sps:$4 sm:$0xff]  }
 0x8a4   :  { %3669 = vmatpush1.bf16.msra.mxu1 %v5378_v47  ;;  %v5456_v47 = vld [vmem:[#allocation11 + $0x268] ss:$16 sps:$4 sm:$0xff]  }
 0x8a5   :  { %3670 = vmatprep.subr.bf16.mxu1 %v5386_v48  ;;  %v5464_v48 = vld [vmem:[#allocation11 + $0x24c] ss:$16 sps:$4 sm:$0xff]  }
 0x8a6   :  { %3630 = vmatpush2.bf16.msra.mxu0 %v5381_v49  ;;  %v5459_v49 = vld [vmem:[#allocation11 + $0x48] ss:$16 sps:$4 sm:$0xff]  }
 0x8a7   :  { %3631 = vmatprep.subr.bf16.mxu0 %v5389_v50  ;;  %v5467_v50 = vld [vmem:[#allocation11 + $0x2c] ss:$16 sps:$4 sm:$0xff]  }
 0x8a8   :  { %3671 = vmatpush2.bf16.msra.mxu1 %v5384_v51  ;;  %v5462_v51 = vld [vmem:[#allocation11 + $0x248] ss:$16 sps:$4 sm:$0xff]  }
 0x8a9   :  { %3672 = vmatprep.subr.bf16.mxu1 %v5392_v52  ;;  %v5470_v52 = vld [vmem:[#allocation11 + $0x22c] ss:$16 sps:$4 sm:$0xff]  }
 0x8aa   :  { %3632 = vmatpush2.bf16.msra.mxu0 %v5387_v53  ;;  %v5465_v53 = vld [vmem:[#allocation11 + $0x28] ss:$16 sps:$4 sm:$0xff]  }
 0x8ab   :  { %3633 = vmatprep.subr.bf16.mxu0 %v5395_v55  ;;  %v5473_v55 = vld [vmem:[#allocation11 + $0xc] ss:$16 sps:$4 sm:$0xff]  }
 0x8ac   :  { %3673 = vmatpush2.bf16.msra.mxu1 %v5390_v56  ;;  %v5468_v56 = vld [vmem:[#allocation11 + $0x228] ss:$16 sps:$4 sm:$0xff]  }
 0x8ad   :  { %3674 = vmatprep.subr.bf16.mxu1 %v5398_v57  ;;  %v5476_v57 = vld [vmem:[#allocation11 + $0x20c] ss:$16 sps:$4 sm:$0xff]  }
 0x8ae   :  { %3634 = vmatpush2.bf16.msra.mxu0 %v5393_v58  ;;  %v5471_v58 = vld [vmem:[#allocation11 + $0x8] ss:$16 sps:$4 sm:$0xff]  }
 0x8af   :  { %3635 = vmatprep.subr.bf16.mxu0 %v5401_v59  ;;  %v5479_v59 = vld [vmem:[#allocation11 + $0x1ec] ss:$16 sps:$4 sm:$0xff]  }
 0x8b0   :  { %3675 = vmatpush2.bf16.msra.mxu1 %v5396_v60  ;;  %v5474_v60 = vld [vmem:[#allocation11 + $0x208] ss:$16 sps:$4 sm:$0xff]  }
 0x8b1   :  { %3676 = vmatprep.subr.bf16.mxu1 %v5404_v61  ;;  %v5482_v61 = vld [vmem:[#allocation11 + $0x3ec] ss:$16 sps:$4 sm:$0xff]  }
 0x8b2   :  { %3636 = vmatpush2.bf16.msra.mxu0 %v5399_v62  ;;  %v5477_v62 = vld [vmem:[#allocation11 + $0x1e8] ss:$16 sps:$4 sm:$0xff]  }
 0x8b3   :  { %3637 = vmatprep.subr.bf16.mxu0 %v5407_v63  ;;  %v5485_v63 = vld [vmem:[#allocation11 + $0x1cc] ss:$16 sps:$4 sm:$0xff]  }
 0x8b4   :  { %3677 = vmatpush2.bf16.msra.mxu1 %v5402_v1  ;;  %v5480_v1 = vld [vmem:[#allocation11 + $0x3e8] ss:$16 sps:$4 sm:$0xff]  }
 0x8b5   :  { %3678 = vmatprep.subr.bf16.mxu1 %v5410_v3  ;;  %v5488_v3 = vld [vmem:[#allocation11 + $0x3cc] ss:$16 sps:$4 sm:$0xff]  }
 0x8b6   :  { %3638 = vmatpush2.bf16.msra.mxu0 %v5405_v4  ;;  %v5483_v4 = vld [vmem:[#allocation11 + $0x1c8] ss:$16 sps:$4 sm:$0xff]  }
 0x8b7   :  { %3639 = vmatprep.subr.bf16.mxu0 %v5413_v5  ;;  %v5491_v5 = vld [vmem:[#allocation11 + $0x1ac] ss:$16 sps:$4 sm:$0xff]  }
 0x8b8   :  { %3679 = vmatpush2.bf16.msra.mxu1 %v5408_v6  ;;  %v5486_v6 = vld [vmem:[#allocation11 + $0x3c8] ss:$16 sps:$4 sm:$0xff]  }
 0x8b9   :  { %3680 = vmatprep.subr.bf16.mxu1 %v5416_v8  ;;  %v5494_v8 = vld [vmem:[#allocation11 + $0x3ac] ss:$16 sps:$4 sm:$0xff]  }
 0x8ba   :  { %3640 = vmatpush2.bf16.msra.mxu0 %v5411_v14  ;;  %v5489_v14 = vld [vmem:[#allocation11 + $0x1a8] ss:$16 sps:$4 sm:$0xff]  }
 0x8bb   :  { %3641 = vmatprep.subr.bf16.mxu0 %v5419_v10  ;;  %v5497_v10 = vld [vmem:[#allocation11 + $0x18c] ss:$16 sps:$4 sm:$0xff]  }
 0x8bc   :  { %3681 = vmatpush2.bf16.msra.mxu1 %v5414_v15  ;;  %v5492_v15 = vld [vmem:[#allocation11 + $0x3a8] ss:$16 sps:$4 sm:$0xff]  }
 0x8bd   :  { %3682 = vmatprep.subr.bf16.mxu1 %v5422_v19  ;;  %v5495_v19 = vld [vmem:[#allocation11 + $0x188] ss:$16 sps:$4 sm:$0xff]  }
 0x8be   :  { %3642 = vmatpush2.bf16.msra.mxu0 %v5417_v20  ;;  %v5503_v20 = vld [vmem:[#allocation11 + $0x16c] ss:$16 sps:$4 sm:$0xff]  }
 0x8bf   :  { %3643 = vmatprep.subr.bf16.mxu0 %v5425_v22  ;;  %v5498_v22 = vld [vmem:[#allocation11 + $0x388] ss:$16 sps:$4 sm:$0xff]  }
 0x8c0   :  { %3683 = vmatpush2.bf16.msra.mxu1 %v5420_v23  ;;  %v5506_v23 = vld [vmem:[#allocation11 + $0x36c] ss:$16 sps:$4 sm:$0xff]  }
 0x8c1   :  { %3684 = vmatprep.subr.bf16.mxu1 %v5428_v25  ;;  %v5509_v25 = vld [vmem:[#allocation11 + $0x14c] ss:$16 sps:$4 sm:$0xff]  }
 0x8c2   :  { %3644 = vmatpush2.bf16.msra.mxu0 %v5423_v26  ;;  %v5504_v26 = vld [vmem:[#allocation11 + $0x368] ss:$16 sps:$4 sm:$0xff]  }
 0x8c3   :  { %3695 = vmatprep.subr.bf16.mxu0 %v5431_v27  ;;  %v5512_v27 = vld [vmem:[#allocation11 + $0x34c] ss:$16 sps:$4 sm:$0xff]  }
 0x8c4   :  { %3685 = vmatpush2.bf16.msra.mxu1 %v5426_v28  ;;  %v5507_v28 = vld [vmem:[#allocation11 + $0x148] ss:$16 sps:$4 sm:$0xff]  }
 0x8c5   :  { %3646 = vmatmul.mubr.bf16.vlgmr.msra.gmra.mxu0 %v6425_v31  ;;  %3736 = vmatprep.subr.bf16.mxu1 %v5434_v54  ;;  %v5510_v54 = vld [vmem:[#allocation11 + $0x348] ss:$16 sps:$4 sm:$0xff]  }
 0x8c6   :  { %3696 = vmatpush1.bf16.msra.mxu0 %v5429_v30  ;;  %3727 = vmatprep.mubr.bf16.mxu0 %v6398_v0  ;;  %v5447_v0 = vld [vmem:[#allocation11 + $0x88] ss:$16 sps:$4 sm:$0xff]   ;;  %v5518_v30 = vld [vmem:[#allocation11 + $0x32c] ss:$16 sps:$4 sm:$0xff]  }
 0x8c7   :  { %3687 = vmatmul.mubr.bf16.vlgmr.msra.gmra.mxu1 %v6430_v34  ;;  %3697 = vmatprep.subr.bf16.mxu0 %v5437_v32  ;;  %v5513_v32 = vld [vmem:[#allocation11 + $0x128] ss:$16 sps:$4 sm:$0xff]  }
 0x8c8   :  { %3737 = vmatpush1.bf16.msra.mxu1 %v5432_v33  ;;  %3768 = vmatprep.mubr.bf16.mxu1 %v6405_v9  ;;  %v5453_v9 = vld [vmem:[#allocation11 + $0x68] ss:$16 sps:$4 sm:$0xff]   ;;  %v5521_v33 = vld [vmem:[#allocation11 + $0x10c] ss:$16 sps:$4 sm:$0xff]  }
 0x8c9   :  { %3738 = vmatprep.subr.bf16.mxu1 %v5440_v41  ;;  %v5516_v41 = vld [vmem:[#allocation11 + $0x328] ss:$16 sps:$4 sm:$0xff]  }
 0x8ca   :  { %3698 = vmatpush1.bf16.msra.mxu0 %v5435_v36  ;;  %v5524_v36 = vld [vmem:[#allocation11 + $0x30c] ss:$16 sps:$4 sm:$0xff]  }
 0x8cb   :  { %3699 = vmatprep.subr.bf16.mxu0 %v5443_v37  ;;  %v5519_v37 = vld [vmem:[#allocation11 + $0x108] ss:$16 sps:$4 sm:$0xff]  }
 0x8cc   :  { %3739 = vmatpush1.bf16.msra.mxu1 %v5438_v7  ;;  %v5527_v7 = vld [vmem:[#allocation11 + $0x4ec] ss:$16 sps:$4 sm:$0xff]  }
 0x8cd   :  { %3740 = vmatprep.subr.bf16.mxu1 %v5446_v38  ;;  %v5522_v38 = vld [vmem:[#allocation11 + $0x308] ss:$16 sps:$4 sm:$0xff]  }
 0x8ce   :  { %3700 = vmatpush1.bf16.msra.mxu0 %v5441_v39  ;;  %v5530_v39 = vld [vmem:[#allocation11 + $0x6ec] ss:$16 sps:$4 sm:$0xff]  }
 0x8cf   :  { %3701 = vmatprep.subr.bf16.mxu0 %v5449_v16  ;;  %v5525_v16 = vld [vmem:[#allocation11 + $0x4e8] ss:$16 sps:$4 sm:$0xff]  }
 0x8d0   :  { %3741 = vmatpush1.bf16.msra.mxu1 %v5444_v40  ;;  %v5533_v40 = vld [vmem:[#allocation11 + $0x4cc] ss:$16 sps:$4 sm:$0xff]  }
 0x8d1   :  { %3742 = vmatprep.subr.bf16.mxu1 %v5452_v42  ;;  %v5528_v42 = vld [vmem:[#allocation11 + $0x6e8] ss:$16 sps:$4 sm:$0xff]  }
 0x8d2   :  { %3702 = vmatpush1.bf16.msra.mxu0 %v5447_v0  ;;  %v5536_v0 = vld [vmem:[#allocation11 + $0x6cc] ss:$16 sps:$4 sm:$0xff]  }
 0x8d3   :  { %3703 = vmatprep.subr.bf16.mxu0 %v5455_v43  ;;  %v5531_v43 = vld [vmem:[#allocation11 + $0x4c8] ss:$16 sps:$4 sm:$0xff]  }
 0x8d4   :  { %3743 = vmatpush1.bf16.msra.mxu1 %v5450_v44  ;;  %v5539_v44 = vld [vmem:[#allocation11 + $0x4ac] ss:$16 sps:$4 sm:$0xff]  }
 0x8d5   :  { %3744 = vmatprep.subr.bf16.mxu1 %v5458_v45  ;;  %v5534_v45 = vld [vmem:[#allocation11 + $0x6c8] ss:$16 sps:$4 sm:$0xff]  }
 0x8d6   :  { %3704 = vmatpush1.bf16.msra.mxu0 %v5453_v9  ;;  %v5542_v9 = vld [vmem:[#allocation11 + $0x6ac] ss:$16 sps:$4 sm:$0xff]  }
 0x8d7   :  { %3705 = vmatprep.subr.bf16.mxu0 %v5461_v46  ;;  %v5537_v46 = vld [vmem:[#allocation11 + $0x4a8] ss:$16 sps:$4 sm:$0xff]  }
 0x8d8   :  { %3745 = vmatpush1.bf16.msra.mxu1 %v5456_v47  ;;  %v5540_v47 = vld [vmem:[#allocation11 + $0x6a8] ss:$16 sps:$4 sm:$0xff]  }
 0x8d9   :  { %3746 = vmatprep.subr.bf16.mxu1 %v5464_v48  ;;  %v5548_v48 = vld [vmem:[#allocation11 + $0x68c] ss:$16 sps:$4 sm:$0xff]  }
 0x8da   :  { %3706 = vmatpush1.bf16.msra.mxu0 %v5459_v49  ;;  %v5546_v49 = vld [vmem:[#allocation11 + $0x688] ss:$16 sps:$4 sm:$0xff]  }
 0x8db   :  { %3707 = vmatprep.subr.bf16.mxu0 %v5467_v50  ;;  %v5554_v50 = vld [vmem:[#allocation11 + $0x66c] ss:$16 sps:$4 sm:$0xff]  }
 0x8dc   :  { %3747 = vmatpush1.bf16.msra.mxu1 %v5462_v51  ;;  %v5557_v51 = vld [vmem:[#allocation11 + $0x44c] ss:$16 sps:$4 sm:$0xff]  }
 0x8dd   :  { %3748 = vmatprep.subr.bf16.mxu1 %v5470_v52  ;;  %v5552_v52 = vld [vmem:[#allocation11 + $0x668] ss:$16 sps:$4 sm:$0xff]  }
 0x8de   :  { %3708 = vmatpush1.bf16.msra.mxu0 %v5465_v53  ;;  %v5560_v53 = vld [vmem:[#allocation11 + $0x64c] ss:$16 sps:$4 sm:$0xff]  }
 0x8df   :  { %3709 = vmatprep.subr.bf16.mxu0 %v5473_v55  ;;  %v5555_v55 = vld [vmem:[#allocation11 + $0x448] ss:$16 sps:$4 sm:$0xff]  }
 0x8e0   :  { %3749 = vmatpush1.bf16.msra.mxu1 %v5468_v56  ;;  %v5563_v56 = vld [vmem:[#allocation11 + $0x42c] ss:$16 sps:$4 sm:$0xff]  }
 0x8e1   :  { %3750 = vmatprep.subr.bf16.mxu1 %v5476_v57  ;;  %v5558_v57 = vld [vmem:[#allocation11 + $0x648] ss:$16 sps:$4 sm:$0xff]  }
 0x8e2   :  { %3710 = vmatpush1.bf16.msra.mxu0 %v5471_v58  ;;  %v5566_v58 = vld [vmem:[#allocation11 + $0x62c] ss:$16 sps:$4 sm:$0xff]  }
 0x8e3   :  { %3711 = vmatprep.subr.bf16.mxu0 %v5479_v59  ;;  %v5561_v59 = vld [vmem:[#allocation11 + $0x428] ss:$16 sps:$4 sm:$0xff]  }
 0x8e4   :  { %3751 = vmatpush1.bf16.msra.mxu1 %v5474_v60  ;;  %v5569_v60 = vld [vmem:[#allocation11 + $0x40c] ss:$16 sps:$4 sm:$0xff]  }
 0x8e5   :  { %3752 = vmatprep.subr.bf16.mxu1 %v5482_v61  ;;  %v5564_v61 = vld [vmem:[#allocation11 + $0x628] ss:$16 sps:$4 sm:$0xff]  }
 0x8e6   :  { %3712 = vmatpush2.bf16.msra.mxu0 %v5477_v62  ;;  %v5572_v62 = vld [vmem:[#allocation11 + $0x60c] ss:$16 sps:$4 sm:$0xff]  }
 0x8e7   :  { %3713 = vmatprep.subr.bf16.mxu0 %v5485_v63  ;;  %v5567_v63 = vld [vmem:[#allocation11 + $0x408] ss:$16 sps:$4 sm:$0xff]  }
 0x8e8   :  { %3753 = vmatpush2.bf16.msra.mxu1 %v5480_v1  ;;  %v5575_v1 = vld [vmem:[#allocation11 + $0x5ec] ss:$16 sps:$4 sm:$0xff]  }
 0x8e9   :  { %3754 = vmatprep.subr.bf16.mxu1 %v5488_v3  ;;  %v5570_v3 = vld [vmem:[#allocation11 + $0x608] ss:$16 sps:$4 sm:$0xff]  }
 0x8ea   :  { %3714 = vmatpush2.bf16.msra.mxu0 %v5483_v4  ;;  %v5578_v4 = vld [vmem:[#allocation11 + $0x7ec] ss:$16 sps:$4 sm:$0xff]  }
 0x8eb   :  { %3715 = vmatprep.subr.bf16.mxu0 %v5491_v5  ;;  %v5573_v5 = vld [vmem:[#allocation11 + $0x5e8] ss:$16 sps:$4 sm:$0xff]  }
 0x8ec   :  { %3755 = vmatpush2.bf16.msra.mxu1 %v5486_v6  ;;  %v5581_v6 = vld [vmem:[#allocation11 + $0x5cc] ss:$16 sps:$4 sm:$0xff]  }
 0x8ed   :  { %3756 = vmatprep.subr.bf16.mxu1 %v5494_v8  ;;  %v5576_v8 = vld [vmem:[#allocation11 + $0x7e8] ss:$16 sps:$4 sm:$0xff]  }
 0x8ee   :  { %3716 = vmatpush2.bf16.msra.mxu0 %v5489_v14  ;;  %v5584_v14 = vld [vmem:[#allocation11 + $0x7cc] ss:$16 sps:$4 sm:$0xff]  }
 0x8ef   :  { %3717 = vmatprep.subr.bf16.mxu0 %v5497_v10  ;;  %v5579_v10 = vld [vmem:[#allocation11 + $0x5c8] ss:$16 sps:$4 sm:$0xff]  }
 0x8f0   :  { %3757 = vmatpush2.bf16.msra.mxu1 %v5492_v15  ;;  %v5587_v15 = vld [vmem:[#allocation11 + $0x5ac] ss:$16 sps:$4 sm:$0xff]  }
 0x8f1   :  { %3758 = vmatprep.subr.bf16.mxu1 %v5500_v17  ;;  %v5582_v17 = vld [vmem:[#allocation11 + $0x7c8] ss:$16 sps:$4 sm:$0xff]  }
 0x8f2   :  { %3718 = vmatpush2.bf16.msra.mxu0 %v5495_v19  ;;  %v5590_v19 = vld [vmem:[#allocation11 + $0x7ac] ss:$16 sps:$4 sm:$0xff]  }
 0x8f3   :  { %3719 = vmatprep.subr.bf16.mxu0 %v5503_v20  ;;  %v5585_v20 = vld [vmem:[#allocation11 + $0x5a8] ss:$16 sps:$4 sm:$0xff]  }
 0x8f4   :  { %3759 = vmatpush2.bf16.msra.mxu1 %v5498_v22  ;;  %v5593_v22 = vld [vmem:[#allocation11 + $0x58c] ss:$16 sps:$4 sm:$0xff]  }
 0x8f5   :  { %3760 = vmatprep.subr.bf16.mxu1 %v5506_v23  ;;  %v5588_v23 = vld [vmem:[#allocation11 + $0x7a8] ss:$16 sps:$4 sm:$0xff]  }
 0x8f6   :  { %3720 = vmatpush2.bf16.msra.mxu0 %v5501_v24  ;;  %v5596_v24 = vld [vmem:[#allocation11 + $0x78c] ss:$16 sps:$4 sm:$0xff]  }
 0x8f7   :  { %3721 = vmatprep.subr.bf16.mxu0 %v5509_v25  ;;  %v5591_v25 = vld [vmem:[#allocation11 + $0x588] ss:$16 sps:$4 sm:$0xff]  }
 0x8f8   :  { %3761 = vmatpush2.bf16.msra.mxu1 %v5504_v26  ;;  %v5599_v26 = vld [vmem:[#allocation11 + $0x56c] ss:$16 sps:$4 sm:$0xff]  }
 0x8f9   :  { %3762 = vmatprep.subr.bf16.mxu1 %v5512_v27  ;;  %v5594_v27 = vld [vmem:[#allocation11 + $0x788] ss:$16 sps:$4 sm:$0xff]  }
 0x8fa   :  { %3722 = vmatpush2.bf16.msra.mxu0 %v5507_v28  ;;  %v5602_v28 = vld [vmem:[#allocation11 + $0x76c] ss:$16 sps:$4 sm:$0xff]  }
 0x8fb   :  { %3723 = vmatprep.subr.bf16.mxu0 %v5515_v29  ;;  %v5597_v29 = vld [vmem:[#allocation11 + $0x568] ss:$16 sps:$4 sm:$0xff]  }
 0x8fc   :  { %3763 = vmatpush2.bf16.msra.mxu1 %v5510_v54  ;;  %v5605_v54 = vld [vmem:[#allocation11 + $0x54c] ss:$16 sps:$4 sm:$0xff]  }
 0x8fd   :  { %3764 = vmatprep.subr.bf16.mxu1 %v5518_v30  ;;  %v5600_v30 = vld [vmem:[#allocation11 + $0x768] ss:$16 sps:$4 sm:$0xff]  }
 0x8fe   :  { %3724 = vmatpush2.bf16.msra.mxu0 %v5513_v32  ;;  %v5608_v32 = vld [vmem:[#allocation11 + $0x74c] ss:$16 sps:$4 sm:$0xff]  }
 0x8ff   :  { %3725 = vmatprep.subr.bf16.mxu0 %v5521_v33  ;;  %v5603_v33 = vld [vmem:[#allocation11 + $0x548] ss:$16 sps:$4 sm:$0xff]  }
 0x900   :  { %3765 = vmatpush2.bf16.msra.mxu1 %v5516_v41  ;;  %v5611_v41 = vld [vmem:[#allocation11 + $0x52c] ss:$16 sps:$4 sm:$0xff]  }
 0x901   :  { %3766 = vmatprep.subr.bf16.mxu1 %v5524_v36  ;;  %v5606_v36 = vld [vmem:[#allocation11 + $0x748] ss:$16 sps:$4 sm:$0xff]  }
 0x902   :  { %3726 = vmatpush2.bf16.msra.mxu0 %v5519_v37  ;;  %v5614_v37 = vld [vmem:[#allocation11 + $0x72c] ss:$16 sps:$4 sm:$0xff]  }
 0x903   :  { %3777 = vmatprep.subr.bf16.mxu0 %v5527_v7  ;;  %v5609_v7 = vld [vmem:[#allocation11 + $0x528] ss:$16 sps:$4 sm:$0xff]  }
 0x904   :  { %3767 = vmatpush2.bf16.msra.mxu1 %v5522_v38  ;;  %v5617_v38 = vld [vmem:[#allocation11 + $0x50c] ss:$16 sps:$4 sm:$0xff]  }
 0x905   :  { %3728 = vmatmul.mubr.bf16.vlgmr.msra.gmra.mxu0 %v6400_v2  ;;  %3818 = vmatprep.subr.bf16.mxu1 %v5530_v39  ;;  %v5545_v2 = vld [vmem:[#allocation11 + $0x48c] ss:$16 sps:$4 sm:$0xff]   ;;  %v5612_v39 = vld [vmem:[#allocation11 + $0x728] ss:$16 sps:$4 sm:$0xff]  }
 0x906   :  { %3778 = vmatpush1.bf16.msra.mxu0 %v5525_v16  ;;  %3809 = vmatprep.mubr.bf16.mxu0 %v6407_v13  ;;  %v5543_v13 = vld [vmem:[#allocation11 + $0x488] ss:$16 sps:$4 sm:$0xff]   ;;  %v5620_v16 = vld [vmem:[#allocation11 + $0x70c] ss:$16 sps:$4 sm:$0xff]  }
 0x907   :  { %3769 = vmatmul.mubr.bf16.vlgmr.msra.gmra.mxu1 %v6412_v18  ;;  %3779 = vmatprep.subr.bf16.mxu0 %v5533_v40  ;;  %v5551_v18 = vld [vmem:[#allocation11 + $0x46c] ss:$16 sps:$4 sm:$0xff]   ;;  %v5615_v40 = vld [vmem:[#allocation11 + $0x508] ss:$16 sps:$4 sm:$0xff]  }
 0x908   :  { %3819 = vmatpush1.bf16.msra.mxu1 %v5528_v42  ;;  %3850 = vmatprep.mubr.bf16.mxu1 %v6420_v21  ;;  %v5549_v21 = vld [vmem:[#allocation11 + $0x468] ss:$16 sps:$4 sm:$0xff]   ;;  %v2229_v42 = vld [vmem:[%s6538_s17] sm:$0xf] }
 0x909   :  { %3820 = vmatprep.subr.bf16.mxu1 %v5536_v0  ;;  %v5618_v0 = vld [vmem:[#allocation11 + $0x708] ss:$16 sps:$4 sm:$0xff]  }
 0x90a   :  { %3780 = vmatpush1.bf16.msra.mxu0 %v5531_v43  ;;  %v2234_v43 = vrot.slane %v2229_v42, %v6145_v35 }
 0x90b   :  { %3781 = vmatprep.subr.bf16.mxu0 %v5539_v44  ;;  %v2238_v44 = vrot.slane %v2229_v42, %v6138_v12 }
 0x90c   :  { %3821 = vmatpush1.bf16.msra.mxu1 %v5534_v45 }
 0x90d   :  { %3822 = vmatprep.subr.bf16.mxu1 %v5542_v9 }
 0x90e   :  { %3782 = vmatpush1.bf16.msra.mxu0 %v5537_v46 }
 0x90f   :  { %3783 = vmatprep.subr.bf16.mxu0 %v5545_v2 }
 0x910   :  { %3823 = vmatpush1.bf16.msra.mxu1 %v5540_v47 }
 0x911   :  { %3824 = vmatprep.subr.bf16.mxu1 %v5548_v48 }
 0x912   :  { %3784 = vmatpush1.bf16.msra.mxu0 %v5543_v13 }
 0x913   :  { %3785 = vmatprep.subr.bf16.mxu0 %v5551_v18 }
 0x914   :  { %3825 = vmatpush1.bf16.msra.mxu1 %v5546_v49 }
 0x915   :  { %3826 = vmatprep.subr.bf16.mxu1 %v5554_v50 }
 0x916   :  { %3786 = vmatpush1.bf16.msra.mxu0 %v5549_v21 }
 0x917   :  { %3787 = vmatprep.subr.bf16.mxu0 %v5557_v51 }
 0x918   :  { %3827 = vmatpush1.bf16.msra.mxu1 %v5552_v52 }
 0x919   :  { %3828 = vmatprep.subr.bf16.mxu1 %v5560_v53 }
 0x91a   :  { %3788 = vmatpush1.bf16.msra.mxu0 %v5555_v55 }
 0x91b   :  { %3789 = vmatprep.subr.bf16.mxu0 %v5563_v56 }
 0x91c   :  { %3829 = vmatpush1.bf16.msra.mxu1 %v5558_v57 }
 0x91d   :  { %3830 = vmatprep.subr.bf16.mxu1 %v5566_v58 }
 0x91e   :  { %3790 = vmatpush1.bf16.msra.mxu0 %v5561_v59 }
 0x91f   :  { %3791 = vmatprep.subr.bf16.mxu0 %v5569_v60 }
 0x920   :  { %3831 = vmatpush1.bf16.msra.mxu1 %v5564_v61 }
 0x921   :  { %3832 = vmatprep.subr.bf16.mxu1 %v5572_v62 }
 0x922   :  { %3792 = vmatpush1.bf16.msra.mxu0 %v5567_v63 }
 0x923   :  { %3793 = vmatprep.subr.bf16.mxu0 %v5575_v1 }
 0x924   :  { %3833 = vmatpush1.bf16.msra.mxu1 %v5570_v3 }
 0x925   :  { %3834 = vmatprep.subr.bf16.mxu1 %v5578_v4 }
 0x926   :  { %3794 = vmatpush2.bf16.msra.mxu0 %v5573_v5 }
 0x927   :  { %3795 = vmatprep.subr.bf16.mxu0 %v5581_v6 }
 0x928   :  { %3835 = vmatpush2.bf16.msra.mxu1 %v5576_v8 }
 0x929   :  { %3836 = vmatprep.subr.bf16.mxu1 %v5584_v14 }
 0x92a   :  { %3796 = vmatpush2.bf16.msra.mxu0 %v5579_v10  ;;  %v2241_v10 = vsub.s32 2, %v6135_v11 }
 0x92b   :  { %3797 = vmatprep.subr.bf16.mxu0 %v5587_v15  ;;  %v2245_v15 = vsub.s32 3, %v6135_v11 }
 0x92c   :  { %3837 = vmatpush2.bf16.msra.mxu1 %v5582_v17  ;;  %v2242_v17 = vrot.slane %v2229_v42, %v2241_v10  ;;  %v5653_v10 = vld [vmem:[#allocation13 + $0xd4] ss:$8 sps:$4 sm:$0xff]  }
 0x92d   :  { %3838 = vmatprep.subr.bf16.mxu1 %v5590_v19  ;;  %v2246_v19 = vrot.slane %v2229_v42, %v2245_v15  ;;  %v5651_v15 = vld [vmem:[#allocation13 + $0xd0] ss:$8 sps:$4 sm:$0xff]  }
 0x92e   :  { %3798 = vmatpush2.bf16.msra.mxu0 %v5585_v20 }
 0x92f   :  { %3799 = vmatprep.subr.bf16.mxu0 %v5593_v22 }
 0x930   :  { %3839 = vmatpush2.bf16.msra.mxu1 %v5588_v23 }
 0x931   :  { %3840 = vmatprep.subr.bf16.mxu1 %v5596_v24 }
 0x932   :  { %3800 = vmatpush2.bf16.msra.mxu0 %v5591_v25 }
 0x933   :  { %3801 = vmatprep.subr.bf16.mxu0 %v5599_v26 }
 0x934   :  { %3841 = vmatpush2.bf16.msra.mxu1 %v5594_v27 }
 0x935   :  { %3842 = vmatprep.subr.bf16.mxu1 %v5602_v28 }
 0x936   :  { %3802 = vmatpush2.bf16.msra.mxu0 %v5597_v29 }
 0x937   :  { %3803 = vmatprep.subr.bf16.mxu0 %v5605_v54 }
 0x938   :  { %3843 = vmatpush2.bf16.msra.mxu1 %v5600_v30 }
 0x939   :  { %3844 = vmatprep.subr.bf16.mxu1 %v5608_v32 }
 0x93a   :  { %3804 = vmatpush2.bf16.msra.mxu0 %v5603_v33 }
 0x93b   :  { %3805 = vmatprep.subr.bf16.mxu0 %v5611_v41 }
 0x93c   :  { %3845 = vmatpush2.bf16.msra.mxu1 %v5606_v36 }
 0x93d   :  { %3846 = vmatprep.subr.bf16.mxu1 %v5614_v37 }
 0x93e   :  { %3806 = vmatpush2.bf16.msra.mxu0 %v5609_v7 }
 0x93f   :  { %3807 = vmatprep.subr.bf16.mxu0 %v5617_v38 }
 0x940   :  { %3847 = vmatpush2.bf16.msra.mxu1 %v5612_v39 }
 0x941   :  { %3848 = vmatprep.subr.bf16.mxu1 %v5620_v16 }
 0x942   :  { %3808 = vmatpush2.bf16.msra.mxu0 %v5615_v40 }
 0x944   :  { %3849 = vmatpush2.bf16.msra.mxu1 %v5618_v0 }
 0x945   :  { %3810 = vmatmul.mubr.bf16.vlgmr.msra.gmra.mxu0 %v6425_v31  ;;  %v3565_v45 = vpop.f32.mrf.mxu0 }
 0x946   :  { %v3566_v9 = vadd.f32 %v3565_v45, %v2234_v43 }
 0x947   :  { %3851 = vmatmul.mubr.bf16.vlgmr.msra.gmra.mxu1 %v6430_v34  ;;  %v3567_v46 = vpop.f32.mrf.mxu0  ;;  %v3606_v2 = vpop.f32.mrf.mxu1 }
 0x948   :  { %v3568_v47 = vadd.f32 %v3567_v46, %v2238_v44  ;;  %v3607_v48 = vadd.f32 %v3606_v2, %v3566_v9  ;;  %v5621_v2 = vld [vmem:[#allocation13 + $0x70] ss:$8 sps:$4 sm:$0xff]  }
 0x949   :  { %v3569_v13 = vpop.f32.mrf.mxu0  ;;  %v3608_v18 = vpop.f32.mrf.mxu1 }
 0x94a   :  { %v3609_v49 = vadd.f32 %v3608_v18, %v3568_v47  ;;  %v5623_v47 = vld [vmem:[#allocation13 + $0x74] ss:$8 sps:$4 sm:$0xff]   ;;  %v5624_v13 = vld [vmem:[#allocation13 + $0x60] ss:$8 sps:$4 sm:$0xff]  }
 0x94b   :  { %v3570_v50 = vpop.f32.mrf.mxu0  ;;  %v3610_v21 = vpop.f32.mrf.mxu1  ;;  %4127 = vmatprep.subr.bf16.mxu0 %v5623_v47  ;;  %v5629_v18 = vld [vmem:[#allocation13 + $0x54] ss:$8 sps:$4 sm:$0xff]   ;;  %v5673_v47 = vld [vmem:[%s6545_s24 + $0x68] sm:$0xff]  }
 0x94c   :  { %4128 = vmatpush1.bf16.msra.mxu0 %v5621_v2  ;;  %v5632_v50 = vld [vmem:[#allocation13 + $0x44] ss:$8 sps:$4 sm:$0xff]   ;;  %v5630_v21 = vld [vmem:[#allocation13 + $0x40] ss:$8 sps:$4 sm:$0xff]   ;;  %v5672_v2 = vld [vmem:[%s6545_s24 + $0x30] sm:$0xff]  }
 0x94d   :  { %v3611_v51 = vpop.f32.mrf.mxu1 }
 0x94e   :  { %v5635_v51 = vld [vmem:[#allocation13 + $0x34] ss:$8 sps:$4 sm:$0xff]  }
 0x985   :  { %v3647_v52 = vpop.f32.mrf.mxu0 }
 0x986   :  { %v3648_v53 = vadd.f32 %v3647_v52, %v3607_v48  ;;  %v5626_v48 = vld [vmem:[#allocation13 + $0x64] ss:$8 sps:$4 sm:$0xff]   ;;  %v5633_v52 = vld [vmem:[#allocation13 + $0x30] ss:$8 sps:$4 sm:$0xff]  }
 0x987   :  { %v3649_v55 = vpop.f32.mrf.mxu0  ;;  %v3688_v56 = vpop.f32.mrf.mxu1  ;;  %4129 = vmatprep.subr.bf16.mxu0 %v5626_v48  ;;  %v5674_v48 = vld [vmem:[%s6545_s24 + $0x28] sm:$0xff]  }
 0x988   :  { %v3650_v57 = vadd.f32 %v3649_v55, %v3609_v49  ;;  %v3689_v31 = vadd.f32 %v3688_v56, %v3648_v53  ;;  %4130 = vmatpush1.bf16.msra.mxu0 %v5624_v13  ;;  %v5627_v49 = vld [vmem:[#allocation13 + $0x50] ss:$8 sps:$4 sm:$0xff]   ;;  %v5638_v53 = vld [vmem:[#allocation13 + $0x24] ss:$8 sps:$4 sm:$0xff]   ;;  %v5636_v55 = vld [vmem:[#allocation13 + $0x20] ss:$8 sps:$4 sm:$0xff]  }
 0x989   :  { %v3651_v58 = vpop.f32.mrf.mxu0  ;;  %v3690_v59 = vpop.f32.mrf.mxu1  ;;  %4131 = vmatprep.subr.bf16.mxu0 %v5629_v18  ;;  %v5641_v56 = vld [vmem:[#allocation13 + $0x14] ss:$8 sps:$4 sm:$0xff]   ;;  %v5675_v13 = vld [vmem:[%s6545_s24 + $0x60] sm:$0xff]  }
 0x98a   :  { %v3691_v60 = vadd.f32 %v3690_v59, %v3650_v57  ;;  %v5639_v57 = vld [vmem:[#allocation13 + $0x10] ss:$8 sps:$4 sm:$0xff]   ;;  %v5642_v58 = vld [vmem:[#allocation13] ss:$8 sps:$4 sm:$0xff]   ;;  %v5647_v59 = vld [vmem:[#allocation13 + $0xf4] ss:$8 sps:$4 sm:$0xff]  }
 0x98b   :  { %v3652_v34 = vpop.f32.mrf.mxu0  ;;  %v3692_v61 = vpop.f32.mrf.mxu1  ;;  %v5676_v18 = vld [vmem:[%s6545_s24 + $0x20] sm:$0xff]  }
 0x98c   :  { %4132 = vmatpush1.bf16.msra.mxu0 %v5627_v49  ;;  %v5650_v34 = vld [vmem:[#allocation13 + $0xe4] ss:$8 sps:$4 sm:$0xff]   ;;  %v5648_v61 = vld [vmem:[#allocation13 + $0xe0] ss:$8 sps:$4 sm:$0xff]   ;;  %v5677_v49 = vld [vmem:[%s6545_s24 + $0x58] sm:$0xff]  }
 0x98d   :  { %v3693_v62 = vpop.f32.mrf.mxu1  ;;  %4133 = vmatprep.subr.bf16.mxu0 %v5632_v50  ;;  %v5678_v50 = vld [vmem:[%s6545_s24 + $0x18] sm:$0xff]  }
 0x990   :  { %4134 = vmatpush1.bf16.msra.mxu0 %v5630_v21  ;;  %v5679_v21 = vld [vmem:[%s6545_s24 + $0x50] sm:$0xff]  }
 0x991   :  { %4135 = vmatprep.subr.bf16.mxu0 %v5635_v51  ;;  %v5680_v51 = vld [vmem:[%s6545_s24 + $0x10] sm:$0xff]  }
 0x994   :  { %4136 = vmatpush1.bf16.msra.mxu0 %v5633_v52  ;;  %v5681_v52 = vld [vmem:[%s6545_s24 + $0x48] sm:$0xff]  }
 0x995   :  { %4137 = vmatprep.subr.bf16.mxu0 %v5638_v53  ;;  %v5682_v53 = vld [vmem:[%s6545_s24 + $0x8] sm:$0xff]  }
 0x998   :  { %4138 = vmatpush1.bf16.msra.mxu0 %v5636_v55  ;;  %v5683_v55 = vld [vmem:[%s6545_s24 + $0x40] sm:$0xff]  }
 0x999   :  { %4139 = vmatprep.subr.bf16.mxu0 %v5641_v56  ;;  %v5684_v56 = vld [vmem:[%s6545_s24] sm:$0xff]  }
 0x99c   :  { %4140 = vmatpush1.bf16.msra.mxu0 %v5639_v57  ;;  %v3955_v57 = vld [vmem:[%s6542_s21] sm:$0x3] }
 0x9c5   :  { %v3729_v63 = vpop.f32.mrf.mxu0 }
 0x9c6   :  { %v3730_v20 = vadd.f32 %v3729_v63, %v2242_v17  ;;  %v5656_v17 = vld [vmem:[#allocation13 + $0xc4] ss:$8 sps:$4 sm:$0xff]  }
 0x9c7   :  { %v3731_v1 = vpop.f32.mrf.mxu0  ;;  %v3770_v3 = vpop.f32.mrf.mxu1 }
 0x9c8   :  { %v3732_v22 = vadd.f32 %v3731_v1, %v2246_v19  ;;  %v3771_v23 = vadd.f32 %v3770_v3, %v3730_v20  ;;  %v5654_v19 = vld [vmem:[#allocation13 + $0xc0] ss:$8 sps:$4 sm:$0xff]   ;;  %v5659_v20 = vld [vmem:[#allocation13 + $0xb4] ss:$8 sps:$4 sm:$0xff]  }
 0x9c9   :  { %v3733_v4 = vpop.f32.mrf.mxu0  ;;  %v3772_v5 = vpop.f32.mrf.mxu1 }
 0x9ca   :  { %v3773_v25 = vadd.f32 %v3772_v5, %v3732_v22  ;;  %v5657_v22 = vld [vmem:[#allocation13 + $0xb0] ss:$8 sps:$4 sm:$0xff]  }
 0x9cb   :  { %v3734_v6 = vpop.f32.mrf.mxu0  ;;  %v3774_v8 = vpop.f32.mrf.mxu1 }
 0x9cd   :  { %v3775_v14 = vpop.f32.mrf.mxu1 }
 0xa05   :  { %v3811_v24 = vpop.f32.mrf.mxu0 }
 0xa06   :  { %v3812_v26 = vadd.f32 %v3811_v24, %v3771_v23  ;;  %v5662_v23 = vld [vmem:[#allocation13 + $0xa4] ss:$8 sps:$4 sm:$0xff]   ;;  %v5660_v24 = vld [vmem:[#allocation13 + $0xa0] ss:$8 sps:$4 sm:$0xff]  }
 0xa07   :  { %v3813_v27 = vpop.f32.mrf.mxu0  ;;  %v3852_v28 = vpop.f32.mrf.mxu1 }
 0xa08   :  { %v3814_v29 = vadd.f32 %v3813_v27, %v3773_v25  ;;  %v3853_v54 = vadd.f32 %v3852_v28, %v3812_v26  ;;  %v5665_v25 = vld [vmem:[#allocation13 + $0x94] ss:$8 sps:$4 sm:$0xff]   ;;  %v5663_v26 = vld [vmem:[#allocation13 + $0x90] ss:$8 sps:$4 sm:$0xff]   ;;  %v5668_v27 = vld [vmem:[#allocation13 + $0x84] ss:$8 sps:$4 sm:$0xff]  }
 0xa09   :  { %v3815_v30 = vpop.f32.mrf.mxu0  ;;  %v3854_v32 = vpop.f32.mrf.mxu1  ;;  %v5666_v28 = vld [vmem:[#allocation13 + $0x80] ss:$8 sps:$4 sm:$0xff]  }
 0xa0a   :  { %v4805_v33 = vmul.f32 -1.442695, %v3853_v54  ;;  %v3855_v41 = vadd.f32 %v3854_v32, %v3814_v29  ;;  %v3893_v32 = vld [vmem:[%s6541_s20] sm:$0x3] }
 0xa0b   :  { %v3816_v36 = vpop.f32.mrf.mxu0  ;;  %v3856_v37 = vpop.f32.mrf.mxu1 }
 0xa0c   :  { %5711 = vpow2.f32 %v4805_v33  ;;  %v4806_v11 = vmul.f32 -1.442695, %v3855_v41  ;;  %v3907_v33 = vld [vmem:[%s6540_s19] sm:$0x3]  ;;  %v3898_v41 = vrot.slane %v3893_v32, %v6145_v35  ;;  %v3902_v36 = vrot.slane %v3893_v32, %v6138_v12 }
 0xa0d   :  { %v3857_v7 = vpop.f32.mrf.mxu1 }
 0xa0e   :  { %5713 = vpow2.f32 %v4806_v11  ;;  %v3912_v7 = vrot.slane %v3907_v33, %v6145_v35 }
 0xa19   :  { %v5712_v38 = vpop.eup %5711 }
 0xa1a   :  { %v3865_v39 = vadd.f32 1.0, %v5712_v38  ;;  %v3916_v38 = vrot.slane %v3907_v33, %v6138_v12 }
 0xa1b   :  { %v5714_v16 = vpop.eup %5713 }
 0xa1c   :  { %5715 = vrcp.f32 %v3865_v39  ;;  %v3866_v40 = vadd.f32 1.0, %v5714_v16 }
 0xa1e   :  { %5717 = vrcp.f32 %v3866_v40 }
 0xa29   :  { %v5716_v42 = vpop.eup %5715 }
 0xa2a   :  { %v3871_v0 = vmul.f32 %v5716_v42, %v3689_v31  ;;  %v5644_v31 = vld [vmem:[#allocation13 + $0x4] ss:$8 sps:$4 sm:$0xff]  }
 0xa2b   :  { %v5718_v43 = vpop.eup %5717  ;;  %4141 = vmatprep.subr.bf16.mxu0 %v5644_v31  ;;  %v3960_v31 = vrot.slane %v3955_v57, %v6145_v35 }
 0xa2c   :  { %v3872_v44 = vmul.f32 %v5718_v43, %v3691_v60  ;;  %v3873_v45 = vsel %vm226_vm2, %v3871_v0, 0.0  ;;  %4142 = vmatpush1.bf16.msra.mxu0 %v5642_v58  ;;  %v5645_v60 = vld [vmem:[#allocation13 + $0xf0] ss:$8 sps:$4 sm:$0xff]   ;;  %v3964_v58 = vrot.slane %v3955_v57, %v6138_v12 }
 0xa2d   :  { %4143 = vmatprep.subr.bf16.mxu0 %v5647_v59 }
 0xa2e   :  { %v3874_v9 = vsel %vm226_vm2, %v3872_v44, 0.0 }
 0xa2f   :  { %v3875_v46 = vadd.f32 %v3874_v9, %v3873_v45  ;;  %v5669_v45 = vld [vmem:[%s6545_s24 + $0x78] sm:$0xff]  }
 0xa30   :  { %4144 = vmatpush2.bf16.msra.mxu0 %v5645_v60  ;;  %v5670_v9 = vld [vmem:[%s6545_s24 + $0x38] sm:$0xff]   ;;  %4908 = vmatprep.subr.bf16.mxu1 %v5669_v45 }
 0xa31   :  { %3876 = vadd.xlane.f32.xlu1 %v3875_v46  ;;  %4145 = vmatprep.subr.bf16.mxu0 %v5650_v34  ;;  %v5671_v46 = vld [vmem:[%s6545_s24 + $0x70] sm:$0xff]  }
 0xa32   :  { %4909 = vmatpush3.bf16.msra.mxu1 %v5670_v9 }
 0xa33   :  { %4910 = vmatprep.subr.bf16.mxu1 %v5671_v46 }
 0xa34   :  { %4146 = vmatpush2.bf16.msra.mxu0 %v5648_v61 }
 0xa35   :  { %4147 = vmatprep.subr.bf16.mxu0 %v5653_v10 }
 0xa36   :  { %4911 = vmatpush3.bf16.msra.mxu1 %v5672_v2 }
 0xa37   :  { %4912 = vmatprep.subr.bf16.mxu1 %v5673_v47 }
 0xa38   :  { %4148 = vmatpush2.bf16.msra.mxu0 %v5651_v15 }
 0xa39   :  { %4149 = vmatprep.subr.bf16.mxu0 %v5656_v17  ;;  %v4841_v17 = vld [vmem:[%s6544_s23] ss:$0 sm:$0xff] }
 0xa3a   :  { %4913 = vmatpush3.bf16.msra.mxu1 %v5674_v48 }
 0xa3b   :  { %4914 = vmatprep.subr.bf16.mxu1 %v5675_v13 }
 0xa3c   :  { %4150 = vmatpush2.bf16.msra.mxu0 %v5654_v19 }
 0xa3d   :  { %4151 = vmatprep.subr.bf16.mxu0 %v5659_v20 }
 0xa3e   :  { %4915 = vmatpush3.bf16.msra.mxu1 %v5676_v18 }
 0xa3f   :  { %4916 = vmatprep.subr.bf16.mxu1 %v5677_v49 }
 0xa40   :  { %4152 = vmatpush2.bf16.msra.mxu0 %v5657_v22 }
 0xa41   :  { %4153 = vmatprep.subr.bf16.mxu0 %v5662_v23 }
 0xa42   :  { %4917 = vmatpush3.bf16.msra.mxu1 %v5678_v50 }
 0xa43   :  { %4918 = vmatprep.subr.bf16.mxu1 %v5679_v21 }
 0xa44   :  { %4154 = vmatpush2.bf16.msra.mxu0 %v5660_v24 }
 0xa45   :  { %4155 = vmatprep.subr.bf16.mxu0 %v5665_v25 }
 0xa46   :  { %4919 = vmatpush3.bf16.msra.mxu1 %v5680_v51 }
 0xa47   :  { %4920 = vmatprep.subr.bf16.mxu1 %v5681_v52 }
 0xa48   :  { %4156 = vmatpush2.bf16.msra.mxu0 %v5663_v26 }
 0xa49   :  { %4157 = vmatprep.subr.bf16.mxu0 %v5668_v27 }
 0xa4a   :  { %4921 = vmatpush3.bf16.msra.mxu1 %v5682_v53 }
 0xa4b   :  { %4922 = vmatprep.subr.bf16.mxu1 %v5683_v55 }
 0xa4c   :  { %4158 = vmatpush2.bf16.msra.mxu0 %v5666_v28 }
 0xa4e   :  { %4923 = vmatpush3.bf16.msra.mxu1 %v5684_v56 }
 0xaba   :  { %v3877_v62 = vpop.xlane.xlu1 %3876 }
 0xabb   :  { %v3878_v63 = vmul.f32 0.00390625, %v3877_v62 }
 0xabd   :  { %v3879_v1 = vsub.f32 %v3871_v0, %v3878_v63  ;;  %v3880_v3 = vsub.f32 %v3872_v44, %v3878_v63 }
 0xabf   :  { %v3881_v4 = vmul.f32 %v3879_v1, %v3879_v1  ;;  %v3882_v5 = vmul.f32 %v3880_v3, %v3880_v3 }
 0xac1   :  { %v3883_v6 = vsel %vm226_vm2, %v3881_v4, 0.0  ;;  %v3884_v8 = vsel %vm226_vm2, %v3882_v5, 0.0 }
 0xac2   :  { %v3885_v14 = vadd.f32 %v3884_v8, %v3883_v6 }
 0xac4   :  { %3886 = vadd.xlane.f32.xlu1 %v3885_v14 }
 0xb4d   :  { %v3887_v29 = vpop.xlane.xlu1 %3886 }
 0xb4e   :  { %v3888_v54 = vmul.f32 0.00390625, %v3887_v29 }
 0xb50   :  { %v3889_v30 = vadd.f32 1e-05, %v3888_v54 }
 0xb52   :  { %5719 = vrsqrt.f32 %v3889_v30 }
 0xb5f   :  { %v5720_v37 = vpop.eup %5719 }
 0xb60   :  { %v3892_v11 = vmul.f32 %v5720_v37, %v3880_v3  ;;  %v3891_v39 = vmul.f32 %v5720_v37, %v3879_v1 }
 0xb62   :  { %v3906_v16 = vmul.f32 %v3902_v36, %v3892_v11  ;;  %v3905_v40 = vmul.f32 %v3898_v41, %v3891_v39 }
 0xb64   :  { %v3920_v42 = vadd.f32 %v3916_v38, %v3906_v16  ;;  %v3919_v0 = vadd.f32 %v3912_v7, %v3905_v40 }
 0xb66   :  { %v3954_v43 = vpack.c.bf16 %v3920_v42, %v3920_v42  ;;  %v3953_v44 = vpack.c.bf16 %v3919_v0, %v3919_v0 }
 0xb68   :  { %4159 = vmatprep.mubr.bf16.mxu0 %v3954_v43 }
 0xb69   :  { %4160 = vmatmul.mubr.bf16.vlgmr.msra.gmra.mxu0 %v3953_v44 }
 0xc29   :  { %v4161_v59 = vpop.f32.mrf.mxu0 }
 0xc2a   :  { %v4162_v60 = vadd.f32 %v4161_v59, %v3960_v31 }
 0xc2b   :  { %v4163_v34 = vpop.f32.mrf.mxu0 }
 0xc2c   :  { %v4839_v61 = vmul.f32 -1.442695, %v4162_v60  ;;  %v4164_v62 = vadd.f32 %v4163_v34, %v3964_v58 }
 0xc2d   :  { %v4165_v63 = vpop.f32.mrf.mxu0 }
 0xc2e   :  { %5721 = vpow2.f32 %v4839_v61  ;;  %v4840_v1 = vmul.f32 -1.442695, %v4164_v62 }
 0xc2f   :  { %v4166_v3 = vpop.f32.mrf.mxu0 }
 0xc30   :  { %5723 = vpow2.f32 %v4840_v1 }
 0xc3b   :  { %v5722_v4 = vpop.eup %5721 }
 0xc3c   :  { %v4174_v5 = vadd.f32 1.0, %v5722_v4 }
 0xc3d   :  { %v5724_v6 = vpop.eup %5723 }
 0xc3e   :  { %v4175_v8 = vadd.f32 1.0, %v5724_v6  ;;  %5725 = vrcp.f32 %v4174_v5 }
 0xc40   :  { %5727 = vrcp.f32 %v4175_v8 }
 0xc4b   :  { %v5726_v14 = vpop.eup %5725 }
 0xc4c   :  { %v4212_v12 = vpack.c.bf16 %v5726_v14, %v5726_v14 }
 0xc4d   :  { %v5728_v35 = vpop.eup %5727 }
 0xc4e   :  { %v4213_v10 = vpack.c.bf16 %v5728_v35, %v5728_v35 }
 0xc50   :  { %4349 = vmatprep.mubr.bf16.mxu1 %v4213_v10 }
 0xc51   :  { %4350 = vmatmul.mubr.bf16.vlgmr.msra.gmra.mxu1 %v4212_v12 }
 0xd11   :  { %v4924_v15 = vpop.f32.mrf.mxu1 }
 0xd13   :  { %v4925_v19 = vpop.f32.mrf.mxu1 }
 0xd14   :  { %v4926_v20 = vadd.f32 %v4925_v19, %v4924_v15 }
 0xd15   :  { %v4927_v22 = vpop.f32.mrf.mxu1 }
 0xd16   :  { %v4352_v23 = vadd.f32 %v4926_v20, %v4841_v17 }
 0xd17   :  { %v4928_v24 = vpop.f32.mrf.mxu1 }
 0xd18   :  { %4358 = vst.msk [vmem:[#allocation14] sm:$0x3] %vm4357_vm7, %v4352_v23 }
 0xd19   :  { %5880 = shalt.err (!%p5877_p11)
}
 0xd1a   :  { %4368 = dma.vmem_to_hbm [thread:$0]  %s4366_s29, 32, %s6546_s25, [#allocation4]  }
 0xd1b   :  { %5897 = dma.done.wait [#allocation4], 32  }
 0xd1c   :  { %5898 = vsyncadd [#allocation4], 4294967264 }
 0xd1d   :  { %4372 = vsyncpa [#allocation3], 1 }
 0xd1e   :  { %4373 = vsyncpa [#allocation6], 1 }
 0xd1f   :  { %4374 = vsyncpa [#allocation9], 1 }
 0xd20   :  { %4375 = vsyncpa [#allocation12], 1 }
 0xd21   :  { %4376 = vsyncpa [#allocation4], 1 }

</bundles_post_ra>
